<compile_context>
chip_gen: v7x
topology: tpu7x:2x2x1
jax: 0.10.0
libtpu: 0.0.40
codegen_flags: <defaults>
</compile_context>

<pallas_src>
import jax
import jax.numpy as jnp
from jax import lax
from jax.experimental import pallas as pl
from jax.experimental.pallas import tpu as pltpu

# ------------------------- module hyper-parameters (defaults) -------------------------
INPUT_DIM = 256                  # pose encoder width
GLOBAL_COND_DIM = 1024           # per-geometry embedding dim
DIFF_EMB_DIM = 128               # diffusion_step_embed_dim
FUSION_PROJ_DIM = 512            # fusion_projection_dim
FUSION_DIM = DIFF_EMB_DIM + INPUT_DIM + 2 * GLOBAL_COND_DIM   # 2432
BN_EPS = 1e-5
NUM_HEADS = 3                    # grid axis: 0 = trans, 1 = rot_x, 2 = rot_y

# Row offsets of the concat segments inside W1 (all 32- and 128-row aligned).
SEG_G1 = 0
SEG_G2 = GLOBAL_COND_DIM                          # 1024
SEG_DIFF = 2 * GLOBAL_COND_DIM                    # 2048
SEG_POSE = 2 * GLOBAL_COND_DIM + DIFF_EMB_DIM     # 2176


# ----------------------------------- Pallas kernel ------------------------------------
def parallel_mlp_head_kernel(
    # shared activations (bf16)
    t_emb_ref, sample_ref, geo1_ref, geo2_ref,
    # diffusion_step_encoder + pose_encoder weights (shared, bf16 W / f32 b)
    wd_ref, bd_ref, wp1_ref, bp1_ref, wp2_ref, bp2_ref,
    # per-head fusion params (stacked on a leading head axis, selected by BlockSpec)
    w1_ref, s1_ref, b1_ref, bn1g_ref, bn1b_ref,   # int8 W1 + dequant scale + bias + BN1
    w2_ref, s2_ref, b2_ref, bn2g_ref, bn2b_ref,   # int8 W2 + dequant scale + bias + BN2 (rot heads)
    w3_ref, b3_ref,                               # bf16 Linear(512->3)
    # output block for this head: (B, 3)
    out_ref,
    # VMEM scratch holding the input to the final Linear
    hbuf_ref,
):
    f32 = jnp.float32
    bf16 = jnp.bfloat16

    def lin(x_bf16, w_ref, b_ref):
        # bf16 MXU matmul with f32 accumulation; bias add in f32.
        return jnp.dot(x_bf16, w_ref[...], preferred_element_type=f32) + b_ref[...]

    def bn(h, g_ref, b_ref):
        # nn.BatchNorm1d training-mode: batch statistics, biased variance, f32 math.
        mean = jnp.mean(h, axis=0, keepdims=True)
        var = jnp.mean(jnp.square(h - mean), axis=0, keepdims=True)
        return (h - mean) * lax.rsqrt(var + BN_EPS) * g_ref[...] + b_ref[...]

    def relu(x):
        return jnp.maximum(x, 0.0)

    # Small encoders (recomputed per head step; trivially cheap, keeps head steps independent).
    diff = relu(lin(t_emb_ref[...], wd_ref, bd_ref)).astype(bf16)        # [B, 128]
    px = relu(lin(sample_ref[...], wp1_ref, bp1_ref)).astype(bf16)       # [B, 256]
    px = relu(lin(px, wp2_ref, bp2_ref)).astype(bf16)                    # [B, 256]

    # Fusion layer 1: total_feat = cat([geo1, geo2, diff, px]) is never materialized —
    # W1 is sliced by concat row-segment (all offsets 32/128-row aligned -> views, not copies),
    # each int8 segment is cast to bf16 in-VMEM, and the per-output-column dequant scale is
    # applied once to the summed result (column scaling commutes out of the matmul).
    def seg_dot(x_bf16, lo, hi):
        return jnp.dot(x_bf16, w1_ref[lo:hi, :].astype(bf16),
                       preferred_element_type=f32)

    z = (seg_dot(geo1_ref[...], SEG_G1, SEG_G2)
         + seg_dot(geo2_ref[...], SEG_G2, SEG_DIFF)
         + seg_dot(diff, SEG_DIFF, SEG_POSE)
         + seg_dot(px, SEG_POSE, FUSION_DIM)) * s1_ref[...] + b1_ref[...]
    h1 = relu(bn(z, bn1g_ref, bn1b_ref))                                 # [B, 512] f32

    # Fusion layer 2: only the rotation heads (program_id > 0) have it; the trans head
    # bypasses.  pl.when-gated (skipped at runtime for head 0) so any non-finite value in the
    # head-0-aliased W2/BN2 params cannot leak into the trans output.
    hbuf_ref[...] = h1
    @pl.when(pl.program_id(0) > 0)
    def _():
        z2 = (jnp.dot(h1.astype(bf16), w2_ref[...].astype(bf16),
                      preferred_element_type=f32) * s2_ref[...] + b2_ref[...])
        hbuf_ref[...] = relu(bn(z2, bn2g_ref, bn2b_ref))

    # Final Linear(512 -> 3); one full-block store for this head's output.
    out_ref[...] = lin(hbuf_ref[...].astype(bf16), w3_ref, b3_ref)


# -------------------------------------- glue ------------------------------------------
def positional_embedding(t, num_channels=DIFF_EMB_DIM, max_positions=10000):
    """EDM-style PositionalEmbedding: [cos(t*f) || sin(t*f)]."""
    half = num_channels // 2
    freqs = jnp.arange(half, dtype=jnp.float32) / float(half)
    freqs = (1.0 / max_positions) ** freqs
    x = t.astype(jnp.float32)[:, None] * freqs[None, :]
    return jnp.concatenate([jnp.cos(x), jnp.sin(x)], axis=1)


def init_params(key):
    """Deterministic parameter init with the shapes implied by ParallelMLP.__init__."""
    def lin_params(key, fan_in, fan_out, scale=0.02):
        kw, kb = jax.random.split(key)
        w = scale * jax.random.normal(kw, (fan_in, fan_out), jnp.float32)
        b = scale * jax.random.normal(kb, (1, fan_out), jnp.float32)
        return w, b

    def bn_params(key, dim):
        kg, kb = jax.random.split(key)
        gamma = 1.0 + 0.01 * jax.random.normal(kg, (1, dim), jnp.float32)
        beta = 0.01 * jax.random.normal(kb, (1, dim), jnp.float32)
        return gamma, beta

    keys = iter(jax.random.split(key, 32))
    p = {}
    # diffusion_step_encoder Linear(128,128)
    p["wd"], p["bd"] = lin_params(next(keys), DIFF_EMB_DIM, DIFF_EMB_DIM)
    # pose_encoder
    p["wp1"], p["bp1"] = lin_params(next(keys), 9, INPUT_DIM)
    p["wp2"], p["bp2"] = lin_params(next(keys), INPUT_DIM, INPUT_DIM)

    def head(prefix, has_second):
        p[prefix + "w1"], p[prefix + "b1"] = lin_params(next(keys), FUSION_DIM, FUSION_PROJ_DIM)
        p[prefix + "g1"], p[prefix + "be1"] = bn_params(next(keys), FUSION_PROJ_DIM)
        if has_second:
            p[prefix + "w2"], p[prefix + "b2"] = lin_params(next(keys), FUSION_PROJ_DIM, FUSION_PROJ_DIM)
            p[prefix + "g2"], p[prefix + "be2"] = bn_params(next(keys), FUSION_PROJ_DIM)
        # reference module uses init_zero here; random-init so output is non-trivial
        p[prefix + "w3"], p[prefix + "b3"] = lin_params(next(keys), FUSION_PROJ_DIM, 3)

    head("rx_", True)    # fusion_tail_rot_x
    head("ry_", True)    # fusion_tail_rot_y
    head("tr_", False)   # fusion_tail_trans (no second Linear/BN)
    return p


def quantize_int8_per_col(w):
    """Symmetric per-output-column int8 quantization (column axis = last axis)."""
    amax = jnp.max(jnp.abs(w), axis=-2, keepdims=True)
    scale = jnp.maximum(amax, 1e-8) / 127.0
    q = jnp.clip(jnp.round(w / scale), -127.0, 127.0).astype(jnp.int8)
    return q, scale.astype(jnp.float32)


def pack_params(p):
    """Quantize the big fusion weights to int8, cast small weights to bf16, and stack the
    per-head params along a leading head axis.

    Head order is (trans, rot_x, rot_y) so the output block index equals the head index and
    matches torch.cat([trans, rot_x, rot_y], dim=-1).  The second-layer stack only has the two
    rotation heads (trans has none); its BlockSpec index_map maps head 0 -> slot 0 (content
    unused: pl.when gates the second layer off for head 0).
    """
    bf16 = jnp.bfloat16
    w1_q, s1 = quantize_int8_per_col(
        jnp.stack([p["tr_w1"], p["rx_w1"], p["ry_w1"]]))                 # [3, 2432, 512] i8
    w2_q, s2 = quantize_int8_per_col(
        jnp.stack([p["rx_w2"], p["ry_w2"]]))                             # [2, 512, 512] i8
    return (
        p["wd"].astype(bf16), p["bd"],
        p["wp1"].astype(bf16), p["bp1"],
        p["wp2"].astype(bf16), p["bp2"],
        w1_q, s1,                                                        # i8 W1, [3,1,512] scale
        jnp.stack([p["tr_b1"], p["rx_b1"], p["ry_b1"]]),                 # [3, 1, 512]
        jnp.stack([p["tr_g1"], p["rx_g1"], p["ry_g1"]]),
        jnp.stack([p["tr_be1"], p["rx_be1"], p["ry_be1"]]),
        w2_q, s2,                                                        # i8 W2, [2,1,512] scale
        jnp.stack([p["rx_b2"], p["ry_b2"]]),
        jnp.stack([p["rx_g2"], p["ry_g2"]]),
        jnp.stack([p["rx_be2"], p["ry_be2"]]),
        jnp.stack([p["tr_w3"], p["rx_w3"], p["ry_w3"]]).astype(bf16),    # [3, 512, 3]
        jnp.stack([p["tr_b3"], p["rx_b3"], p["ry_b3"]]),                 # [3, 1, 3]
    )


@jax.jit
def parallel_mlp_forward(sample, timestep, geo1, geo2, packed):
    """sample: [B,9] f32, timestep: scalar int, geo1/geo2: [B,1024] geometry embeddings."""
    B = sample.shape[0]
    bf16 = jnp.bfloat16
    timesteps = jnp.broadcast_to(jnp.asarray(timestep, jnp.int32).reshape(-1), (B,))
    # Pre-cast shared activations to bf16 once in the wrapper (drops 3x per-head in-kernel casts).
    t_emb = positional_embedding(timesteps).astype(bf16)                 # [B, 128]
    sample_b = sample.astype(bf16)
    geo1_b = geo1.astype(bf16)
    geo2_b = geo2.astype(bf16)

    (wd, bd, wp1, bp1, wp2, bp2,
     w1_q, s1_s, b1_s, bn1g_s, bn1b_s,
     w2_q, s2_s, b2_s, bn2g_s, bn2b_s,
     w3_s, b3_s) = packed

    inputs = (t_emb, sample_b, geo1_b, geo2_b,
              wd, bd, wp1, bp1, wp2, bp2,
              w1_q, s1_s, b1_s, bn1g_s, bn1b_s,
              w2_q, s2_s, b2_s, bn2g_s, bn2b_s,
              w3_s, b3_s)

    # Shared arrays: constant index_map -> block index never changes -> DMA'd once.
    def shared(shape):
        return pl.BlockSpec(shape, lambda i, _n=len(shape): (0,) * _n)

    # Per-head stacks of size 3 (trans, rot_x, rot_y): leading dim squeezed, selected by i.
    def head3(shape):
        return pl.BlockSpec((None,) + shape, lambda i, _n=len(shape): (i,) + (0,) * _n)

    # Per-head stacks of size 2 (rot_x, rot_y only): head 0 (trans) aliases slot 0 (its use is
    # pl.when-gated off); consecutive equal block indices (heads 0 and 1) skip the re-DMA.
    def head2(shape):
        return pl.BlockSpec(
            (None,) + shape,
            lambda i, _n=len(shape): (jnp.maximum(i - 1, 0),) + (0,) * _n)

    in_specs = [
        shared((B, DIFF_EMB_DIM)), shared((B, 9)),
        shared((B, GLOBAL_COND_DIM)), shared((B, GLOBAL_COND_DIM)),
        shared((DIFF_EMB_DIM, DIFF_EMB_DIM)), shared((1, DIFF_EMB_DIM)),
        shared((9, INPUT_DIM)), shared((1, INPUT_DIM)),
        shared((INPUT_DIM, INPUT_DIM)), shared((1, INPUT_DIM)),
        head3((FUSION_DIM, FUSION_PROJ_DIM)), head3((1, FUSION_PROJ_DIM)),
        head3((1, FUSION_PROJ_DIM)), head3((1, FUSION_PROJ_DIM)), head3((1, FUSION_PROJ_DIM)),
        head2((FUSION_PROJ_DIM, FUSION_PROJ_DIM)), head2((1, FUSION_PROJ_DIM)),
        head2((1, FUSION_PROJ_DIM)), head2((1, FUSION_PROJ_DIM)), head2((1, FUSION_PROJ_DIM)),
        head3((FUSION_PROJ_DIM, 3)), head3((1, 3)),
    ]
    out_spec = pl.BlockSpec((None, B, 3), lambda i: (i, 0, 0))

    # Advisory cost estimate so XLA schedules surrounding ops sensibly.
    flops = (2 * B * NUM_HEADS * (
                 DIFF_EMB_DIM * DIFF_EMB_DIM + 9 * INPUT_DIM + INPUT_DIM * INPUT_DIM
                 + FUSION_DIM * FUSION_PROJ_DIM + FUSION_PROJ_DIM * 3)
             + 2 * B * 2 * FUSION_PROJ_DIM * FUSION_PROJ_DIM)
    bytes_accessed = (sum(int(a.size) * a.dtype.itemsize for a in inputs)
                      + NUM_HEADS * B * 3 * 4)
    cost = pl.CostEstimate(flops=flops,
                           transcendentals=5 * FUSION_PROJ_DIM,
                           bytes_accessed=bytes_accessed)

    out_heads = pl.pallas_call(
        parallel_mlp_head_kernel,
        out_shape=jax.ShapeDtypeStruct((NUM_HEADS, B, 3), jnp.float32),
        grid=(NUM_HEADS,),
        in_specs=in_specs,
        out_specs=out_spec,
        scratch_shapes=[pltpu.VMEM((B, FUSION_PROJ_DIM), jnp.float32)],
        compiler_params=pltpu.CompilerParams(
            # Heads are independent -> megacore shards the weight stream on v7x
            # (2:1 head split caps dual-TC gain at ~1.6x; accepted at tiny B).
            dimension_semantics=("parallel",),
            # Actual per-step peak with int8 weights is ~5 MiB (2 x 1.2 MiB W1 double-buffer
            # + 2 x 0.25 MiB W2 + bf16 convert temps + shared activations); 16 MiB leaves
            # headroom for larger B without squeezing neighbouring fusions on v7x's 64 MiB.
            vmem_limit_bytes=16 * 1024 * 1024),
        cost_estimate=cost,
    )(*inputs)                                                          # [3, B, 3]

    # Per-row concat order [trans, rot_x, rot_y] -> [B, 9].
    return jnp.transpose(out_heads, (1, 0, 2)).reshape(B, 9)


# -------------------------------------- main ------------------------------------------
if __name__ == "__main__":
    B = 8   # small demo batch; the kernel handles any B (bigger B amortizes the weight DMA)
    key = jax.random.PRNGKey(0)
    k_sample, k_g1, k_g2, k_params = jax.random.split(key, 4)

    sample = jax.random.normal(k_sample, (B, 9), jnp.float32)            # 9-D pose sample
    geo1 = jax.random.normal(k_g1, (B, GLOBAL_COND_DIM), jnp.float32)    # geometry embedding 1
    geo2 = jax.random.normal(k_g2, (B, GLOBAL_COND_DIM), jnp.float32)    # geometry embedding 2
    timestep = 10
    params = init_params(k_params)
    packed = pack_params(params)   # int8 weight quantization + per-head stacking, done once

    out = parallel_mlp_forward(sample, timestep, geo1, geo2, packed)
    out = jax.block_until_ready(out)
    assert out.shape == (B, 9) and out.dtype == jnp.float32
    assert bool(jnp.all(jnp.isfinite(out)))
    print("KERNEL_OK")
</pallas_src>

<mosaic_0001>
module attributes {stable_mosaic.version = 11 : i64} {
  func.func @parallel_mlp_head_kernel(%arg0: i32, %arg1: memref<8x128xbf16, #tpu.memory_space<vmem>>, %arg2: memref<8x9xbf16, #tpu.memory_space<vmem>>, %arg3: memref<8x1024xbf16, #tpu.memory_space<vmem>>, %arg4: memref<8x1024xbf16, #tpu.memory_space<vmem>>, %arg5: memref<128x128xbf16, #tpu.memory_space<vmem>>, %arg6: memref<1x128xf32, #tpu.memory_space<vmem>>, %arg7: memref<9x256xbf16, #tpu.memory_space<vmem>>, %arg8: memref<1x256xf32, #tpu.memory_space<vmem>>, %arg9: memref<256x256xbf16, #tpu.memory_space<vmem>>, %arg10: memref<1x256xf32, #tpu.memory_space<vmem>>, %arg11: memref<1x2432x512xi8, #tpu.memory_space<vmem>>, %arg12: memref<1x1x512xf32, #tpu.memory_space<vmem>>, %arg13: memref<1x1x512xf32, #tpu.memory_space<vmem>>, %arg14: memref<1x1x512xf32, #tpu.memory_space<vmem>>, %arg15: memref<1x1x512xf32, #tpu.memory_space<vmem>>, %arg16: memref<1x512x512xi8, #tpu.memory_space<vmem>>, %arg17: memref<1x1x512xf32, #tpu.memory_space<vmem>>, %arg18: memref<1x1x512xf32, #tpu.memory_space<vmem>>, %arg19: memref<1x1x512xf32, #tpu.memory_space<vmem>>, %arg20: memref<1x1x512xf32, #tpu.memory_space<vmem>>, %arg21: memref<1x512x3xbf16, #tpu.memory_space<vmem>>, %arg22: memref<1x1x3xf32, #tpu.memory_space<vmem>>, %arg23: memref<1x8x3xf32, #tpu.memory_space<vmem>>, %arg24: memref<8x512xf32, #tpu.memory_space<vmem>>) attributes {dimension_semantics = [#tpu.dimension_semantics<parallel>], iteration_bounds = array<i64: 3>, scalar_prefetch = 0 : i64, scratch_operands = 1 : i64, tpu.core_type = #tpu.core_type<tc>, window_params = [{pipeline_mode = #tpu.pipeline_mode<synchronous>, transform_indices = @transform_0, window_bounds = array<i64: 8, 128>}, {pipeline_mode = #tpu.pipeline_mode<synchronous>, transform_indices = @transform_1, window_bounds = array<i64: 8, 9>}, {pipeline_mode = #tpu.pipeline_mode<synchronous>, transform_indices = @transform_2, window_bounds = array<i64: 8, 1024>}, {pipeline_mode = #tpu.pipeline_mode<synchronous>, transform_indices = @transform_3, window_bounds = array<i64: 8, 1024>}, {pipeline_mode = #tpu.pipeline_mode<synchronous>, transform_indices = @transform_4, window_bounds = array<i64: 128, 128>}, {pipeline_mode = #tpu.pipeline_mode<synchronous>, transform_indices = @transform_5, window_bounds = array<i64: 1, 128>}, {pipeline_mode = #tpu.pipeline_mode<synchronous>, transform_indices = @transform_6, window_bounds = array<i64: 9, 256>}, {pipeline_mode = #tpu.pipeline_mode<synchronous>, transform_indices = @transform_7, window_bounds = array<i64: 1, 256>}, {pipeline_mode = #tpu.pipeline_mode<synchronous>, transform_indices = @transform_8, window_bounds = array<i64: 256, 256>}, {pipeline_mode = #tpu.pipeline_mode<synchronous>, transform_indices = @transform_9, window_bounds = array<i64: 1, 256>}, {transform_indices = @transform_10, window_bounds = array<i64: 1, 2432, 512>}, {transform_indices = @transform_11, window_bounds = array<i64: 1, 1, 512>}, {transform_indices = @transform_12, window_bounds = array<i64: 1, 1, 512>}, {transform_indices = @transform_13, window_bounds = array<i64: 1, 1, 512>}, {transform_indices = @transform_14, window_bounds = array<i64: 1, 1, 512>}, {transform_indices = @transform_15, window_bounds = array<i64: 1, 512, 512>}, {transform_indices = @transform_16, window_bounds = array<i64: 1, 1, 512>}, {transform_indices = @transform_17, window_bounds = array<i64: 1, 1, 512>}, {transform_indices = @transform_18, window_bounds = array<i64: 1, 1, 512>}, {transform_indices = @transform_19, window_bounds = array<i64: 1, 1, 512>}, {transform_indices = @transform_20, window_bounds = array<i64: 1, 512, 3>}, {transform_indices = @transform_21, window_bounds = array<i64: 1, 1, 3>}, {transform_indices = @transform_22, window_bounds = array<i64: 1, 8, 3>}]} {
    %c0 = arith.constant 0 : index
    %c0_0 = arith.constant 0 : index
    %0 = vector.load %arg1[%c0, %c0_0] : memref<8x128xbf16, #tpu.memory_space<vmem>>, vector<8x128xbf16>
    %c0_1 = arith.constant 0 : index
    %c0_2 = arith.constant 0 : index
    %1 = vector.load %arg5[%c0_1, %c0_2] : memref<128x128xbf16, #tpu.memory_space<vmem>>, vector<128x128xbf16>
    %cst = arith.constant dense<0.000000e+00> : vector<8x128xf32>
    %2 = tpu.matmul %0, %1, %cst {dimension_numbers = #tpu.dot_dimension_numbers<[1], [0], [0], [1], [0, 0, 1, 1], [], []>} : vector<8x128xbf16>, vector<128x128xbf16>, vector<8x128xf32> -> vector<8x128xf32>
    %c0_3 = arith.constant 0 : index
    %c0_4 = arith.constant 0 : index
    %3 = vector.load %arg6[%c0_3, %c0_4] : memref<1x128xf32, #tpu.memory_space<vmem>>, vector<1x128xf32>
    %4 = vector.broadcast %3 : vector<1x128xf32> to vector<8x128xf32>
    %5 = arith.addf %2, %4 : vector<8x128xf32>
    %cst_5 = arith.constant 0.000000e+00 : f32
    %6 = vector.broadcast %cst_5 : f32 to vector<8x128xf32>
    %7 = arith.maximumf %5, %6 : vector<8x128xf32>
    %8 = arith.truncf %7 : vector<8x128xf32> to vector<8x128xbf16>
    %c0_6 = arith.constant 0 : index
    %c0_7 = arith.constant 0 : index
    %9 = vector.load %arg2[%c0_6, %c0_7] : memref<8x9xbf16, #tpu.memory_space<vmem>>, vector<8x9xbf16>
    %c0_8 = arith.constant 0 : index
    %c0_9 = arith.constant 0 : index
    %10 = vector.load %arg7[%c0_8, %c0_9] : memref<9x256xbf16, #tpu.memory_space<vmem>>, vector<9x256xbf16>
    %cst_10 = arith.constant dense<0.000000e+00> : vector<8x256xf32>
    %11 = tpu.matmul %9, %10, %cst_10 {dimension_numbers = #tpu.dot_dimension_numbers<[1], [0], [0], [1], [0, 0, 1, 1], [], []>} : vector<8x9xbf16>, vector<9x256xbf16>, vector<8x256xf32> -> vector<8x256xf32>
    %c0_11 = arith.constant 0 : index
    %c0_12 = arith.constant 0 : index
    %12 = vector.load %arg8[%c0_11, %c0_12] : memref<1x256xf32, #tpu.memory_space<vmem>>, vector<1x256xf32>
    %13 = vector.broadcast %12 : vector<1x256xf32> to vector<8x256xf32>
    %14 = arith.addf %11, %13 : vector<8x256xf32>
    %cst_13 = arith.constant 0.000000e+00 : f32
    %15 = vector.broadcast %cst_13 : f32 to vector<8x256xf32>
    %16 = arith.maximumf %14, %15 : vector<8x256xf32>
    %17 = arith.truncf %16 : vector<8x256xf32> to vector<8x256xbf16>
    %c0_14 = arith.constant 0 : index
    %c0_15 = arith.constant 0 : index
    %18 = vector.load %arg9[%c0_14, %c0_15] : memref<256x256xbf16, #tpu.memory_space<vmem>>, vector<256x256xbf16>
    %cst_16 = arith.constant dense<0.000000e+00> : vector<8x256xf32>
    %19 = tpu.matmul %17, %18, %cst_16 {dimension_numbers = #tpu.dot_dimension_numbers<[1], [0], [0], [1], [0, 0, 1, 1], [], []>} : vector<8x256xbf16>, vector<256x256xbf16>, vector<8x256xf32> -> vector<8x256xf32>
    %c0_17 = arith.constant 0 : index
    %c0_18 = arith.constant 0 : index
    %20 = vector.load %arg10[%c0_17, %c0_18] : memref<1x256xf32, #tpu.memory_space<vmem>>, vector<1x256xf32>
    %21 = vector.broadcast %20 : vector<1x256xf32> to vector<8x256xf32>
    %22 = arith.addf %19, %21 : vector<8x256xf32>
    %cst_19 = arith.constant 0.000000e+00 : f32
    %23 = vector.broadcast %cst_19 : f32 to vector<8x256xf32>
    %24 = arith.maximumf %22, %23 : vector<8x256xf32>
    %25 = arith.truncf %24 : vector<8x256xf32> to vector<8x256xbf16>
    %c0_20 = arith.constant 0 : index
    %c0_21 = arith.constant 0 : index
    %26 = vector.load %arg3[%c0_20, %c0_21] : memref<8x1024xbf16, #tpu.memory_space<vmem>>, vector<8x1024xbf16>
    %c0_22 = arith.constant 0 : index
    %c0_23 = arith.constant 0 : index
    %c0_24 = arith.constant 0 : index
    %27 = vector.load %arg11[%c0_22, %c0_23, %c0_24] : memref<1x2432x512xi8, #tpu.memory_space<vmem>>, vector<1x1024x512xi8>
    %28 = vector.shape_cast %27 : vector<1x1024x512xi8> to vector<1024x512xi8>
    %29 = arith.sitofp %28 : vector<1024x512xi8> to vector<1024x512xbf16>
    %cst_25 = arith.constant dense<0.000000e+00> : vector<8x512xf32>
    %30 = tpu.matmul %26, %29, %cst_25 {dimension_numbers = #tpu.dot_dimension_numbers<[1], [0], [0], [1], [0, 0, 1, 1], [], []>} : vector<8x1024xbf16>, vector<1024x512xbf16>, vector<8x512xf32> -> vector<8x512xf32>
    %c0_26 = arith.constant 0 : index
    %c0_27 = arith.constant 0 : index
    %31 = vector.load %arg4[%c0_26, %c0_27] : memref<8x1024xbf16, #tpu.memory_space<vmem>>, vector<8x1024xbf16>
    %c0_28 = arith.constant 0 : index
    %c1024 = arith.constant 1024 : index
    %c0_29 = arith.constant 0 : index
    %32 = vector.load %arg11[%c0_28, %c1024, %c0_29] : memref<1x2432x512xi8, #tpu.memory_space<vmem>>, vector<1x1024x512xi8>
    %33 = vector.shape_cast %32 : vector<1x1024x512xi8> to vector<1024x512xi8>
    %34 = arith.sitofp %33 : vector<1024x512xi8> to vector<1024x512xbf16>
    %cst_30 = arith.constant dense<0.000000e+00> : vector<8x512xf32>
    %35 = tpu.matmul %31, %34, %cst_30 {dimension_numbers = #tpu.dot_dimension_numbers<[1], [0], [0], [1], [0, 0, 1, 1], [], []>} : vector<8x1024xbf16>, vector<1024x512xbf16>, vector<8x512xf32> -> vector<8x512xf32>
    %36 = arith.addf %30, %35 : vector<8x512xf32>
    %c0_31 = arith.constant 0 : index
    %c2048 = arith.constant 2048 : index
    %c0_32 = arith.constant 0 : index
    %37 = vector.load %arg11[%c0_31, %c2048, %c0_32] : memref<1x2432x512xi8, #tpu.memory_space<vmem>>, vector<1x128x512xi8>
    %38 = vector.shape_cast %37 : vector<1x128x512xi8> to vector<128x512xi8>
    %39 = arith.sitofp %38 : vector<128x512xi8> to vector<128x512xbf16>
    %cst_33 = arith.constant dense<0.000000e+00> : vector<8x512xf32>
    %40 = tpu.matmul %8, %39, %cst_33 {dimension_numbers = #tpu.dot_dimension_numbers<[1], [0], [0], [1], [0, 0, 1, 1], [], []>} : vector<8x128xbf16>, vector<128x512xbf16>, vector<8x512xf32> -> vector<8x512xf32>
    %41 = arith.addf %36, %40 : vector<8x512xf32>
    %c0_34 = arith.constant 0 : index
    %c2176 = arith.constant 2176 : index
    %c0_35 = arith.constant 0 : index
    %42 = vector.load %arg11[%c0_34, %c2176, %c0_35] : memref<1x2432x512xi8, #tpu.memory_space<vmem>>, vector<1x256x512xi8>
    %43 = vector.shape_cast %42 : vector<1x256x512xi8> to vector<256x512xi8>
    %44 = arith.sitofp %43 : vector<256x512xi8> to vector<256x512xbf16>
    %cst_36 = arith.constant dense<0.000000e+00> : vector<8x512xf32>
    %45 = tpu.matmul %25, %44, %cst_36 {dimension_numbers = #tpu.dot_dimension_numbers<[1], [0], [0], [1], [0, 0, 1, 1], [], []>} : vector<8x256xbf16>, vector<256x512xbf16>, vector<8x512xf32> -> vector<8x512xf32>
    %46 = arith.addf %41, %45 : vector<8x512xf32>
    %c0_37 = arith.constant 0 : index
    %c0_38 = arith.constant 0 : index
    %c0_39 = arith.constant 0 : index
    %47 = vector.load %arg12[%c0_37, %c0_38, %c0_39] : memref<1x1x512xf32, #tpu.memory_space<vmem>>, vector<1x1x512xf32>
    %48 = vector.shape_cast %47 : vector<1x1x512xf32> to vector<1x512xf32>
    %49 = vector.broadcast %48 : vector<1x512xf32> to vector<8x512xf32>
    %50 = arith.mulf %46, %49 : vector<8x512xf32>
    %c0_40 = arith.constant 0 : index
    %c0_41 = arith.constant 0 : index
    %c0_42 = arith.constant 0 : index
    %51 = vector.load %arg13[%c0_40, %c0_41, %c0_42] : memref<1x1x512xf32, #tpu.memory_space<vmem>>, vector<1x1x512xf32>
    %52 = vector.shape_cast %51 : vector<1x1x512xf32> to vector<1x512xf32>
    %53 = vector.broadcast %52 : vector<1x512xf32> to vector<8x512xf32>
    %54 = arith.addf %50, %53 : vector<8x512xf32>
    %cst_43 = arith.constant dense<0.000000e+00> : vector<512xf32>
    %55 = vector.multi_reduction <add>, %54, %cst_43 [0] : vector<8x512xf32> to vector<512xf32>
    %56 = vector.shape_cast %55 : vector<512xf32> to vector<1x512xf32>
    %cst_44 = arith.constant 8.000000e+00 : f32
    %57 = vector.broadcast %cst_44 : f32 to vector<1x512xf32>
    %58 = arith.divf %56, %57 : vector<1x512xf32>
    %59 = vector.broadcast %58 : vector<1x512xf32> to vector<8x512xf32>
    %60 = arith.subf %54, %59 : vector<8x512xf32>
    %61 = arith.mulf %60, %60 : vector<8x512xf32>
    %cst_45 = arith.constant dense<0.000000e+00> : vector<512xf32>
    %62 = vector.multi_reduction <add>, %61, %cst_45 [0] : vector<8x512xf32> to vector<512xf32>
    %63 = vector.shape_cast %62 : vector<512xf32> to vector<1x512xf32>
    %cst_46 = arith.constant 8.000000e+00 : f32
    %64 = vector.broadcast %cst_46 : f32 to vector<1x512xf32>
    %65 = arith.divf %63, %64 : vector<1x512xf32>
    %66 = vector.broadcast %58 : vector<1x512xf32> to vector<8x512xf32>
    %67 = arith.subf %54, %66 : vector<8x512xf32>
    %cst_47 = arith.constant 9.99999974E-6 : f32
    %68 = vector.broadcast %cst_47 : f32 to vector<1x512xf32>
    %69 = arith.addf %65, %68 : vector<1x512xf32>
    %70 = math.rsqrt %69 : vector<1x512xf32>
    %71 = vector.broadcast %70 : vector<1x512xf32> to vector<8x512xf32>
    %72 = arith.mulf %67, %71 : vector<8x512xf32>
    %c0_48 = arith.constant 0 : index
    %c0_49 = arith.constant 0 : index
    %c0_50 = arith.constant 0 : index
    %73 = vector.load %arg14[%c0_48, %c0_49, %c0_50] : memref<1x1x512xf32, #tpu.memory_space<vmem>>, vector<1x1x512xf32>
    %74 = vector.shape_cast %73 : vector<1x1x512xf32> to vector<1x512xf32>
    %75 = vector.broadcast %74 : vector<1x512xf32> to vector<8x512xf32>
    %76 = arith.mulf %72, %75 : vector<8x512xf32>
    %c0_51 = arith.constant 0 : index
    %c0_52 = arith.constant 0 : index
    %c0_53 = arith.constant 0 : index
    %77 = vector.load %arg15[%c0_51, %c0_52, %c0_53] : memref<1x1x512xf32, #tpu.memory_space<vmem>>, vector<1x1x512xf32>
    %78 = vector.shape_cast %77 : vector<1x1x512xf32> to vector<1x512xf32>
    %79 = vector.broadcast %78 : vector<1x512xf32> to vector<8x512xf32>
    %80 = arith.addf %76, %79 : vector<8x512xf32>
    %cst_54 = arith.constant 0.000000e+00 : f32
    %81 = vector.broadcast %cst_54 : f32 to vector<8x512xf32>
    %82 = arith.maximumf %80, %81 : vector<8x512xf32>
    %c0_55 = arith.constant 0 : index
    %c0_56 = arith.constant 0 : index
    %83 = vector.load %arg24[%c0_55, %c0_56] : memref<8x512xf32, #tpu.memory_space<vmem>>, vector<8x512xf32>
    tpu.vector_store %arg24[%c0_55, %c0_56], %82 {strides = array<i32>} : memref<8x512xf32, #tpu.memory_space<vmem>>, vector<8x512xf32>,
    %c0_i32 = arith.constant 0 : i32
    %84 = arith.cmpi sgt, %arg0, %c0_i32 : i32
    %85 = arith.extui %84 : i1 to i32
    %c0_i32_57 = arith.constant 0 : i32
    %86 = arith.cmpi ne, %85, %c0_i32_57 : i32
    scf.if %86 {
      %99 = arith.truncf %82 : vector<8x512xf32> to vector<8x512xbf16>
      %c0_70 = arith.constant 0 : index
      %c0_71 = arith.constant 0 : index
      %c0_72 = arith.constant 0 : index
      %100 = vector.load %arg16[%c0_70, %c0_71, %c0_72] : memref<1x512x512xi8, #tpu.memory_space<vmem>>, vector<1x512x512xi8>
      %101 = vector.shape_cast %100 : vector<1x512x512xi8> to vector<512x512xi8>
      %102 = arith.sitofp %101 : vector<512x512xi8> to vector<512x512xbf16>
      %cst_73 = arith.constant dense<0.000000e+00> : vector<8x512xf32>
      %103 = tpu.matmul %99, %102, %cst_73 {dimension_numbers = #tpu.dot_dimension_numbers<[1], [0], [0], [1], [0, 0, 1, 1], [], []>} : vector<8x512xbf16>, vector<512x512xbf16>, vector<8x512xf32> -> vector<8x512xf32>
      %c0_74 = arith.constant 0 : index
      %c0_75 = arith.constant 0 : index
      %c0_76 = arith.constant 0 : index
      %104 = vector.load %arg17[%c0_74, %c0_75, %c0_76] : memref<1x1x512xf32, #tpu.memory_space<vmem>>, vector<1x1x512xf32>
      %105 = vector.shape_cast %104 : vector<1x1x512xf32> to vector<1x512xf32>
      %106 = vector.broadcast %105 : vector<1x512xf32> to vector<8x512xf32>
      %107 = arith.mulf %103, %106 : vector<8x512xf32>
      %c0_77 = arith.constant 0 : index
      %c0_78 = arith.constant 0 : index
      %c0_79 = arith.constant 0 : index
      %108 = vector.load %arg18[%c0_77, %c0_78, %c0_79] : memref<1x1x512xf32, #tpu.memory_space<vmem>>, vector<1x1x512xf32>
      %109 = vector.shape_cast %108 : vector<1x1x512xf32> to vector<1x512xf32>
      %110 = vector.broadcast %109 : vector<1x512xf32> to vector<8x512xf32>
      %111 = arith.addf %107, %110 : vector<8x512xf32>
      %cst_80 = arith.constant dense<0.000000e+00> : vector<512xf32>
      %112 = vector.multi_reduction <add>, %111, %cst_80 [0] : vector<8x512xf32> to vector<512xf32>
      %113 = vector.shape_cast %112 : vector<512xf32> to vector<1x512xf32>
      %cst_81 = arith.constant 8.000000e+00 : f32
      %114 = vector.broadcast %cst_81 : f32 to vector<1x512xf32>
      %115 = arith.divf %113, %114 : vector<1x512xf32>
      %116 = vector.broadcast %115 : vector<1x512xf32> to vector<8x512xf32>
      %117 = arith.subf %111, %116 : vector<8x512xf32>
      %118 = arith.mulf %117, %117 : vector<8x512xf32>
      %cst_82 = arith.constant dense<0.000000e+00> : vector<512xf32>
      %119 = vector.multi_reduction <add>, %118, %cst_82 [0] : vector<8x512xf32> to vector<512xf32>
      %120 = vector.shape_cast %119 : vector<512xf32> to vector<1x512xf32>
      %cst_83 = arith.constant 8.000000e+00 : f32
      %121 = vector.broadcast %cst_83 : f32 to vector<1x512xf32>
      %122 = arith.divf %120, %121 : vector<1x512xf32>
      %123 = vector.broadcast %115 : vector<1x512xf32> to vector<8x512xf32>
      %124 = arith.subf %111, %123 : vector<8x512xf32>
      %cst_84 = arith.constant 9.99999974E-6 : f32
      %125 = vector.broadcast %cst_84 : f32 to vector<1x512xf32>
      %126 = arith.addf %122, %125 : vector<1x512xf32>
      %127 = math.rsqrt %126 : vector<1x512xf32>
      %128 = vector.broadcast %127 : vector<1x512xf32> to vector<8x512xf32>
      %129 = arith.mulf %124, %128 : vector<8x512xf32>
      %c0_85 = arith.constant 0 : index
      %c0_86 = arith.constant 0 : index
      %c0_87 = arith.constant 0 : index
      %130 = vector.load %arg19[%c0_85, %c0_86, %c0_87] : memref<1x1x512xf32, #tpu.memory_space<vmem>>, vector<1x1x512xf32>
      %131 = vector.shape_cast %130 : vector<1x1x512xf32> to vector<1x512xf32>
      %132 = vector.broadcast %131 : vector<1x512xf32> to vector<8x512xf32>
      %133 = arith.mulf %129, %132 : vector<8x512xf32>
      %c0_88 = arith.constant 0 : index
      %c0_89 = arith.constant 0 : index
      %c0_90 = arith.constant 0 : index
      %134 = vector.load %arg20[%c0_88, %c0_89, %c0_90] : memref<1x1x512xf32, #tpu.memory_space<vmem>>, vector<1x1x512xf32>
      %135 = vector.shape_cast %134 : vector<1x1x512xf32> to vector<1x512xf32>
      %136 = vector.broadcast %135 : vector<1x512xf32> to vector<8x512xf32>
      %137 = arith.addf %133, %136 : vector<8x512xf32>
      %cst_91 = arith.constant 0.000000e+00 : f32
      %138 = vector.broadcast %cst_91 : f32 to vector<8x512xf32>
      %139 = arith.maximumf %137, %138 : vector<8x512xf32>
      %c0_92 = arith.constant 0 : index
      %c0_93 = arith.constant 0 : index
      %140 = vector.load %arg24[%c0_92, %c0_93] : memref<8x512xf32, #tpu.memory_space<vmem>>, vector<8x512xf32>
      tpu.vector_store %arg24[%c0_92, %c0_93], %139 {strides = array<i32>} : memref<8x512xf32, #tpu.memory_space<vmem>>, vector<8x512xf32>,
    } else {
    }
    %c0_58 = arith.constant 0 : index
    %c0_59 = arith.constant 0 : index
    %87 = vector.load %arg24[%c0_58, %c0_59] : memref<8x512xf32, #tpu.memory_space<vmem>>, vector<8x512xf32>
    %88 = arith.truncf %87 : vector<8x512xf32> to vector<8x512xbf16>
    %c0_60 = arith.constant 0 : index
    %c0_61 = arith.constant 0 : index
    %c0_62 = arith.constant 0 : index
    %89 = vector.load %arg21[%c0_60, %c0_61, %c0_62] : memref<1x512x3xbf16, #tpu.memory_space<vmem>>, vector<1x512x3xbf16>
    %90 = vector.shape_cast %89 : vector<1x512x3xbf16> to vector<512x3xbf16>
    %cst_63 = arith.constant dense<0.000000e+00> : vector<8x3xf32>
    %91 = tpu.matmul %88, %90, %cst_63 {dimension_numbers = #tpu.dot_dimension_numbers<[1], [0], [0], [1], [0, 0, 1, 1], [], []>} : vector<8x512xbf16>, vector<512x3xbf16>, vector<8x3xf32> -> vector<8x3xf32>
    %c0_64 = arith.constant 0 : index
    %c0_65 = arith.constant 0 : index
    %c0_66 = arith.constant 0 : index
    %92 = vector.load %arg22[%c0_64, %c0_65, %c0_66] : memref<1x1x3xf32, #tpu.memory_space<vmem>>, vector<1x1x3xf32>
    %93 = vector.shape_cast %92 : vector<1x1x3xf32> to vector<1x3xf32>
    %94 = vector.broadcast %93 : vector<1x3xf32> to vector<8x3xf32>
    %95 = arith.addf %91, %94 : vector<8x3xf32>
    %c0_67 = arith.constant 0 : index
    %c0_68 = arith.constant 0 : index
    %c0_69 = arith.constant 0 : index
    %96 = vector.load %arg23[%c0_67, %c0_68, %c0_69] : memref<1x8x3xf32, #tpu.memory_space<vmem>>, vector<1x8x3xf32>
    %97 = vector.shape_cast %96 : vector<1x8x3xf32> to vector<8x3xf32>
    %98 = vector.shape_cast %95 : vector<8x3xf32> to vector<1x8x3xf32>
    tpu.vector_store %arg23[%c0_67, %c0_68, %c0_69], %98 {strides = array<i32>} : memref<1x8x3xf32, #tpu.memory_space<vmem>>, vector<1x8x3xf32>,
    return
  }
  func.func @transform_0(%arg0: i32) -> (i32, i32) {
    %c0_i32 = arith.constant 0 : i32
    %c0_i32_0 = arith.constant 0 : i32
    %c0_i32_1 = arith.constant 0 : i32
    return %c0_i32, %c0_i32_0 : i32, i32
  }
  func.func @transform_1(%arg0: i32) -> (i32, i32) {
    %c0_i32 = arith.constant 0 : i32
    %c0_i32_0 = arith.constant 0 : i32
    %c0_i32_1 = arith.constant 0 : i32
    return %c0_i32, %c0_i32_0 : i32, i32
  }
  func.func @transform_2(%arg0: i32) -> (i32, i32) {
    %c0_i32 = arith.constant 0 : i32
    %c0_i32_0 = arith.constant 0 : i32
    %c0_i32_1 = arith.constant 0 : i32
    return %c0_i32, %c0_i32_0 : i32, i32
  }
  func.func @transform_3(%arg0: i32) -> (i32, i32) {
    %c0_i32 = arith.constant 0 : i32
    %c0_i32_0 = arith.constant 0 : i32
    %c0_i32_1 = arith.constant 0 : i32
    return %c0_i32, %c0_i32_0 : i32, i32
  }
  func.func @transform_4(%arg0: i32) -> (i32, i32) {
    %c0_i32 = arith.constant 0 : i32
    %c0_i32_0 = arith.constant 0 : i32
    %c0_i32_1 = arith.constant 0 : i32
    return %c0_i32, %c0_i32_0 : i32, i32
  }
  func.func @transform_5(%arg0: i32) -> (i32, i32) {
    %c0_i32 = arith.constant 0 : i32
    %c0_i32_0 = arith.constant 0 : i32
    %c0_i32_1 = arith.constant 0 : i32
    return %c0_i32, %c0_i32_0 : i32, i32
  }
  func.func @transform_6(%arg0: i32) -> (i32, i32) {
    %c0_i32 = arith.constant 0 : i32
    %c0_i32_0 = arith.constant 0 : i32
    %c0_i32_1 = arith.constant 0 : i32
    return %c0_i32, %c0_i32_0 : i32, i32
  }
  func.func @transform_7(%arg0: i32) -> (i32, i32) {
    %c0_i32 = arith.constant 0 : i32
    %c0_i32_0 = arith.constant 0 : i32
    %c0_i32_1 = arith.constant 0 : i32
    return %c0_i32, %c0_i32_0 : i32, i32
  }
  func.func @transform_8(%arg0: i32) -> (i32, i32) {
    %c0_i32 = arith.constant 0 : i32
    %c0_i32_0 = arith.constant 0 : i32
    %c0_i32_1 = arith.constant 0 : i32
    return %c0_i32, %c0_i32_0 : i32, i32
  }
  func.func @transform_9(%arg0: i32) -> (i32, i32) {
    %c0_i32 = arith.constant 0 : i32
    %c0_i32_0 = arith.constant 0 : i32
    %c0_i32_1 = arith.constant 0 : i32
    return %c0_i32, %c0_i32_0 : i32, i32
  }
  func.func @transform_10(%arg0: i32) -> (i32, i32, i32) {
    %c0_i32 = arith.constant 0 : i32
    %c0_i32_0 = arith.constant 0 : i32
    %c0_i32_1 = arith.constant 0 : i32
    return %arg0, %c0_i32, %c0_i32_0 : i32, i32, i32
  }
  func.func @transform_11(%arg0: i32) -> (i32, i32, i32) {
    %c0_i32 = arith.constant 0 : i32
    %c0_i32_0 = arith.constant 0 : i32
    %c0_i32_1 = arith.constant 0 : i32
    return %arg0, %c0_i32, %c0_i32_0 : i32, i32, i32
  }
  func.func @transform_12(%arg0: i32) -> (i32, i32, i32) {
    %c0_i32 = arith.constant 0 : i32
    %c0_i32_0 = arith.constant 0 : i32
    %c0_i32_1 = arith.constant 0 : i32
    return %arg0, %c0_i32, %c0_i32_0 : i32, i32, i32
  }
  func.func @transform_13(%arg0: i32) -> (i32, i32, i32) {
    %c0_i32 = arith.constant 0 : i32
    %c0_i32_0 = arith.constant 0 : i32
    %c0_i32_1 = arith.constant 0 : i32
    return %arg0, %c0_i32, %c0_i32_0 : i32, i32, i32
  }
  func.func @transform_14(%arg0: i32) -> (i32, i32, i32) {
    %c0_i32 = arith.constant 0 : i32
    %c0_i32_0 = arith.constant 0 : i32
    %c0_i32_1 = arith.constant 0 : i32
    return %arg0, %c0_i32, %c0_i32_0 : i32, i32, i32
  }
  func.func @transform_15(%arg0: i32) -> (i32, i32, i32) {
    %c1_i32 = arith.constant 1 : i32
    %0 = arith.subi %arg0, %c1_i32 : i32
    %c0_i32 = arith.constant 0 : i32
    %1 = arith.maxsi %0, %c0_i32 : i32
    %c0_i32_0 = arith.constant 0 : i32
    %c0_i32_1 = arith.constant 0 : i32
    %c0_i32_2 = arith.constant 0 : i32
    return %1, %c0_i32_0, %c0_i32_1 : i32, i32, i32
  }
  func.func @transform_16(%arg0: i32) -> (i32, i32, i32) {
    %c1_i32 = arith.constant 1 : i32
    %0 = arith.subi %arg0, %c1_i32 : i32
    %c0_i32 = arith.constant 0 : i32
    %1 = arith.maxsi %0, %c0_i32 : i32
    %c0_i32_0 = arith.constant 0 : i32
    %c0_i32_1 = arith.constant 0 : i32
    %c0_i32_2 = arith.constant 0 : i32
    return %1, %c0_i32_0, %c0_i32_1 : i32, i32, i32
  }
  func.func @transform_17(%arg0: i32) -> (i32, i32, i32) {
    %c1_i32 = arith.constant 1 : i32
    %0 = arith.subi %arg0, %c1_i32 : i32
    %c0_i32 = arith.constant 0 : i32
    %1 = arith.maxsi %0, %c0_i32 : i32
    %c0_i32_0 = arith.constant 0 : i32
    %c0_i32_1 = arith.constant 0 : i32
    %c0_i32_2 = arith.constant 0 : i32
    return %1, %c0_i32_0, %c0_i32_1 : i32, i32, i32
  }
  func.func @transform_18(%arg0: i32) -> (i32, i32, i32) {
    %c1_i32 = arith.constant 1 : i32
    %0 = arith.subi %arg0, %c1_i32 : i32
    %c0_i32 = arith.constant 0 : i32
    %1 = arith.maxsi %0, %c0_i32 : i32
    %c0_i32_0 = arith.constant 0 : i32
    %c0_i32_1 = arith.constant 0 : i32
    %c0_i32_2 = arith.constant 0 : i32
    return %1, %c0_i32_0, %c0_i32_1 : i32, i32, i32
  }
  func.func @transform_19(%arg0: i32) -> (i32, i32, i32) {
    %c1_i32 = arith.constant 1 : i32
    %0 = arith.subi %arg0, %c1_i32 : i32
    %c0_i32 = arith.constant 0 : i32
    %1 = arith.maxsi %0, %c0_i32 : i32
    %c0_i32_0 = arith.constant 0 : i32
    %c0_i32_1 = arith.constant 0 : i32
    %c0_i32_2 = arith.constant 0 : i32
    return %1, %c0_i32_0, %c0_i32_1 : i32, i32, i32
  }
  func.func @transform_20(%arg0: i32) -> (i32, i32, i32) {
    %c0_i32 = arith.constant 0 : i32
    %c0_i32_0 = arith.constant 0 : i32
    %c0_i32_1 = arith.constant 0 : i32
    return %arg0, %c0_i32, %c0_i32_0 : i32, i32, i32
  }
  func.func @transform_21(%arg0: i32) -> (i32, i32, i32) {
    %c0_i32 = arith.constant 0 : i32
    %c0_i32_0 = arith.constant 0 : i32
    %c0_i32_1 = arith.constant 0 : i32
    return %arg0, %c0_i32, %c0_i32_0 : i32, i32, i32
  }
  func.func @transform_22(%arg0: i32) -> (i32, i32, i32) {
    %c0_i32 = arith.constant 0 : i32
    %c0_i32_0 = arith.constant 0 : i32
    %c0_i32_1 = arith.constant 0 : i32
    return %arg0, %c0_i32, %c0_i32_0 : i32, i32, i32
  }
}

</mosaic_0001>

<bundles_post_ra>
// kernel: parallel_mlp_forward.1
= control target key start
LH: loop header
LB: loop body
LE: loop exit
PB: predicated region body
PF: predicated region fallthrough
CT: control target
= control target key end

     0   :  { %s7573_s0 = inlined_call_operand.vmem [shape: bf16[8,128], index: 0, kind: input, shape index: {}]   ;;  %s7574_s1 = inlined_call_operand.vmem [shape: bf16[8,9], index: 1, kind: input, shape index: {}]   ;;  %s7575_s2 = inlined_call_operand.vmem [shape: bf16[8,1024], index: 2, kind: input, shape index: {}]   ;;  %s7576_s3 = inlined_call_operand.vmem [shape: bf16[8,1024], index: 3, kind: input, shape index: {}]   ;;  %s7577_s4 = inlined_call_operand.hbm [shape: bf16[128,128], index: 4, kind: input, shape index: {}]   ;;  %s7578_s5 = inlined_call_operand.hbm [shape: f32[1,128], index: 5, kind: input, shape index: {}]   ;;  %s7579_s6 = inlined_call_operand.hbm [shape: bf16[9,256], index: 6, kind: input, shape index: {}]   ;;  %s7580_s7 = inlined_call_operand.hbm [shape: f32[1,256], index: 7, kind: input, shape index: {}]   ;;  %s7581_s8 = inlined_call_operand.hbm [shape: bf16[256,256], index: 8, kind: input, shape index: {}]   ;;  %s7582_s9 = inlined_call_operand.hbm [shape: f32[1,256], index: 9, kind: input, shape index: {}]   ;;  %s7583_s10 = inlined_call_operand.hbm [shape: s8[3,2432,512], index: 10, kind: input, shape index: {}]   ;;  %s7584_s11 = inlined_call_operand.hbm [shape: f32[3,1,512], index: 11, kind: input, shape index: {}]   ;;  %s7585_s12 = inlined_call_operand.hbm [shape: f32[3,1,512], index: 12, kind: input, shape index: {}]   ;;  %s7586_s13 = inlined_call_operand.hbm [shape: f32[3,1,512], index: 13, kind: input, shape index: {}]   ;;  %s7587_s14 = inlined_call_operand.hbm [shape: f32[3,1,512], index: 14, kind: input, shape index: {}]   ;;  %s7588_s15 = inlined_call_operand.hbm [shape: s8[2,512,512], index: 15, kind: input, shape index: {}]   ;;  %s7589_s16 = inlined_call_operand.hbm [shape: f32[2,1,512], index: 16, kind: input, shape index: {}]   ;;  %s7590_s17 = inlined_call_operand.hbm [shape: f32[2,1,512], index: 17, kind: input, shape index: {}]   ;;  %s7591_s18 = inlined_call_operand.hbm [shape: f32[2,1,512], index: 18, kind: input, shape index: {}]   ;;  %s7592_s19 = inlined_call_operand.hbm [shape: f32[2,1,512], index: 19, kind: input, shape index: {}]   ;;  %s7593_s20 = inlined_call_operand.vmem [shape: bf16[3,512,3], index: 20, kind: input, shape index: {}]   ;;  %s7594_s21 = inlined_call_operand.hbm [shape: f32[3,1,3], index: 21, kind: input, shape index: {}]   ;;  %s7595_s22 = inlined_call_operand.vmem [shape: f32[3,8,3], index: 22, kind: output, shape index: {}]  }
   0x1   :  { %7641 = sst [smem:[#allocation39_spill]] %s7573_s0 }
   0x2   :  { %7642 = sst [smem:[#allocation40_spill]] %s7574_s1 }
   0x3   :  { %7643 = sst [smem:[#allocation41_spill]] %s7575_s2 }
   0x4   :  { %7644 = sst [smem:[#allocation42_spill]] %s7576_s3 }
   0x5   :  { %7645 = sst [smem:[#allocation43_spill]] %s7577_s4 }
   0x6   :  { %7646 = sst [smem:[#allocation44_spill]] %s7578_s5 }
   0x7   :  { %7647 = sst [smem:[#allocation45_spill]] %s7579_s6 }
   0x8   :  { %7648 = sst [smem:[#allocation46_spill]] %s7580_s7 }
   0x9   :  { %7649 = sst [smem:[#allocation47_spill]] %s7581_s8 }
   0xa   :  { %7650 = sst [smem:[#allocation48_spill]] %s7582_s9 }
   0xb   :  { %7651 = sst [smem:[#allocation49_spill]] %s7583_s10 }
   0xc   :  { %7652 = sst [smem:[#allocation50_spill]] %s7584_s11 }
   0xd   :  { %7653 = sst [smem:[#allocation51_spill]] %s7585_s12 }
   0xe   :  { %7654 = sst [smem:[#allocation52_spill]] %s7586_s13 }
   0xf   :  { %7655 = sst [smem:[#allocation53_spill]] %s7587_s14 }
  0x10   :  { %7656 = sst [smem:[#allocation54_spill]] %s7588_s15 }
  0x11   :  { %7657 = sst [smem:[#allocation55_spill]] %s7589_s16 }
  0x12   :  { %7658 = sst [smem:[#allocation56_spill]] %s7590_s17 }
  0x13   :  { %7659 = sst [smem:[#allocation57_spill]] %s7591_s18 }
  0x14   :  { %7660 = sst [smem:[#allocation58_spill]] %s7592_s19 }
  0x15   :  { %7661 = sst [smem:[#allocation59_spill]] %s7593_s20 }
  0x16   :  { %7662 = sst [smem:[#allocation60_spill]] %s7594_s21 }
  0x17   :  { %7663 = sst [smem:[#allocation61_spill]] %s7595_s22 }
  0x18   :  { %27 = vsyncpa [#allocation4], 0 }
  0x19   :  { %28 = vsyncpa [#allocation6], 0 }
  0x1a   :  { %29 = vsyncpa [#allocation9], 0 }
  0x1b   :  { %30 = vsyncpa [#allocation12], 0  ;;  %s6249_s3 = smov 0   ;;  %s6251_s28 = smov 0  }
  0x1c   :  { %s6253_s29 = smov 0   ;;  %s6255_s30 = smov 0  }
  0x1d   :  { %s6257_s4 = smov 0   ;;  %s6259_s0 = smov 0  }
  0x1e   :  { %s6261_s23 = smov 0  }
  0x1f LB: > { %7664 = sst [smem:[#allocation31_spill]] %s6097_s4  ;;  %s6107_s1 = smov [#allocation3]   ;;  %s6105_s23 = sphi %s6261_s23, %s7757_s23   ;;  %s6101_s0 = sphi %s6259_s0, %s7753_s0   ;;  %s6097_s4 = sphi %s6257_s4, %s7752_s4   ;;  %s6093_s30 = sphi %s6255_s30, %s7751_s30   ;;  %s6089_s29 = sphi %s6253_s29, %s7756_s29   ;;  %s6085_s28 = sphi %s6251_s28, %s7755_s28   ;;  %s6081_s3 = sphi %s6249_s3, %s7754_s3  }
  0x20   : > { %7665 = sst [smem:[#allocation32_spill]] %s6101_s0  ;;  %s643_s5 = sshll.u32 %s6107_s1, 4  ;;  %s644_s5 = int_to_ptr.vmem [resolvable:$true] %s643_s5 }
  0x21   : > { %s6285_s24 = sadd.s32 4294967295, %s6105_s23   ;;  %p4895_p0 = scmp.ge.s32.totalorder %s6105_s23, 1 }
  0x22   : > { %p7605_p1 = scmp.eq.s32.totalorder %s6285_s24, 0  ;;  %p619_p2 = scmp.lt.s32.totalorder %s6105_s23, 4 }
  0x23   : > { %s6303_s26 = sadd.s32 1, %s6105_s23   ;;  %s7670_s1 = sld [smem:[#allocation43_spill]] }
  0x24   : > { %p6290_p3 = pnand %p4895_p0, %p619_p2 }
  0x26   : > { %s7666_s6 = scalar_select %p6290_p3, 1, 0 }
  0x27   : > { %p5264_p4 = pneg %p6290_p3 }
  0x28   : > { %7667 = sst [smem:[#allocation33_spill]] %s7666_s6 }
  0x29   : > { %p6298_p5 = pnand %p5264_p4, %p7605_p1  ;;  %s5525_s22 = scalar_lea.hbm %s7670_s1, 1024 }
  0x2a   : > { %p5526_p6 = scmp.ne.s32.totalorder %s7670_s1, %s5525_s22  ;;  %p5532_p10 = scmp.lt.u32.totalorder %s5525_s22, %s7670_s1 }
  0x2b   : > { %s7668_s25 = scalar_select %p6298_p5, 1, 0 }
  0x2c   : > { %p6313_p7 = pneg %p6298_p5 }
  0x2d   : > { %7669 = sst [smem:[#allocation34_spill]] %s7668_s25 }
  0x2e   : > { %s7671_s6 = scalar_select %p6313_p7, 1, 0 }
  0x2f   : > { %p5528_p8 = pnand %p6313_p7, %p5526_p6 }
  0x30   : > { %7672 = sst [smem:[#allocation35_spill]] %s7671_s6 }
  0x31   : > { %p5529_p9 = pneg %p5528_p8 }
  0x33   : > { %p5534_p11 = pnand %p5532_p10, %p5529_p9 }
  0x35   : > { %5537 = shalt.err (!%p5534_p11)
}
  0x36   : > { %s5538_s2 = scalar_lea.vmem %s644_s5, 1024  ;;  %p5546_p2 = scmp.lt.s32.totalorder %s644_s5, %s644_s5 }
  0x37   : > { %p5539_p12 = scmp.ne.s32.totalorder %s644_s5, %s5538_s2  ;;  %p5547_p4 = scmp.lt.s32.totalorder %s5538_s2, %s5538_s2 }
  0x39   : > { %p5541_p13 = pnand %p5539_p12, %p6313_p7  ;;  %p5548_p1 = por %p5547_p4, %p5546_p2 }
  0x3b   : > { %p5542_p0 = pneg %p5541_p13 }
  0x3d   : > { %p5549_p3 = pnand %p5548_p1, %p5542_p0 }
  0x3f   : > { %5552 = shalt.err (!%p5549_p3)
}
  0x40   : > { %s6108_s20 = smov 64   ;;  %s6109_s8 = smov 4  }
  0x41   : > { %5267 = dma.hbm_to_vmem [thread:$0]  (!%p6298_p5), %s7670_s1, 1024, %s644_s5, [#allocation4], %s6108_s20, %s6108_s20, %s6109_s8  }
  0x42   : > { %s250_s22 = ssub.s32 %s6105_s23, %s6303_s26  ;;  %s253_s27 = sadd.s32 1, %s6101_s0 }
  0x43   : > { %p251_p1 = scmp.eq.s32.totalorder %s250_s22, 0  ;;  %p260_p3 = scmp.ne.s32.totalorder %s6101_s0, %s6097_s4 }
  0x44   : > { %p7614_p6 = scmp.eq.s32.totalorder %s6105_s23, 0  ;;  %p266_p8 = scmp.ne.s32.totalorder %s6097_s4, %s6093_s30 }
  0x45   : > { %s6338_s2 = scalar_select %p251_p1, %s6101_s0, %s253_s27  }
  0x46   : > { %p262_p9 = por %p7614_p6, %p260_p3  ;;  %p7674_p10 = scmp.eq.s32.totalorder %s6285_s24, 0 }
  0x47   : > { %7673 = sst [smem:[#allocation36_spill]] %s6338_s2  ;;  %p7613_p12 = scmp.lt.s32.totalorder %s6105_s23, 3 }
  0x48   : > { %p6344_p11 = por %p7674_p10, %p266_p8  ;;  %s716_s7 = sand.u32 1, %s6105_s23  }
  0x49   : > { %s6351_s9 = sand.u32 1, %s6101_s0   ;;  %p6356_p13 = pnand %p7613_p12, %p262_p9 }
  0x4a   : > { %s7675_s19 = scalar_select %p6344_p11, 1, 0 }
  0x4b   : > { %7677 = sst [smem:[#allocation38_spill]] %s6351_s9  ;;  %s5215_s5 = smul.u32 2432, %s6351_s9 }
  0x4c   : > { %7676 = sst [smem:[#allocation37_spill]] %s7675_s19  ;;  %s5216_s30 = smul.u32 38912, %s6105_s23 }
  0x4d   : > { %s7678_s20 = scalar_select %p6356_p13, 1, 0 }
  0x4e   : > { %s7679_s10 = sld [smem:[#allocation49_spill]]  ;;  %s720_s27 = scalar_lea.vmem [#allocation13], %s5215_s5 }
  0x4f   : > { %s727_s1 = sshll.u32 %s720_s27, 4  ;;  %s6368_s2 = scalar_lea.sflag [#allocation4], %s716_s7  ;;  %s6366_s1 = int_to_ptr.vmem [resolvable:$true] %s727_s1 }
  0x50   : > { %p6374_p2 = pneg %p6356_p13 }
  0x52   : > { %s7680_s19 = scalar_select %p6374_p2, 1, 0 }
  0x54   : > { %s6364_s22 = scalar_lea.hbm %s7679_s10, %s5216_s30  ;;  %s5558_s5 = scalar_lea.hbm %s7679_s10, 116736 }
  0x55   : > { %s5553_s0 = scalar_lea.hbm %s6364_s22, 38912  ;;  %p5559_p3 = scmp.lt.u32.totalorder %s6364_s22, %s7679_s10 }
  0x56   : > { %p5554_p0 = scmp.ne.s32.totalorder %s6364_s22, %s5553_s0  ;;  %p5560_p8 = scmp.lt.u32.totalorder %s5558_s5, %s5553_s0 }
  0x57   : > { %p5562_p10 = scmp.lt.u32.totalorder %s5553_s0, %s6364_s22 }
  0x58   : > { %p5556_p4 = pnand %p6374_p2, %p5554_p0  ;;  %p5561_p9 = por %p5560_p8, %p5559_p3 }
  0x5a   : > { %p5557_p1 = pneg %p5556_p4  ;;  %p5563_p12 = por %p5562_p10, %p5561_p9 }
  0x5c   : > { %p5564_p6 = pnand %p5563_p12, %p5557_p1 }
  0x5e   : > { %5567 = shalt.err (!%p5564_p6)
}
  0x5f   : > { %s5568_s7 = scalar_lea.vmem %s6366_s1, 38912  ;;  %s6110_s30 = smov [#allocation13]  }
  0x60   : > { %p5569_p0 = scmp.ne.s32.totalorder %s6366_s1, %s5568_s7  ;;  %s5573_s8 = sshll.u32 %s6110_s30, 4  ;;  %s5574_s8 = int_to_ptr.vmem [resolvable:$false] %s5573_s8 }
  0x61   : > { %s5575_s21 = scalar_lea.vmem %s5574_s8, 77824  ;;  %p5576_p5 = scmp.lt.s32.totalorder %s6366_s1, %s5574_s8 }
  0x62   : > { %p5571_p4 = pnand %p5569_p0, %p6374_p2  ;;  %p5577_p7 = scmp.lt.s32.totalorder %s5575_s21, %s5568_s7 }
  0x64   : > { %p5572_p11 = pneg %p5571_p4  ;;  %p5578_p3 = por %p5577_p7, %p5576_p5 }
  0x66   : > { %p5579_p8 = pnand %p5578_p3, %p5572_p11 }
  0x68   : > { %5582 = shalt.err (!%p5579_p8)
}
  0x69   : > { %s7621_s0 = smov 512   ;;  %s7622_s5 = smov 32  }
  0x6a   : > { %5286 = dma.hbm_to_vmem [thread:$0]  (!%p6356_p13), %s6364_s22, 38912, %s6366_s1, %s6368_s2, %s7621_s0, %s7621_s0, %s7622_s5  }
  0x6b   : > { %s6402_s27 = sshll.u32 %s6351_s9, 2  ;;  %s6405_s7 = sshll.u32 %s6105_s23, 6 }
  0x6c   : > { %s7681_s11 = sld [smem:[#allocation50_spill]]  ;;  %s741_s10 = scalar_lea.vmem [#allocation14], %s6402_s27 }
  0x6d   : > { %s749_s4 = sshll.u32 %s741_s10, 4  ;;  %s7682_s12 = sld [smem:[#allocation51_spill]]  ;;  %s750_s4 = int_to_ptr.vmem [resolvable:$true] %s749_s4 }
  0x72   : > { %s6411_s21 = scalar_lea.hbm %s7681_s11, %s6405_s7  ;;  %s5588_s9 = scalar_lea.hbm %s7681_s11, 192 }
  0x73   : > { %s6418_s0 = scalar_lea.hbm %s7682_s12, %s6405_s7  ;;  %s5583_s5 = scalar_lea.hbm %s6411_s21, 64 }
  0x74   : > { %p5584_p5 = scmp.ne.s32.totalorder %s6411_s21, %s5583_s5  ;;  %p5589_p11 = scmp.lt.u32.totalorder %s6411_s21, %s7681_s11 }
  0x75   : > { %p5590_p12 = scmp.lt.u32.totalorder %s5588_s9, %s5583_s5  ;;  %p5592_p9 = scmp.lt.u32.totalorder %s5583_s5, %s6411_s21 }
  0x76   : > { %p5586_p7 = pnand %p5584_p5, %p6374_p2 }
  0x77   : > { %p5591_p1 = por %p5590_p12, %p5589_p11 }
  0x78   : > { %p5587_p6 = pneg %p5586_p7 }
  0x79   : > { %p5593_p10 = por %p5592_p9, %p5591_p1 }
  0x7b   : > { %p5594_p0 = pnand %p5593_p10, %p5587_p6 }
  0x7d   : > { %5597 = shalt.err (!%p5594_p0)
}
  0x7e   : > { %s5598_s10 = scalar_lea.vmem %s750_s4, 64  ;;  %s6113_s1 = smov [#allocation14]  }
  0x7f   : > { %p5599_p4 = scmp.ne.s32.totalorder %s750_s4, %s5598_s10  ;;  %s5603_s22 = sshll.u32 %s6113_s1, 4  ;;  %s5604_s22 = int_to_ptr.vmem [resolvable:$false] %s5603_s22 }
  0x80   : > { %s5605_s30 = scalar_lea.vmem %s5604_s22, 128  ;;  %p5606_p5 = scmp.lt.s32.totalorder %s750_s4, %s5604_s22 }
  0x81   : > { %p5601_p3 = pnand %p5599_p4, %p6374_p2  ;;  %p5607_p7 = scmp.lt.s32.totalorder %s5605_s30, %s5598_s10 }
  0x83   : > { %p5602_p8 = pneg %p5601_p3  ;;  %p5608_p13 = por %p5607_p7, %p5606_p5 }
  0x85   : > { %p5609_p11 = pnand %p5608_p13, %p5602_p8 }
  0x87   : > { %5612 = shalt.err (!%p5609_p11)
}
  0x88   : > { %p7683_p12 = scmp.ne.s32.totalorder %s7678_s20, 0  ;;  %s760_s6 = scalar_lea.vmem [#allocation15], %s6402_s27 }
  0x89   : > { %s768_s25 = sshll.u32 %s760_s6, 4  ;;  %s7684_s13 = sld [smem:[#allocation52_spill]]  ;;  %s769_s25 = int_to_ptr.vmem [resolvable:$true] %s768_s25 }
  0x8a   : > { %5289 = dma.hbm_to_vmem [thread:$0]  (!%p7683_p12), %s6411_s21, 64, %s750_s4, %s6368_s2  }
  0x8b   : > { %s5613_s10 = scalar_lea.hbm %s6418_s0, 64  ;;  %s5618_s30 = scalar_lea.hbm %s7682_s12, 192 }
  0x8c   : > { %p5614_p13 = scmp.ne.s32.totalorder %s6418_s0, %s5613_s10  ;;  %p5619_p9 = scmp.lt.u32.totalorder %s6418_s0, %s7682_s12 }
  0x8d   : > { %p5620_p10 = scmp.lt.u32.totalorder %s5618_s30, %s5613_s10  ;;  %p5622_p4 = scmp.lt.u32.totalorder %s5613_s10, %s6418_s0 }
  0x8e   : > { %p5616_p6 = pnand %p5614_p13, %p6374_p2 }
  0x8f   : > { %s6443_s8 = scalar_lea.hbm %s7684_s13, %s6405_s7  ;;  %p5621_p0 = por %p5620_p10, %p5619_p9 }
  0x90   : > { %p5617_p1 = pneg %p5616_p6 }
  0x91   : > { %p5623_p3 = por %p5622_p4, %p5621_p0 }
  0x93   : > { %p5624_p8 = pnand %p5623_p3, %p5617_p1 }
  0x95   : > { %5627 = shalt.err (!%p5624_p8)
}
  0x96   : > { %s5628_s4 = scalar_lea.vmem %s769_s25, 64  ;;  %s6114_s21 = smov [#allocation15]  }
  0x97   : > { %p5629_p5 = scmp.ne.s32.totalorder %s769_s25, %s5628_s4  ;;  %s5633_s6 = sshll.u32 %s6114_s21, 4  ;;  %s5634_s6 = int_to_ptr.vmem [resolvable:$false] %s5633_s6 }
  0x98   : > { %s5635_s9 = scalar_lea.vmem %s5634_s6, 128  ;;  %p5636_p13 = scmp.lt.s32.totalorder %s769_s25, %s5634_s6 }
  0x99   : > { %p5631_p7 = pnand %p5629_p5, %p6374_p2  ;;  %p5637_p6 = scmp.lt.s32.totalorder %s5635_s9, %s5628_s4 }
  0x9b   : > { %p5632_p11 = pneg %p5631_p7  ;;  %p5638_p12 = por %p5637_p6, %p5636_p13 }
  0x9d   : > { %p5639_p9 = pnand %p5638_p12, %p5632_p11 }
  0x9f   : > { %5642 = shalt.err (!%p5639_p9)
}
  0xa0   : > { %p7685_p10 = scmp.ne.s32.totalorder %s7678_s20, 0  ;;  %s779_s11 = scalar_lea.vmem [#allocation16], %s6402_s27 }
  0xa1   : > { %s787_s18 = sshll.u32 %s779_s11, 4  ;;  %s7686_s14 = sld [smem:[#allocation53_spill]]  ;;  %s788_s18 = int_to_ptr.vmem [resolvable:$true] %s787_s18 }
  0xa2   : > { %5292 = dma.hbm_to_vmem [thread:$0]  (!%p7685_p10), %s6418_s0, 64, %s769_s25, %s6368_s2  }
  0xa3   : > { %s5643_s22 = scalar_lea.hbm %s6443_s8, 64  ;;  %s5648_s21 = scalar_lea.hbm %s7684_s13, 192 }
  0xa4   : > { %p5644_p12 = scmp.ne.s32.totalorder %s6443_s8, %s5643_s22  ;;  %p5649_p4 = scmp.lt.u32.totalorder %s6443_s8, %s7684_s13 }
  0xa5   : > { %p5650_p3 = scmp.lt.u32.totalorder %s5648_s21, %s5643_s22  ;;  %p5652_p5 = scmp.lt.u32.totalorder %s5643_s22, %s6443_s8 }
  0xa6   : > { %p5646_p1 = pnand %p5644_p12, %p6374_p2 }
  0xa7   : > { %s6468_s1 = scalar_lea.hbm %s7686_s14, %s6405_s7  ;;  %p5651_p8 = por %p5650_p3, %p5649_p4 }
  0xa8   : > { %p5647_p0 = pneg %p5646_p1 }
  0xa9   : > { %p5653_p7 = por %p5652_p5, %p5651_p8 }
  0xab   : > { %p5654_p11 = pnand %p5653_p7, %p5647_p0 }
  0xad   : > { %5657 = shalt.err (!%p5654_p11)
}
  0xae   : > { %s5658_s0 = scalar_lea.vmem %s788_s18, 64  ;;  %s6115_s7 = smov [#allocation16]  }
  0xaf   : > { %p5659_p13 = scmp.ne.s32.totalorder %s788_s18, %s5658_s0  ;;  %s5663_s25 = sshll.u32 %s6115_s7, 4  ;;  %s5664_s25 = int_to_ptr.vmem [resolvable:$false] %s5663_s25 }
  0xb0   : > { %s5665_s11 = scalar_lea.vmem %s5664_s25, 128  ;;  %p5666_p12 = scmp.lt.s32.totalorder %s788_s18, %s5664_s25 }
  0xb1   : > { %p5661_p6 = pnand %p5659_p13, %p6374_p2  ;;  %p5667_p1 = scmp.lt.s32.totalorder %s5665_s11, %s5658_s0 }
  0xb3   : > { %p5662_p9 = pneg %p5661_p6  ;;  %p5668_p10 = por %p5667_p1, %p5666_p12 }
  0xb5   : > { %p5669_p3 = pnand %p5668_p10, %p5662_p9 }
  0xb7   : > { %5672 = shalt.err (!%p5669_p3)
}
  0xb8   : > { %p7687_p4 = scmp.ne.s32.totalorder %s7678_s20, 0  ;;  %s798_s5 = scalar_lea.vmem [#allocation17], %s6402_s27 }
  0xb9   : > { %s806_s10 = sshll.u32 %s798_s5, 4  ;;  %s5673_s22 = scalar_lea.hbm %s6468_s1, 64  ;;  %s807_s10 = int_to_ptr.vmem [resolvable:$true] %s806_s10 }
  0xba   : > { %5295 = dma.hbm_to_vmem [thread:$0]  (!%p7687_p4), %s6443_s8, 64, %s788_s18, %s6368_s2  }
  0xbb   : > { %p5674_p0 = scmp.ne.s32.totalorder %s6468_s1, %s5673_s22  ;;  %s5678_s21 = scalar_lea.hbm %s7686_s14, 192 }
  0xbc   : > { %p5679_p5 = scmp.lt.u32.totalorder %s6468_s1, %s7686_s14  ;;  %p5680_p7 = scmp.lt.u32.totalorder %s5678_s21, %s5673_s22 }
  0xbd   : > { %p5676_p8 = pnand %p5674_p0, %p6374_p2  ;;  %p5682_p13 = scmp.lt.u32.totalorder %s5673_s22, %s6468_s1 }
  0xbe   : > { %p5681_p11 = por %p5680_p7, %p5679_p5 }
  0xbf   : > { %p5677_p10 = pneg %p5676_p8 }
  0xc0   : > { %p5683_p6 = por %p5682_p13, %p5681_p11 }
  0xc2   : > { %p5684_p9 = pnand %p5683_p6, %p5677_p10 }
  0xc4   : > { %5687 = shalt.err (!%p5684_p9)
}
  0xc5   : > { %s5688_s27 = scalar_lea.vmem %s807_s10, 64  ;;  %s6116_s8 = smov [#allocation17]  }
  0xc6   : > { %p5689_p12 = scmp.ne.s32.totalorder %s807_s10, %s5688_s27  ;;  %s5693_s18 = sshll.u32 %s6116_s8, 4  ;;  %s5694_s18 = int_to_ptr.vmem [resolvable:$false] %s5693_s18 }
  0xc7   : > { %s5695_s0 = scalar_lea.vmem %s5694_s18, 128  ;;  %p5696_p0 = scmp.lt.s32.totalorder %s807_s10, %s5694_s18 }
  0xc8   : > { %p5691_p1 = pnand %p5689_p12, %p6374_p2  ;;  %p5697_p8 = scmp.lt.s32.totalorder %s5695_s0, %s5688_s27 }
  0xca   : > { %p5692_p3 = pneg %p5691_p1  ;;  %p5698_p4 = por %p5697_p8, %p5696_p0 }
  0xcc   : > { %p5699_p5 = pnand %p5698_p4, %p5692_p3 }
  0xce   : > { %5702 = shalt.err (!%p5699_p5)
}
  0xcf   : > { %p7688_p7 = scmp.ne.s32.totalorder %s7678_s20, 0  ;;  %p381_p10 = scmp.gt.s32.totalorder %s6285_s24, 0 }
  0xd0   : > { %s4886_s7 = sadd.s32 4294967295, %s6303_s26  ;;  %s389_s25 = sadd.s32 1, %s6089_s29 }
  0xd1   : > { %5298 = dma.hbm_to_vmem [thread:$0]  (!%p7688_p7), %s6468_s1, 64, %s807_s10, %s6368_s2  }
  0xd2   : > { %p384_p4 = scmp.gt.s32.totalorder %s4886_s7, 0  ;;  %p396_p11 = scmp.ne.s32.totalorder %s6089_s29, %s6085_s28 }
  0xd3   : > { %s382_s11 = scalar_select %p381_p10, %s6285_s24, 0 }
  0xd4   : > { %s7759_s7 = smov (!%p384_p4, %s4886_s7), 0  ;;  %p402_p13 = scmp.ne.s32.totalorder %s6085_s28, %s6081_s3 }
  0xd5   : > { %s386_s5 = ssub.s32 %s382_s11, %s7759_s7  ;;  %s815_s22 = sand.u32 1, %s6089_s29  }
  0xd6   : > { %p387_p6 = scmp.eq.s32.totalorder %s386_s5, 0  ;;  %p7689_p9 = scmp.eq.s32.totalorder %s6105_s23, 0 }
  0xd7   : > { %p7690_p1 = scmp.eq.s32.totalorder %s6285_s24, 0  ;;  %s4916_s1 = sshll.u32 %s815_s22, 9 }
  0xd8   : > { %p398_p12 = por %p396_p11, %p7689_p9  ;;  %s5056_s4 = sshll.u32 %s382_s11, 13 }
  0xd9   : > { %p6520_p3 = por %p402_p13, %p7690_p1  ;;  %s7692_s15 = sld [smem:[#allocation54_spill]] }
  0xda   : > { %s6525_s10 = scalar_select %p387_p6, %s6089_s29, %s389_s25  }
  0xdb   : > { %s7691_s30 = scalar_select %p6520_p3, 1, 0 }
  0xdc   : > { %s817_s3 = scalar_lea.vmem [#allocation18], %s4916_s1  ;;  %p7693_p0 = scmp.lt.s32.totalorder %s6105_s23, 3 }
  0xdd   : > { %s827_s27 = sshll.u32 %s817_s3, 4  ;;  %s6540_s18 = sshll.u32 %s815_s22, 2  ;;  %s6532_s27 = int_to_ptr.vmem [resolvable:$true] %s827_s27 }
  0xde   : > { %p6536_p8 = pnand %p7693_p0, %p398_p12  ;;  %s6542_s0 = sshll.u32 %s382_s11, 6 }
  0xdf   : > { %s6530_s9 = scalar_lea.hbm %s7692_s15, %s5056_s4  ;;  %s5708_s4 = scalar_lea.hbm %s7692_s15, 16384 }
  0xe0   : > { %s7694_s8 = scalar_select %p6536_p8, 1, 0 }
  0xe1   : > { %s5703_s7 = scalar_lea.hbm %s6530_s9, 8192  ;;  %p6548_p10 = pneg %p6536_p8 }
  0xe2   : > { %p5704_p5 = scmp.ne.s32.totalorder %s6530_s9, %s5703_s7  ;;  %p5709_p13 = scmp.lt.u32.totalorder %s6530_s9, %s7692_s15 }
  0xe3   : > { %s7695_s25 = scalar_select %p6548_p10, 1, 0 }
  0xe4   : > { %p5706_p4 = pnand %p6548_p10, %p5704_p5  ;;  %p5710_p6 = scmp.lt.u32.totalorder %s5708_s4, %s5703_s7 }
  0xe5   : > { %p5712_p12 = scmp.lt.u32.totalorder %s5703_s7, %s6530_s9 }
  0xe6   : > { %p5707_p11 = pneg %p5706_p4  ;;  %p5711_p9 = por %p5710_p6, %p5709_p13 }
  0xe8   : > { %p5713_p1 = por %p5712_p12, %p5711_p9 }
  0xea   : > { %p5714_p0 = pnand %p5713_p1, %p5707_p11 }
  0xec   : > { %5717 = shalt.err (!%p5714_p0)
}
  0xed   : > { %s5718_s11 = scalar_lea.vmem %s6532_s27, 8192  ;;  %s6117_s6 = smov [#allocation18]  }
  0xee   : > { %p5719_p5 = scmp.ne.s32.totalorder %s6532_s27, %s5718_s11  ;;  %s5723_s3 = sshll.u32 %s6117_s6, 4  ;;  %s5724_s3 = int_to_ptr.vmem [resolvable:$false] %s5723_s3 }
  0xef   : > { %s5725_s5 = scalar_lea.vmem %s5724_s3, 16384  ;;  %p5726_p7 = scmp.lt.s32.totalorder %s6532_s27, %s5724_s3 }
  0xf0   : > { %p5721_p4 = pnand %p5719_p5, %p6548_p10  ;;  %p5727_p2 = scmp.lt.s32.totalorder %s5725_s5, %s5718_s11 }
  0xf2   : > { %p5722_p3 = pneg %p5721_p4  ;;  %p5728_p13 = por %p5727_p2, %p5726_p7 }
  0xf4   : > { %p5729_p6 = pnand %p5728_p13, %p5722_p3 }
  0xf6   : > { %5732 = shalt.err (!%p5729_p6)
}
  0xf7   : > { %s7696_s7 = smov 32   ;;  %s7697_s1 = smov 512  }
  0xf8   : > { %5301 = dma.hbm_to_vmem [thread:$0]  (!%p6536_p8), %s6530_s9, 8192, %s6532_s27, %s6368_s2, %s7697_s1, %s7697_s1, %s7696_s7  }
  0xf9   : > { %s7698_s16 = sld [smem:[#allocation55_spill]]  ;;  %s841_s11 = scalar_lea.vmem [#allocation19], %s6540_s18 }
  0xfa   : > { %s852_s6 = sshll.u32 %s841_s11, 4  ;;  %s853_s6 = int_to_ptr.vmem [resolvable:$true] %s852_s6 }
  0xff   : > { %s6579_s22 = scalar_lea.hbm %s7698_s16, %s6542_s0  ;;  %s5738_s9 = scalar_lea.hbm %s7698_s16, 128 }
 0x100   : > { %s5733_s3 = scalar_lea.hbm %s6579_s22, 64  ;;  %p5739_p11 = scmp.lt.u32.totalorder %s6579_s22, %s7698_s16 }
 0x101   : > { %p5734_p2 = scmp.ne.s32.totalorder %s6579_s22, %s5733_s3  ;;  %p5740_p9 = scmp.lt.u32.totalorder %s5738_s9, %s5733_s3 }
 0x102   : > { %p5742_p1 = scmp.lt.u32.totalorder %s5733_s3, %s6579_s22 }
 0x103   : > { %p5736_p7 = pnand %p5734_p2, %p6548_p10  ;;  %p5741_p12 = por %p5740_p9, %p5739_p11 }
 0x105   : > { %p5737_p3 = pneg %p5736_p7  ;;  %p5743_p0 = por %p5742_p1, %p5741_p12 }
 0x107   : > { %p5744_p5 = pnand %p5743_p0, %p5737_p3 }
 0x109   : > { %5747 = shalt.err (!%p5744_p5)
}
 0x10a   : > { %s5748_s1 = scalar_lea.vmem %s853_s6, 64  ;;  %s6118_s4 = smov [#allocation19]  }
 0x10b   : > { %p5749_p4 = scmp.ne.s32.totalorder %s853_s6, %s5748_s1  ;;  %s5753_s21 = sshll.u32 %s6118_s4, 4  ;;  %s5754_s21 = int_to_ptr.vmem [resolvable:$false] %s5753_s21 }
 0x10c   : > { %s5755_s12 = scalar_lea.vmem %s5754_s21, 128  ;;  %p5756_p2 = scmp.lt.s32.totalorder %s853_s6, %s5754_s21 }
 0x10d   : > { %p5751_p13 = pnand %p5749_p4, %p6548_p10  ;;  %p5757_p7 = scmp.lt.s32.totalorder %s5755_s12, %s5748_s1 }
 0x10f   : > { %p5752_p6 = pneg %p5751_p13  ;;  %p5758_p8 = por %p5757_p7, %p5756_p2 }
 0x111   : > { %p5759_p9 = pnand %p5758_p8, %p5752_p6 }
 0x113   : > { %5762 = shalt.err (!%p5759_p9)
}
 0x114   : > { %p7699_p11 = scmp.ne.s32.totalorder %s7694_s8, 0  ;;  %s7700_s17 = sld [smem:[#allocation56_spill]] }
 0x115   : > { %s863_s9 = scalar_lea.vmem [#allocation20], %s6540_s18 }
 0x116   : > { %5304 = dma.hbm_to_vmem [thread:$0]  (!%p7699_p11), %s6579_s22, 64, %s853_s6, %s6368_s2  }
 0x117   : > { %s874_s27 = sshll.u32 %s863_s9, 4  ;;  %s875_s27 = int_to_ptr.vmem [resolvable:$true] %s874_s27 }
 0x11a   : > { %s6604_s5 = scalar_lea.hbm %s7700_s17, %s6542_s0  ;;  %s5768_s22 = scalar_lea.hbm %s7700_s17, 128 }
 0x11b   : > { %s5763_s7 = scalar_lea.hbm %s6604_s5, 64  ;;  %p5769_p1 = scmp.lt.u32.totalorder %s6604_s5, %s7700_s17 }
 0x11c   : > { %p5764_p8 = scmp.ne.s32.totalorder %s6604_s5, %s5763_s7  ;;  %p5770_p0 = scmp.lt.u32.totalorder %s5768_s22, %s5763_s7 }
 0x11d   : > { %p5772_p4 = scmp.lt.u32.totalorder %s5763_s7, %s6604_s5 }
 0x11e   : > { %p5766_p3 = pnand %p5764_p8, %p6548_p10  ;;  %p5771_p5 = por %p5770_p0, %p5769_p1 }
 0x120   : > { %p5767_p12 = pneg %p5766_p3  ;;  %p5773_p13 = por %p5772_p4, %p5771_p5 }
 0x122   : > { %p5774_p6 = pnand %p5773_p13, %p5767_p12 }
 0x124   : > { %5777 = shalt.err (!%p5774_p6)
}
 0x125   : > { %s5778_s12 = scalar_lea.vmem %s875_s27, 64  ;;  %s6119_s11 = smov [#allocation20]  }
 0x126   : > { %p5779_p2 = scmp.ne.s32.totalorder %s875_s27, %s5778_s12  ;;  %s5783_s3 = sshll.u32 %s6119_s11, 4  ;;  %s5784_s3 = int_to_ptr.vmem [resolvable:$false] %s5783_s3 }
 0x127   : > { %s5785_s9 = scalar_lea.vmem %s5784_s3, 128  ;;  %p5786_p8 = scmp.lt.s32.totalorder %s875_s27, %s5784_s3 }
 0x128   : > { %p5781_p7 = pnand %p5779_p2, %p6548_p10  ;;  %p5787_p3 = scmp.lt.s32.totalorder %s5785_s9, %s5778_s12 }
 0x12a   : > { %p5782_p9 = pneg %p5781_p7  ;;  %p5788_p11 = por %p5787_p3, %p5786_p8 }
 0x12c   : > { %p5789_p0 = pnand %p5788_p11, %p5782_p9 }
 0x12e   : > { %5792 = shalt.err (!%p5789_p0)
}
 0x12f   : > { %p7701_p1 = scmp.ne.s32.totalorder %s7694_s8, 0  ;;  %s7702_s4 = sld [smem:[#allocation57_spill]] }
 0x130   : > { %s885_s21 = scalar_lea.vmem [#allocation21], %s6540_s18 }
 0x131   : > { %5307 = dma.hbm_to_vmem [thread:$0]  (!%p7701_p1), %s6604_s5, 64, %s875_s27, %s6368_s2  }
 0x132   : > { %s896_s12 = sshll.u32 %s885_s21, 4  ;;  %s897_s12 = int_to_ptr.vmem [resolvable:$true] %s896_s12 }
 0x135   : > { %s7703_s22 = smov %s7702_s4  ;;  %s6629_s6 = scalar_lea.hbm %s7702_s4, %s6542_s0 }
 0x136   : > { %s5793_s11 = scalar_lea.hbm %s6629_s6, 64  ;;  %s5798_s5 = scalar_lea.hbm %s7703_s22, 128 }
 0x137   : > { %p5794_p11 = scmp.ne.s32.totalorder %s6629_s6, %s5793_s11  ;;  %p5799_p4 = scmp.lt.u32.totalorder %s6629_s6, %s7703_s22 }
 0x138   : > { %p5800_p13 = scmp.lt.u32.totalorder %s5798_s5, %s5793_s11  ;;  %p5802_p2 = scmp.lt.u32.totalorder %s5793_s11, %s6629_s6 }
 0x139   : > { %p5796_p12 = pnand %p5794_p11, %p6548_p10 }
 0x13a   : > { %p5801_p6 = por %p5800_p13, %p5799_p4 }
 0x13b   : > { %p5797_p5 = pneg %p5796_p12 }
 0x13c   : > { %p5803_p7 = por %p5802_p2, %p5801_p6 }
 0x13e   : > { %p5804_p9 = pnand %p5803_p7, %p5797_p5 }
 0x140   : > { %5807 = shalt.err (!%p5804_p9)
}
 0x141   : > { %s5808_s1 = scalar_lea.vmem %s897_s12, 64  ;;  %s6120_s4 = smov [#allocation21]  }
 0x142   : > { %p5809_p8 = scmp.ne.s32.totalorder %s897_s12, %s5808_s1  ;;  %s5813_s21 = sshll.u32 %s6120_s4, 4  ;;  %s5814_s21 = int_to_ptr.vmem [resolvable:$false] %s5813_s21 }
 0x143   : > { %s5815_s3 = scalar_lea.vmem %s5814_s21, 128  ;;  %p5816_p11 = scmp.lt.s32.totalorder %s897_s12, %s5814_s21 }
 0x144   : > { %p5811_p3 = pnand %p5809_p8, %p6548_p10  ;;  %p5817_p12 = scmp.lt.s32.totalorder %s5815_s3, %s5808_s1 }
 0x146   : > { %p5812_p0 = pneg %p5811_p3  ;;  %p5818_p1 = por %p5817_p12, %p5816_p11 }
 0x148   : > { %p5819_p4 = pnand %p5818_p1, %p5812_p0 }
 0x14a   : > { %5822 = shalt.err (!%p5819_p4)
}
 0x14b   : > { %p7704_p13 = scmp.ne.s32.totalorder %s7694_s8, 0  ;;  %s7705_s11 = sld [smem:[#allocation35_spill]] }
 0x14c   : > { %s6121_s9 = smov [#allocation5]   ;;  %s6122_s27 = smov [#allocation8]  }
 0x14d   : > { %5310 = dma.hbm_to_vmem [thread:$0]  (!%p7704_p13), %s6629_s6, 64, %s897_s12, %s6368_s2  }
 0x14e   : > { %s657_s5 = sshll.u32 %s6121_s9, 4  ;;  %s681_s7 = sshll.u32 %s6122_s27, 4  ;;  %s658_s5 = int_to_ptr.vmem [resolvable:$true] %s657_s5  ;;  %s682_s7 = int_to_ptr.vmem [resolvable:$true] %s681_s7 }
 0x14f   : > { %s7706_s14 = sld [smem:[#allocation44_spill]] }
 0x151   : > { %p7707_p5 = scmp.ne.s32.totalorder %s7705_s11, 0 }
 0x155   : > { %s5823_s15 = scalar_lea.hbm %s7706_s14, 16 }
 0x156   : > { %p5824_p1 = scmp.ne.s32.totalorder %s7706_s14, %s5823_s15  ;;  %p5830_p7 = scmp.lt.u32.totalorder %s5823_s15, %s7706_s14 }
 0x158   : > { %p5826_p6 = pnand %p5824_p1, %p7707_p5 }
 0x15a   : > { %p5827_p2 = pneg %p5826_p6 }
 0x15c   : > { %p5832_p9 = pnand %p5830_p7, %p5827_p2 }
 0x15e   : > { %5835 = shalt.err (!%p5832_p9)
}
 0x15f   : > { %s5836_s6 = scalar_lea.vmem %s658_s5, 16  ;;  %s5843_s13 = scalar_lea.vmem %s658_s5, 32 }
 0x160   : > { %p5837_p8 = scmp.ne.s32.totalorder %s658_s5, %s5836_s6  ;;  %p5844_p11 = scmp.lt.s32.totalorder %s658_s5, %s658_s5 }
 0x161   : > { %p5845_p12 = scmp.lt.s32.totalorder %s5843_s13, %s5836_s6 }
 0x162   : > { %p5839_p3 = pnand %p5837_p8, %p7707_p5 }
 0x163   : > { %p5846_p4 = por %p5845_p12, %p5844_p11 }
 0x164   : > { %p5840_p0 = pneg %p5839_p3 }
 0x166   : > { %p5847_p13 = pnand %p5846_p4, %p5840_p0 }
 0x168   : > { %5850 = shalt.err (!%p5847_p13)
}
 0x169   : > { %s7708_s12 = sld [smem:[#allocation34_spill]]  ;;  %s7710_s4 = sld [smem:[#allocation46_spill]] }
 0x16f   : > { %p7709_p1 = scmp.ne.s32.totalorder %s7708_s12, 0  ;;  %s7711_s21 = smov %s7710_s4 }
 0x170   : > { %s5851_s1 = scalar_lea.hbm %s7710_s4, 32 }
 0x171   : > { %5270 = dma.hbm_to_vmem [thread:$0]  (!%p7709_p1), %s7706_s14, 16, %s658_s5, [#allocation6]  }
 0x172   : > { %p5852_p6 = scmp.ne.s32.totalorder %s7711_s21, %s5851_s1  ;;  %p5858_p13 = scmp.lt.u32.totalorder %s5851_s1, %s7711_s21 }
 0x174   : > { %p5854_p2 = pnand %p5852_p6, %p7707_p5 }
 0x176   : > { %p5855_p7 = pneg %p5854_p2 }
 0x178   : > { %p5860_p9 = pnand %p5858_p13, %p5855_p7 }
 0x17a   : > { %5863 = shalt.err (!%p5860_p9)
}
 0x17b   : > { %s5864_s9 = scalar_lea.vmem %s682_s7, 32  ;;  %p5872_p11 = scmp.lt.s32.totalorder %s682_s7, %s682_s7 }
 0x17c   : > { %p5865_p8 = scmp.ne.s32.totalorder %s682_s7, %s5864_s9  ;;  %p5873_p12 = scmp.lt.s32.totalorder %s5864_s9, %s5864_s9 }
 0x17e   : > { %p5867_p3 = pnand %p5865_p8, %p7707_p5  ;;  %p5874_p4 = por %p5873_p12, %p5872_p11 }
 0x180   : > { %p5868_p0 = pneg %p5867_p3 }
 0x182   : > { %p5875_p10 = pnand %p5874_p4, %p5868_p0 }
 0x184   : > { %5878 = shalt.err (!%p5875_p10)
}
 0x185   : > { %5276 = dma.hbm_to_vmem [thread:$0]  (!%p7709_p1), %s7711_s21, 32, %s682_s7, [#allocation9]  }
 0x186   : > { %s7712_s16 = sld [smem:[#allocation58_spill]]  ;;  %s907_s1 = scalar_lea.vmem [#allocation22], %s6540_s18 }
 0x187   : > { %s918_s3 = sshll.u32 %s907_s1, 4  ;;  %p7713_p6 = scmp.ne.s32.totalorder %s7695_s25, 0  ;;  %s919_s3 = int_to_ptr.vmem [resolvable:$true] %s918_s3 }
 0x18c   : > { %s6690_s4 = scalar_lea.hbm %s7712_s16, %s6542_s0  ;;  %s5884_s7 = scalar_lea.hbm %s7712_s16, 128 }
 0x18d   : > { %s5879_s6 = scalar_lea.hbm %s6690_s4, 64  ;;  %p5885_p13 = scmp.lt.u32.totalorder %s6690_s4, %s7712_s16 }
 0x18e   : > { %p5880_p10 = scmp.ne.s32.totalorder %s6690_s4, %s5879_s6  ;;  %p5886_p9 = scmp.lt.u32.totalorder %s5884_s7, %s5879_s6 }
 0x18f   : > { %p5888_p3 = scmp.lt.u32.totalorder %s5879_s6, %s6690_s4 }
 0x190   : > { %p5882_p2 = pnand %p5880_p10, %p7713_p6  ;;  %p5887_p8 = por %p5886_p9, %p5885_p13 }
 0x192   : > { %p5883_p7 = pneg %p5882_p2  ;;  %p5889_p0 = por %p5888_p3, %p5887_p8 }
 0x194   : > { %p5890_p11 = pnand %p5889_p0, %p5883_p7 }
 0x196   : > { %5893 = shalt.err (!%p5890_p11)
}
 0x197   : > { %s5894_s18 = scalar_lea.vmem %s919_s3, 64  ;;  %s6123_s0 = smov [#allocation22]  }
 0x198   : > { %p5895_p12 = scmp.ne.s32.totalorder %s919_s3, %s5894_s18  ;;  %s5899_s27 = sshll.u32 %s6123_s0, 4  ;;  %s5900_s27 = int_to_ptr.vmem [resolvable:$false] %s5899_s27 }
 0x199   : > { %s5901_s15 = scalar_lea.vmem %s5900_s27, 128  ;;  %p5902_p2 = scmp.lt.s32.totalorder %s919_s3, %s5900_s27 }
 0x19a   : > { %p5897_p4 = pnand %p5895_p12, %p7713_p6  ;;  %p5903_p1 = scmp.lt.s32.totalorder %s5901_s15, %s5894_s18 }
 0x19c   : > { %p5898_p10 = pneg %p5897_p4  ;;  %p5904_p5 = por %p5903_p1, %p5902_p2 }
 0x19e   : > { %p5905_p9 = pnand %p5904_p5, %p5898_p10 }
 0x1a0   : > { %5908 = shalt.err (!%p5905_p9)
}
 0x1a1   : > { %p7714_p13 = scmp.ne.s32.totalorder %s7694_s8, 0  ;;  %s6124_s1 = smov [#allocation7]  }
 0x1a2   : > { %s667_s6 = sshll.u32 %s6124_s1, 4  ;;  %s7715_s9 = sld [smem:[#allocation45_spill]]  ;;  %s668_s6 = int_to_ptr.vmem [resolvable:$true] %s667_s6 }
 0x1a3   : > { %5313 = dma.hbm_to_vmem [thread:$0]  (!%p7714_p13), %s6690_s4, 64, %s919_s3, %s6368_s2  }
 0x1a4   : > { %p7716_p1 = scmp.ne.s32.totalorder %s7705_s11, 0 }
 0x1a8   : > { %s5909_s7 = scalar_lea.hbm %s7715_s9, 256 }
 0x1a9   : > { %p5910_p6 = scmp.ne.s32.totalorder %s7715_s9, %s5909_s7  ;;  %p5916_p8 = scmp.lt.u32.totalorder %s5909_s7, %s7715_s9 }
 0x1ab   : > { %p5912_p5 = pnand %p5910_p6, %p7716_p1 }
 0x1ad   : > { %p5913_p7 = pneg %p5912_p5 }
 0x1af   : > { %p5918_p3 = pnand %p5916_p8, %p5913_p7 }
 0x1b1   : > { %5921 = shalt.err (!%p5918_p3)
}
 0x1b2   : > { %s5922_s4 = scalar_lea.vmem %s668_s6, 256  ;;  %p5930_p4 = scmp.lt.s32.totalorder %s668_s6, %s668_s6 }
 0x1b3   : > { %p5923_p0 = scmp.ne.s32.totalorder %s668_s6, %s5922_s4  ;;  %p5931_p10 = scmp.lt.s32.totalorder %s5922_s4, %s5922_s4 }
 0x1b5   : > { %p5925_p11 = pnand %p5923_p0, %p7716_p1  ;;  %p5932_p2 = por %p5931_p10, %p5930_p4 }
 0x1b7   : > { %p5926_p12 = pneg %p5925_p11 }
 0x1b9   : > { %p5933_p9 = pnand %p5932_p2, %p5926_p12 }
 0x1bb   : > { %5936 = shalt.err (!%p5933_p9)
}
 0x1bc   : > { %s6125_s3 = smov 128   ;;  %s6126_s0 = smov 8  }
 0x1bd   : > { %p7717_p13 = scmp.ne.s32.totalorder %s7708_s12, 0  ;;  %s6127_s1 = smov [#allocation10]  }
 0x1be   : > { %s691_s25 = sshll.u32 %s6127_s1, 4  ;;  %s6128_s13 = smov [#allocation11]   ;;  %s692_s25 = int_to_ptr.vmem [resolvable:$true] %s691_s25 }
 0x1bf   : > { %5273 = dma.hbm_to_vmem [thread:$0]  (!%p7717_p13), %s7715_s9, 256, %s668_s6, [#allocation6], %s6125_s3, %s6125_s3, %s6126_s0  }
 0x1c0   : > { %s705_s7 = sshll.u32 %s6128_s13, 4  ;;  %s7718_s18 = sld [smem:[#allocation47_spill]]  ;;  %s6729_s7 = int_to_ptr.vmem [resolvable:$true] %s705_s7 }
 0x1c6   : > { %s5937_s8 = scalar_lea.hbm %s7718_s18, 4096 }
 0x1c7   : > { %p5938_p6 = scmp.ne.s32.totalorder %s7718_s18, %s5937_s8  ;;  %p5944_p8 = scmp.lt.u32.totalorder %s5937_s8, %s7718_s18 }
 0x1c9   : > { %p5940_p5 = pnand %p5938_p6, %p7716_p1 }
 0x1cb   : > { %p5941_p7 = pneg %p5940_p5 }
 0x1cd   : > { %p5946_p3 = pnand %p5944_p8, %p5941_p7 }
 0x1cf   : > { %5949 = shalt.err (!%p5946_p3)
}
 0x1d0   : > { %s5950_s15 = scalar_lea.vmem %s692_s25, 4096  ;;  %p5958_p4 = scmp.lt.s32.totalorder %s692_s25, %s692_s25 }
 0x1d1   : > { %p5951_p0 = scmp.ne.s32.totalorder %s692_s25, %s5950_s15  ;;  %p5959_p10 = scmp.lt.s32.totalorder %s5950_s15, %s5950_s15 }
 0x1d3   : > { %p5953_p11 = pnand %p5951_p0, %p7716_p1  ;;  %p5960_p2 = por %p5959_p10, %p5958_p4 }
 0x1d5   : > { %p5954_p12 = pneg %p5953_p11 }
 0x1d7   : > { %p5961_p9 = pnand %p5960_p2, %p5954_p12 }
 0x1d9   : > { %5964 = shalt.err (!%p5961_p9)
}
 0x1da   : > { %5279 = dma.hbm_to_vmem [thread:$0]  (!%p7717_p13), %s7718_s18, 4096, %s692_s25, [#allocation9], %s6125_s3, %s6125_s3, %s6126_s0  }
 0x1db   : > { %s7719_s5 = sld [smem:[#allocation48_spill]] }
 0x1e1   : > { %s5965_s8 = scalar_lea.hbm %s7719_s5, 32 }
 0x1e2   : > { %p5966_p6 = scmp.ne.s32.totalorder %s7719_s5, %s5965_s8  ;;  %p5972_p8 = scmp.lt.u32.totalorder %s5965_s8, %s7719_s5 }
 0x1e4   : > { %p5968_p5 = pnand %p5966_p6, %p7716_p1 }
 0x1e6   : > { %p5969_p7 = pneg %p5968_p5 }
 0x1e8   : > { %p5974_p3 = pnand %p5972_p8, %p5969_p7 }
 0x1ea   : > { %5977 = shalt.err (!%p5974_p3)
}
 0x1eb   : > { %s5978_s3 = scalar_lea.vmem %s6729_s7, 32  ;;  %p5986_p4 = scmp.lt.s32.totalorder %s6729_s7, %s6729_s7 }
 0x1ec   : > { %p5979_p0 = scmp.ne.s32.totalorder %s6729_s7, %s5978_s3  ;;  %p5987_p10 = scmp.lt.s32.totalorder %s5978_s3, %s5978_s3 }
 0x1ee   : > { %p5981_p11 = pnand %p5979_p0, %p7716_p1  ;;  %p5988_p2 = por %p5987_p10, %p5986_p4 }
 0x1f0   : > { %p5982_p12 = pneg %p5981_p11 }
 0x1f2   : > { %p5989_p9 = pnand %p5988_p2, %p5982_p12 }
 0x1f4   : > { %5992 = shalt.err (!%p5989_p9)
}
 0x1f5   : > { %s7720_s14 = sld [smem:[#allocation38_spill]]  ;;  %s4936_s1 = sshll.u32 %s6105_s23, 4 }
 0x1f6   : > { %5282 = dma.hbm_to_vmem [thread:$0]  (!%p7717_p13), %s7719_s5, 32, %s6729_s7, [#allocation12]  }
 0x1f7   : > { %s7721_s17 = sld [smem:[#allocation60_spill]]  ;;  %p7722_p6 = scmp.ne.s32.totalorder %s7680_s19, 0 }
 0x1fb   : > { %s936_s4 = scalar_lea.vmem [#allocation23], %s7720_s14 }
 0x1fc   : > { %s943_s12 = sshll.u32 %s936_s4, 4  ;;  %s944_s12 = int_to_ptr.vmem [resolvable:$true] %s943_s12 }
 0x1fd   : > { %s6776_s8 = scalar_lea.hbm %s7721_s17, %s4936_s1  ;;  %s5998_s23 = scalar_lea.hbm %s7721_s17, 48 }
 0x1fe   : > { %s5993_s27 = scalar_lea.hbm %s6776_s8, 16  ;;  %p5999_p13 = scmp.lt.u32.totalorder %s6776_s8, %s7721_s17 }
 0x1ff   : > { %p5994_p1 = scmp.ne.s32.totalorder %s6776_s8, %s5993_s27  ;;  %p6000_p8 = scmp.lt.u32.totalorder %s5998_s23, %s5993_s27 }
 0x200   : > { %p6002_p0 = scmp.lt.u32.totalorder %s5993_s27, %s6776_s8 }
 0x201   : > { %p5996_p5 = pnand %p5994_p1, %p7722_p6  ;;  %p6001_p3 = por %p6000_p8, %p5999_p13 }
 0x203   : > { %p5997_p7 = pneg %p5996_p5  ;;  %p6003_p11 = por %p6002_p0, %p6001_p3 }
 0x205   : > { %p6004_p12 = pnand %p6003_p11, %p5997_p7 }
 0x207   : > { %6007 = shalt.err (!%p6004_p12)
}
 0x208   : > { %s6008_s0 = scalar_lea.vmem %s944_s12, 16  ;;  %s6129_s25 = smov [#allocation23]  }
 0x209   : > { %p6009_p4 = scmp.ne.s32.totalorder %s944_s12, %s6008_s0  ;;  %s6013_s14 = sshll.u32 %s6129_s25, 4  ;;  %s6014_s14 = int_to_ptr.vmem [resolvable:$false] %s6013_s14 }
 0x20a   : > { %s6015_s1 = scalar_lea.vmem %s6014_s14, 32  ;;  %p6016_p9 = scmp.lt.s32.totalorder %s944_s12, %s6014_s14 }
 0x20b   : > { %p6011_p10 = pnand %p6009_p4, %p7722_p6  ;;  %p6017_p1 = scmp.lt.s32.totalorder %s6015_s1, %s6008_s0 }
 0x20d   : > { %p6012_p2 = pneg %p6011_p10  ;;  %p6018_p5 = por %p6017_p1, %p6016_p9 }
 0x20f   : > { %p6019_p8 = pnand %p6018_p5, %p6012_p2 }
 0x211   : > { %6022 = shalt.err (!%p6019_p8)
}
 0x212   : > { %p7723_p13 = scmp.ne.s32.totalorder %s7678_s20, 0  ;;  %s7724_s11 = sld [smem:[#allocation33_spill]] }
 0x214   : > { %5316 = dma.hbm_to_vmem [thread:$0]  (!%p7723_p13), %s6776_s8, 16, %s944_s12, %s6368_s2  }
 0x218   : > { %p7725_p7 = scmp.ne.s32.totalorder %s7724_s11, 0 }
 0x219   : > { %p7726_p6 = scmp.eq.s32.totalorder (!%p7725_p7), %s6285_s24, 0 }
 0x21a   : > { %952 = sbr.rel (%p7725_p7) target bundleno = 2349 (0x92d), region = 108 }
 0x221   : > { %6052 = dma.done.wait (%p7726_p6), [#allocation4], 1024   ;;  %p7727_p3 = pmov %p7726_p6 }
 0x223   : > { %6054 = vsyncadd (%p7727_p3), [#allocation4], 4294966272  ;;  %p7728_p0 = pmov %p7727_p3 }
 0x225   : > { %6056 = dma.done.wait (%p7728_p0), [#allocation6], 272   ;;  %p7729_p11 = pmov %p7728_p0 }
 0x226   : > { %p7730_p12 = pmov %p7728_p0 }
 0x227   : > { %6058 = vsyncadd (%p7729_p11), [#allocation6], 4294967024 }
 0x228   : > { %6060 = dma.done.wait (%p7730_p12), [#allocation9], 4128   ;;  %p7731_p4 = pmov %p7728_p0 }
 0x229   : > { %p7732_p10 = pmov %p7728_p0 }
 0x22a   : > { %6062 = vsyncadd (%p7731_p4), [#allocation9], 4294963168 }
 0x22b   : > { %6064 = dma.done.wait (%p7732_p10), [#allocation12], 32   ;;  %p7733_p2 = pmov %p7728_p0 }
 0x22c   : > { %s7734_s19 = sld [smem:[#allocation31_spill]]  ;;  %s7735_s2 = sld [smem:[#allocation37_spill]] }
 0x22d   : > { %6066 = vsyncadd (%p7733_p2), [#allocation12], 4294967264  ;;  %s978_s20 = sand.u32 1, %s6285_s24  }
 0x22e   : > { %s979_s4 = scalar_lea.sflag [#allocation4], %s978_s20 }
 0x232   : > { %s6817_s13 = sand.u32 1, %s7734_s19   ;;  %p7736_p9 = scmp.ne.s32.totalorder %s7735_s2, 0 }
 0x233   : > { %s5217_s8 = smul.u32 2432, %s6817_s13 }
 0x235   : > { %s6820_s12 = scalar_lea.vmem [#allocation13], %s5217_s8 }
 0x236   : > { %6068 = dma.done.wait (%p7736_p9), %s979_s4, 39168  }
 0x237   : > { %6070 = vsyncadd (%p7736_p9), %s979_s4, 4294928128  ;;  %s6827_s27 = sshll.u32 %s6817_s13, 2  ;;  %s1025_s6 = sand.u32 1, %s6085_s28  }
 0x238   : > { %s4948_s7 = sshll.u32 %s1025_s6, 9  ;;  %s991_s23 = scalar_lea.vmem [#allocation14], %s6827_s27 }
 0x239   : > { %s1000_s15 = scalar_lea.vmem [#allocation15], %s6827_s27  ;;  %s6834_s25 = scalar_lea.vmem [#allocation18], %s4948_s7 }
 0x23a   : > { %p7737_p1 = scmp.ne.s32.totalorder %s7691_s30, 0 }
 0x23c   : > { %6072 = dma.done.wait (%p7737_p1), %s979_s4, 8448  }
 0x23d   : > { %6074 = vsyncadd (%p7737_p1), %s979_s4, 4294958848  ;;  %s6840_s14 = sshll.u32 %s1025_s6, 2 }
 0x23e   : > { %6076 = dma.done.wait (%p7736_p9), %s979_s4, 16  }
 0x23f   : > { %6078 = vsyncadd (%p7736_p9), %s979_s4, 4294967280  ;;  %p1200_p5 = scmp.lt.s32.totalorder %s6285_s24, 2  ;;  %v6130_v0 = vmov 0.0   ;;  %vm6131_vm0 = vmmov 0   ;;  %s7738_s19 = sld [smem:[#allocation59_spill]]  ;;  %v5402_v1 = vld [vmem:[#allocation3] sm:$0xff]  }
 0x240   : > { %5115 = vmatprep.subr.bf16.mxu0 %v6130_v0  ;;  %5131 = vmatprep.mubr.msk.bf16.mxu0 %vm6131_vm0, %v6130_v0  ;;  %s7739_s3 = sld [smem:[#allocation61_spill]]  ;;  %v5403_v2 = vld [vmem:[#allocation3 + $0x8] sm:$0xff]   ;;  %v5404_v3 = vld [vmem:[#allocation3 + $0x10] sm:$0xff]   ;;  %v5405_v4 = vld [vmem:[#allocation3 + $0x18] sm:$0xff]   ;;  %vm1351_vm1 = vcmask 1043456   ;;  %vm1352_vm2 = vcmask 1044480  }
 0x241   : > { %s1201_s30 = scalar_select %p1200_p5, %s6285_s24, 2  ;;  %5116 = vmatpush3.bf16.msra.mxu0 %v5402_v1  ;;  %v5406_v5 = vld [vmem:[#allocation3 + $0x20] sm:$0xff]   ;;  %v5407_v6 = vld [vmem:[#allocation3 + $0x28] sm:$0xff]   ;;  %v6132_v7 = vmov 65535   ;;  %v5408_v9 = vld [vmem:[#allocation3 + $0x30] sm:$0xff]   ;;  %v6133_v19 = vmov 0  }
 0x242   : > { %5117 = vmatprep.subr.bf16.mxu0 %v6130_v0  ;;  %v1353_v8 = vsel %vm1351_vm1, 4294967295, %v6132_v7  ;;  %v5412_v10 = vld [vmem:[#allocation7 + $0x4] ss:$8 sps:$4 sm:$0x1f]   ;;  %v5409_v11 = vld [vmem:[#allocation3 + $0x38] sm:$0xff]   ;;  %s7740_s0 = sld [smem:[#allocation39_spill]] }
 0x243   : > { %s5061_s6 = sshll.u32 %s1201_s30, 8  ;;  %s4955_s7 = sshll.u32 %s1201_s30, 3  ;;  %v5410_v12 = vld [vmem:[#allocation7] ss:$8 sps:$4 sm:$0x1f]   ;;  %v1354_v13 = vsel %vm1352_vm2, %v1353_v8, 0 }
 0x244   : > { %v2048_v14 = vld [vmem:[%s6820_s12 + $0x408] sm:$0xff]  ;;  %v1359_v15 = vand.u32 %v5412_v10, %v1354_v13  ;;  %v1356_v17 = vand.u32 %v5410_v12, %v1354_v13  ;;  %v2047_v20 = vld [vmem:[%s6820_s12 + $0x400] sm:$0xff]  ;;  %vm1347_vm3 = vcmask 72704   ;;  %v5420_v51 = vld [vmem:[#allocation10 + $0x14] ss:$8 sps:$4 sm:$0xff]   ;;  %p5016_p8 = scmp.le.s32.totalorder %s6285_s24, 0 }
 0x245   : > { %s6856_s20 = scalar_lea.vmem %s7738_s19, %s5061_s6  ;;  %5118 = vmatpush3.bf16.msra.mxu0 %v5403_v2  ;;  %v2176_v18 = vunpack.c.l.s8.bf16 %v2048_v14  ;;  %s7741_s19 = sld [smem:[#allocation42_spill]]  ;;  %v2175_v23 = vunpack.c.l.s8.bf16 %v2047_v20  ;;  %v2180_v25 = vunpack.c.h.s8.bf16 %v2048_v14  ;;  %v2052_v26 = vld [vmem:[%s6820_s12 + $0x428] sm:$0xff]  ;;  %v2179_v27 = vunpack.c.h.s8.bf16 %v2047_v20  ;;  %v2051_v29 = vld [vmem:[%s6820_s12 + $0x420] sm:$0xff]  ;;  %v5426_v61 = vld [vmem:[#allocation10 + $0x34] ss:$8 sps:$4 sm:$0xff]  }
 0x246   : > { %s6861_s2 = scalar_lea.vmem %s7739_s3, %s4955_s7  ;;  %5119 = vmatprep.subr.bf16.mxu0 %v6130_v0  ;;  %s7742_s6 = sld [smem:[#allocation40_spill]]  ;;  %v2184_v28 = vunpack.c.l.s8.bf16 %v2052_v26  ;;  %v2183_v30 = vunpack.c.l.s8.bf16 %v2051_v29  ;;  %v2188_v31 = vunpack.c.h.s8.bf16 %v2052_v26  ;;  %v2056_v32 = vld [vmem:[%s6820_s12 + $0x448] sm:$0xff]  ;;  %v2187_v33 = vunpack.c.h.s8.bf16 %v2051_v29  ;;  %v2055_v35 = vld [vmem:[%s6820_s12 + $0x440] sm:$0xff]  ;;  %v5432_v7 = vld [vmem:[#allocation10 + $0x54] ss:$8 sps:$4 sm:$0xff]  }
 0x247   : > { %v2192_v34 = vunpack.c.l.s8.bf16 %v2056_v32  ;;  %v2191_v36 = vunpack.c.l.s8.bf16 %v2055_v35  ;;  %v2196_v37 = vunpack.c.h.s8.bf16 %v2056_v32  ;;  %v2060_v38 = vld [vmem:[%s6820_s12 + $0x468] sm:$0xff]  ;;  %v2195_v39 = vunpack.c.h.s8.bf16 %v2055_v35  ;;  %v2059_v41 = vld [vmem:[%s6820_s12 + $0x460] sm:$0xff]  ;;  %s7746_s24 = scalar_lea.vmem (!%p5016_p8), [#allocation19], %s6840_s14 }
 0x248   : > { %v1210_v16 = vld [vmem:[%s7740_s0] sm:$0xf]  ;;  %v2200_v40 = vunpack.c.l.s8.bf16 %v2060_v38  ;;  %v2199_v42 = vunpack.c.l.s8.bf16 %v2059_v41  ;;  %v2204_v43 = vunpack.c.h.s8.bf16 %v2060_v38  ;;  %v2203_v45 = vunpack.c.h.s8.bf16 %v2059_v41  ;;  %v2063_v48 = vld [vmem:[%s6820_s12 + $0x480] sm:$0xff]  ;;  %v5422_v53 = vld [vmem:[#allocation10 + $0x10] ss:$8 sps:$4 sm:$0xff]  }
 0x249   : > { %5120 = vmatpush3.bf16.msra.mxu0 %v5404_v3  ;;  %v2064_v44 = vld [vmem:[%s6820_s12 + $0x488] sm:$0xff]  ;;  %v2207_v50 = vunpack.c.l.s8.bf16 %v2063_v48  ;;  %v2211_v55 = vunpack.c.h.s8.bf16 %v2063_v48  ;;  %v2067_v58 = vld [vmem:[%s6820_s12 + $0x4a0] sm:$0xff] }
 0x24a   : > { %5121 = vmatprep.subr.bf16.mxu0 %v6130_v0  ;;  %v5417_v46 = vld [vmem:[#allocation10 + $0x4] ss:$8 sps:$4 sm:$0xff]   ;;  %v2208_v47 = vunpack.c.l.s8.bf16 %v2064_v44  ;;  %v5419_v49 = vld [vmem:[#allocation10] ss:$8 sps:$4 sm:$0xff]   ;;  %v2212_v52 = vunpack.c.h.s8.bf16 %v2064_v44  ;;  %v2215_v60 = vunpack.c.l.s8.bf16 %v2067_v58  ;;  %v5428_v63 = vld [vmem:[#allocation10 + $0x30] ss:$8 sps:$4 sm:$0xff]   ;;  %v2219_v1 = vunpack.c.h.s8.bf16 %v2067_v58 }
 0x24b   : > { %v6872_v21 = vld [vmem:[%s7741_s19] sm:$0xff]  ;;  %1610 = vmatprep.subr.bf16.mxu1 %v5417_v46  ;;  %v5425_v59 = vld [vmem:[#allocation10 + $0x20] ss:$8 sps:$4 sm:$0xff]  }
 0x24c   : > { %v1324_v22 = vld [vmem:[%s7742_s6] sm:$0xf]  ;;  %v6879_v24 = vcombine.high %v6872_v21, %v6872_v21  ;;  %1611 = vmatpush1.bf16.msra.mxu1 %v5419_v49  ;;  %v2075_v14 = vld [vmem:[%s6820_s12 + $0x4e0] sm:$0xff]  ;;  %v5440_v20 = vld [vmem:[#allocation10 + $0x70] ss:$8 sps:$4 sm:$0xff]   ;;  %s7743_s6 = sld [smem:[#allocation41_spill]] }
 0x24d   : > { %5122 = vmatpush3.bf16.msra.mxu0 %v5405_v4  ;;  %v2068_v54 = vld [vmem:[%s6820_s12 + $0x4a8] sm:$0xff]  ;;  %1612 = vmatprep.subr.bf16.mxu1 %v5420_v51  ;;  %v2071_v4 = vld [vmem:[%s6820_s12 + $0x4c0] sm:$0xff] }
 0x24e   : > { %5123 = vmatprep.subr.bf16.mxu0 %v6130_v0  ;;  %v5423_v56 = vld [vmem:[#allocation10 + $0x24] ss:$8 sps:$4 sm:$0xff]   ;;  %v2216_v57 = vunpack.c.l.s8.bf16 %v2068_v54  ;;  %v2220_v62 = vunpack.c.h.s8.bf16 %v2068_v54  ;;  %v5443_v29 = vld [vmem:[#allocation10 + $0x80] ss:$8 sps:$4 sm:$0xff]   ;;  %v5448_v35 = vld [vmem:[#allocation10 + $0x90] ss:$8 sps:$4 sm:$0xff]  }
 0x24f   : > { %v5429_v2 = vld [vmem:[#allocation10 + $0x44] ss:$8 sps:$4 sm:$0xff]   ;;  %v5454_v44 = vld [vmem:[#allocation10 + $0xb0] ss:$8 sps:$4 sm:$0xff]  }
 0x250   : > { %1613 = vmatpush1.bf16.msra.mxu1 %v5422_v53  ;;  %v2076_v10 = vld [vmem:[%s6820_s12 + $0x4e8] sm:$0xff]  ;;  %v2087_v48 = vld [vmem:[%s6820_s12 + $0x540] sm:$0xff]  ;;  %v5458_v53 = vld [vmem:[#allocation10 + $0xd4] ss:$8 sps:$4 sm:$0xff]  }
 0x251   : > { %5124 = vmatpush3.bf16.msra.mxu0 %v5406_v5  ;;  %1614 = vmatprep.subr.bf16.mxu1 %v5423_v56  ;;  %v5431_v5 = vld [vmem:[#allocation10 + $0x40] ss:$8 sps:$4 sm:$0xff]   ;;  %v5435_v12 = vld [vmem:[#allocation10 + $0x64] ss:$8 sps:$4 sm:$0xff]   ;;  %v2232_v13 = vunpack.c.l.s8.bf16 %v2076_v10  ;;  %v2255_v51 = vunpack.c.l.s8.bf16 %v2087_v48  ;;  %v2259_v56 = vunpack.c.h.s8.bf16 %v2087_v48 }
 0x252   : > { %5125 = vmatprep.subr.bf16.mxu0 %v6130_v0  ;;  %v5455_v49 = vld [vmem:[#allocation10 + $0xc4] ss:$8 sps:$4 sm:$0xff]  }
 0x253   : > { %v2092_v54 = vld [vmem:[%s6820_s12 + $0x568] sm:$0xff]  ;;  %v2091_v58 = vld [vmem:[%s6820_s12 + $0x560] sm:$0xff] }
 0x254   : > { %1615 = vmatpush1.bf16.msra.mxu1 %v5425_v59  ;;  %v5461_v59 = vld [vmem:[#allocation10 + $0xe4] ss:$8 sps:$4 sm:$0xff]  }
 0x255   : > { %5126 = vmatpush3.bf16.msra.mxu0 %v5407_v6  ;;  %1616 = vmatprep.subr.bf16.mxu1 %v5426_v61  ;;  %v2223_v6 = vunpack.c.l.s8.bf16 %v2071_v4  ;;  %v2263_v61 = vunpack.c.l.s8.bf16 %v2091_v58 }
 0x256   : > { %5127 = vmatprep.subr.bf16.mxu0 %v6130_v0 }
 0x258   : > { %1617 = vmatpush1.bf16.msra.mxu1 %v5428_v63  ;;  %v5464_v63 = vld [vmem:[#allocation10 + $0xf4] ss:$8 sps:$4 sm:$0xff]  }
 0x259   : > { %5128 = vmatpush3.bf16.msra.mxu0 %v5408_v9  ;;  %1618 = vmatprep.subr.bf16.mxu1 %v5429_v2  ;;  %v5434_v9 = vld [vmem:[#allocation10 + $0x50] ss:$8 sps:$4 sm:$0xff]   ;;  %v2267_v2 = vunpack.c.h.s8.bf16 %v2091_v58 }
 0x25a   : > { %5129 = vmatprep.subr.bf16.mxu0 %v6130_v0  ;;  %v2072_v0 = vld [vmem:[%s6820_s12 + $0x4c8] sm:$0xff] }
 0x25b   : > { %v2224_v3 = vunpack.c.l.s8.bf16 %v2072_v0  ;;  %v2228_v8 = vunpack.c.h.s8.bf16 %v2072_v0  ;;  %v2096_v0 = vld [vmem:[%s6820_s12 + $0x588] sm:$0xff] }
 0x25c   : > { %1619 = vmatpush1.bf16.msra.mxu1 %v5431_v5  ;;  %v2095_v5 = vld [vmem:[%s6820_s12 + $0x580] sm:$0xff]  ;;  %v2128_v58 = vld [vmem:[%s6820_s12 + $0x688] sm:$0xff] }
 0x25d   : > { %5130 = vmatpush3.bf16.msra.mxu0 %v5409_v11  ;;  %1620 = vmatprep.subr.bf16.mxu1 %v5432_v7  ;;  %v2227_v11 = vunpack.c.h.s8.bf16 %v2071_v4  ;;  %v2272_v4 = vunpack.c.l.s8.bf16 %v2096_v0  ;;  %v2271_v7 = vunpack.c.l.s8.bf16 %v2095_v5 }
 0x25e   : > { %1361 = vmatprep.subr.bf16.mxu0 %v1359_v15  ;;  %v5437_v15 = vld [vmem:[#allocation10 + $0x60] ss:$8 sps:$4 sm:$0xff]  }
 0x260   : > { %5132 = vmatmul.mubr.bf16.vlgmr.msra.gmra.mrb[0].mxu0 %v1210_v16  ;;  %1621 = vmatpush1.bf16.msra.mxu1 %v5434_v9  ;;  %v2231_v16 = vunpack.c.l.s8.bf16 %v2075_v14  ;;  %v2100_v9 = vld [vmem:[%s6820_s12 + $0x5a8] sm:$0xff] }
 0x261   : > { %1362 = vmatpush1.bf16.msra.mxu0 %v1356_v17  ;;  %1393 = vmatprep.mubr.bf16.mxu0 %v6133_v19  ;;  %v5438_v17 = vld [vmem:[#allocation10 + $0x74] ss:$8 sps:$4 sm:$0xff]  }
 0x262   : > { %2459 = vmatprep.subr.bf16.mxu0 %v2176_v18  ;;  %1622 = vmatprep.subr.bf16.mxu1 %v5435_v12  ;;  %v2236_v18 = vunpack.c.h.s8.bf16 %v2076_v10  ;;  %v2275_v10 = vunpack.c.h.s8.bf16 %v2095_v5  ;;  %v2099_v12 = vld [vmem:[%s6820_s12 + $0x5a0] sm:$0xff] }
 0x264   : > { %1623 = vmatpush1.bf16.msra.mxu1 %v5437_v15  ;;  %v2104_v15 = vld [vmem:[%s6820_s12 + $0x5c8] sm:$0xff] }
 0x265   : > { %1624 = vmatprep.subr.bf16.mxu1 %v5438_v17  ;;  %v2288_v17 = vunpack.c.l.s8.bf16 %v2104_v15 }
 0x268   : > { %4967 = vmatmul.mubr.msk.bf16.vlgmr.msra.gmra.mrb[4].mxu0 %vm1347_vm3, %v1324_v22  ;;  %v2080_v22 = vld [vmem:[%s6820_s12 + $0x508] sm:$0xff]  ;;  %1625 = vmatpush1.bf16.msra.mxu1 %v5440_v20 }
 0x269   : > { %2460 = vmatpush1.bf16.msra.mxu0 %v2175_v23  ;;  %2491 = vmatprep.mubr.bf16.mxu0 %v6879_v24  ;;  %v2235_v23 = vunpack.c.h.s8.bf16 %v2075_v14  ;;  %v2240_v26 = vunpack.c.l.s8.bf16 %v2080_v22  ;;  %v2284_v14 = vunpack.c.h.s8.bf16 %v2100_v9 }
 0x26a   : > { %2461 = vmatprep.subr.bf16.mxu0 %v2180_v25  ;;  %v5441_v25 = vld [vmem:[#allocation10 + $0x84] ss:$8 sps:$4 sm:$0xff]  }
 0x26b   : > { %1626 = vmatprep.subr.bf16.mxu1 %v5441_v25 }
 0x26c   : > { %1627 = vmatpush1.bf16.msra.mxu1 %v5443_v29 }
 0x26d   : > { %2462 = vmatpush1.bf16.msra.mxu0 %v2179_v27  ;;  %v2079_v27 = vld [vmem:[%s6820_s12 + $0x500] sm:$0xff] }
 0x26e   : > { %2463 = vmatprep.subr.bf16.mxu0 %v2184_v28  ;;  %v6901_v28 = vld [vmem:[%s7741_s19 + $0x8] sm:$0xff] }
 0x26f   : > { %v6909_v32 = vcombine.high %v6901_v28, %v6901_v28 }
 0x271   : > { %2464 = vmatpush1.bf16.msra.mxu0 %v2183_v30  ;;  %v6905_v30 = vcombine.low %v6872_v21, %v6872_v21  ;;  %v2243_v21 = vunpack.c.h.s8.bf16 %v2079_v27 }
 0x272   : > { %2465 = vmatprep.subr.bf16.mxu0 %v2188_v31  ;;  %v2239_v31 = vunpack.c.l.s8.bf16 %v2079_v27  ;;  %v2107_v27 = vld [vmem:[%s6820_s12 + $0x5e0] sm:$0xff] }
 0x273   : > { %v2295_v29 = vunpack.c.l.s8.bf16 %v2107_v27 }
 0x275   : > { %2466 = vmatpush1.bf16.msra.mxu0 %v2187_v33  ;;  %v5444_v33 = vld [vmem:[#allocation10 + $0x94] ss:$8 sps:$4 sm:$0xff]  }
 0x276   : > { %2467 = vmatprep.subr.bf16.mxu0 %v2192_v34  ;;  %v2244_v34 = vunpack.c.h.s8.bf16 %v2080_v22  ;;  %1628 = vmatprep.subr.bf16.mxu1 %v5444_v33  ;;  %v2292_v22 = vunpack.c.h.s8.bf16 %v2104_v15  ;;  %v2112_v33 = vld [vmem:[%s6820_s12 + $0x608] sm:$0xff] }
 0x277   : > { %1629 = vmatpush1.bf16.msra.mxu1 %v5448_v35  ;;  %v2304_v35 = vunpack.c.l.s8.bf16 %v2112_v33 }
 0x279   : > { %2468 = vmatpush1.bf16.msra.mxu0 %v2191_v36  ;;  %v2084_v36 = vld [vmem:[%s6820_s12 + $0x528] sm:$0xff] }
 0x27a   : > { %2469 = vmatprep.subr.bf16.mxu0 %v2196_v37  ;;  %v5449_v37 = vld [vmem:[#allocation10 + $0xa4] ss:$8 sps:$4 sm:$0xff]   ;;  %v2248_v38 = vunpack.c.l.s8.bf16 %v2084_v36 }
 0x27b   : > { %1630 = vmatprep.subr.bf16.mxu1 %v5449_v37  ;;  %v6940_v37 = vcombine.low %v6901_v28, %v6901_v28 }
 0x27d   : > { %2470 = vmatpush1.bf16.msra.mxu0 %v2195_v39  ;;  %v2083_v39 = vld [vmem:[%s6820_s12 + $0x520] sm:$0xff] }
 0x27e   : > { %2471 = vmatprep.subr.bf16.mxu0 %v2200_v40  ;;  %v5451_v40 = vld [vmem:[#allocation10 + $0xa0] ss:$8 sps:$4 sm:$0xff]   ;;  %v2247_v41 = vunpack.c.l.s8.bf16 %v2083_v39  ;;  %v2251_v46 = vunpack.c.h.s8.bf16 %v2083_v39 }
 0x27f   : > { %1631 = vmatpush1.bf16.msra.mxu1 %v5451_v40  ;;  %v2308_v40 = vunpack.c.h.s8.bf16 %v2112_v33 }
 0x281   : > { %2472 = vmatpush1.bf16.msra.mxu0 %v2199_v42  ;;  %v5452_v42 = vld [vmem:[#allocation10 + $0xb4] ss:$8 sps:$4 sm:$0xff]  }
 0x282   : > { %2473 = vmatprep.subr.bf16.mxu0 %v2204_v43  ;;  %v2252_v43 = vunpack.c.h.s8.bf16 %v2084_v36  ;;  %1632 = vmatprep.subr.bf16.mxu1 %v5452_v42  ;;  %v2111_v36 = vld [vmem:[%s6820_s12 + $0x600] sm:$0xff] }
 0x283   : > { %1633 = vmatpush1.bf16.msra.mxu1 %v5454_v44  ;;  %v2307_v42 = vunpack.c.h.s8.bf16 %v2111_v36 }
 0x284   : > { %1634 = vmatprep.subr.bf16.mxu1 %v5455_v49  ;;  %v2119_v49 = vld [vmem:[%s6820_s12 + $0x640] sm:$0xff] }
 0x285   : > { %2474 = vmatpush1.bf16.msra.mxu0 %v2203_v45  ;;  %v2088_v45 = vld [vmem:[%s6820_s12 + $0x548] sm:$0xff] }
 0x286   : > { %2475 = vmatprep.subr.bf16.mxu0 %v2208_v47  ;;  %v2256_v47 = vunpack.c.l.s8.bf16 %v2088_v45 }
 0x289   : > { %2476 = vmatpush1.bf16.msra.mxu0 %v2207_v50  ;;  %v5457_v50 = vld [vmem:[#allocation10 + $0xc0] ss:$8 sps:$4 sm:$0xff]  }
 0x28a   : > { %2477 = vmatprep.subr.bf16.mxu0 %v2212_v52  ;;  %1635 = vmatpush1.bf16.msra.mxu1 %v5457_v50  ;;  %v2260_v52 = vunpack.c.h.s8.bf16 %v2088_v45  ;;  %v2319_v50 = vunpack.c.l.s8.bf16 %v2119_v49 }
 0x28b   : > { %1636 = vmatprep.subr.bf16.mxu1 %v5458_v53  ;;  %v2323_v53 = vunpack.c.h.s8.bf16 %v2119_v49 }
 0x28d   : > { %2478 = vmatpush1.bf16.msra.mxu0 %v2211_v55  ;;  %v5460_v55 = vld [vmem:[#allocation10 + $0xd0] ss:$8 sps:$4 sm:$0xff]  }
 0x28e   : > { %2479 = vmatprep.subr.bf16.mxu0 %v2216_v57  ;;  %1637 = vmatpush1.bf16.msra.mxu1 %v5460_v55  ;;  %v2264_v57 = vunpack.c.l.s8.bf16 %v2092_v54  ;;  %v2123_v55 = vld [vmem:[%s6820_s12 + $0x660] sm:$0xff] }
 0x28f   : > { %1638 = vmatprep.subr.bf16.mxu1 %v5461_v59  ;;  %v2331_v59 = vunpack.c.h.s8.bf16 %v2123_v55 }
 0x291   : > { %2480 = vmatpush1.bf16.msra.mxu0 %v2215_v60  ;;  %v5463_v60 = vld [vmem:[#allocation10 + $0xe0] ss:$8 sps:$4 sm:$0xff]  }
 0x292   : > { %2481 = vmatprep.subr.bf16.mxu0 %v2220_v62  ;;  %1639 = vmatpush1.bf16.msra.mxu1 %v5463_v60  ;;  %v2268_v62 = vunpack.c.h.s8.bf16 %v2092_v54  ;;  %v2336_v60 = vunpack.c.l.s8.bf16 %v2128_v58 }
 0x293   : > { %1640 = vmatprep.subr.bf16.mxu1 %v5464_v63  ;;  %v2340_v63 = vunpack.c.h.s8.bf16 %v2128_v58 }
 0x295   : > { %2482 = vmatpush1.bf16.msra.mxu0 %v2219_v1  ;;  %v5466_v1 = vld [vmem:[#allocation10 + $0xf0] ss:$8 sps:$4 sm:$0xff]  }
 0x296   : > { %2483 = vmatprep.subr.bf16.mxu0 %v2224_v3  ;;  %1641 = vmatpush1.bf16.msra.mxu1 %v5466_v1  ;;  %v6921_v3 = vld [vmem:[%s6820_s12 + $0x418] sm:$0xff] }
 0x299   : > { %2484 = vmatpush1.bf16.msra.mxu0 %v2223_v6  ;;  %v2178_v6 = vunpack.c.l.s8.bf16 %v6921_v3 }
 0x29a   : > { %2485 = vmatprep.subr.bf16.mxu0 %v2228_v8  ;;  %v2276_v8 = vunpack.c.h.s8.bf16 %v2096_v0  ;;  %v2132_v0 = vld [vmem:[%s6820_s12 + $0x6a8] sm:$0xff] }
 0x29b   : > { %2623 = vmatprep.subr.bf16.mxu1 %v2178_v6  ;;  %v2348_v6 = vunpack.c.h.s8.bf16 %v2132_v0 }
 0x29d   : > { %2486 = vmatpush1.bf16.msra.mxu0 %v2227_v11  ;;  %v2280_v11 = vunpack.c.l.s8.bf16 %v2100_v9 }
 0x29e   : > { %2487 = vmatprep.subr.bf16.mxu0 %v2232_v13  ;;  %v2279_v13 = vunpack.c.l.s8.bf16 %v2099_v12 }
 0x2a1   : > { %2488 = vmatpush1.bf16.msra.mxu0 %v2231_v16  ;;  %v2283_v16 = vunpack.c.h.s8.bf16 %v2099_v12 }
 0x2a2   : > { %2489 = vmatprep.subr.bf16.mxu0 %v2236_v18  ;;  %v2103_v18 = vld [vmem:[%s6820_s12 + $0x5c0] sm:$0xff] }
 0x2a3   : > { %v2287_v20 = vunpack.c.l.s8.bf16 %v2103_v18  ;;  %v2291_v25 = vunpack.c.h.s8.bf16 %v2103_v18 }
 0x2a5   : > { %2490 = vmatpush1.bf16.msra.mxu0 %v2235_v23  ;;  %v2108_v23 = vld [vmem:[%s6820_s12 + $0x5e8] sm:$0xff] }
 0x2a6   : > { %2500 = vmatprep.subr.bf16.mxu0 %v2240_v26  ;;  %v2296_v26 = vunpack.c.l.s8.bf16 %v2108_v23 }
 0x2a8   : > { %2492 = vmatmul.mubr.bf16.vlgmr.msra.gmra.mrb[8].mxu0 %v6905_v30 }
 0x2a9   : > { %2501 = vmatpush1.bf16.msra.mxu0 %v2239_v31  ;;  %2532 = vmatprep.mubr.bf16.mxu0 %v6909_v32  ;;  %v2300_v31 = vunpack.c.h.s8.bf16 %v2108_v23 }
 0x2aa   : > { %2502 = vmatprep.subr.bf16.mxu0 %v2244_v34  ;;  %v2299_v34 = vunpack.c.h.s8.bf16 %v2107_v27 }
 0x2ad   : > { %2503 = vmatpush1.bf16.msra.mxu0 %v2243_v21  ;;  %v6936_v21 = vld [vmem:[%s7741_s19 + $0x10] sm:$0xff] }
 0x2ae   : > { %2504 = vmatprep.subr.bf16.mxu0 %v2248_v38  ;;  %v2303_v38 = vunpack.c.l.s8.bf16 %v2111_v36  ;;  %v6944_v39 = vcombine.high %v6936_v21, %v6936_v21  ;;  %v6971_v27 = vcombine.low %v6936_v21, %v6936_v21  ;;  %v2147_v21 = vld [vmem:[%s6820_s12 + $0x720] sm:$0xff] }
 0x2b1   : > { %2505 = vmatpush1.bf16.msra.mxu0 %v2247_v41  ;;  %v2116_v41 = vld [vmem:[%s6820_s12 + $0x628] sm:$0xff] }
 0x2b2   : > { %2506 = vmatprep.subr.bf16.mxu0 %v2252_v43  ;;  %v2312_v28 = vunpack.c.l.s8.bf16 %v2116_v41  ;;  %v2115_v43 = vld [vmem:[%s6820_s12 + $0x620] sm:$0xff]  ;;  %v2316_v45 = vunpack.c.h.s8.bf16 %v2116_v41 }
 0x2b3   : > { %v2311_v44 = vunpack.c.l.s8.bf16 %v2115_v43 }
 0x2b5   : > { %2507 = vmatpush1.bf16.msra.mxu0 %v2251_v46  ;;  %v2120_v46 = vld [vmem:[%s6820_s12 + $0x648] sm:$0xff] }
 0x2b6   : > { %2508 = vmatprep.subr.bf16.mxu0 %v2256_v47  ;;  %v2315_v47 = vunpack.c.h.s8.bf16 %v2115_v43  ;;  %v2320_v48 = vunpack.c.l.s8.bf16 %v2120_v46  ;;  %v2379_v43 = vunpack.c.h.s8.bf16 %v2147_v21 }
 0x2b9   : > { %2509 = vmatpush1.bf16.msra.mxu0 %v2255_v51  ;;  %v2324_v51 = vunpack.c.h.s8.bf16 %v2120_v46 }
 0x2ba   : > { %2510 = vmatprep.subr.bf16.mxu0 %v2260_v52  ;;  %v2124_v52 = vld [vmem:[%s6820_s12 + $0x668] sm:$0xff] }
 0x2bb   : > { %v2328_v54 = vunpack.c.l.s8.bf16 %v2124_v52 }
 0x2bd   : > { %2511 = vmatpush1.bf16.msra.mxu0 %v2259_v56  ;;  %v2327_v56 = vunpack.c.l.s8.bf16 %v2123_v55  ;;  %v2156_v55 = vld [vmem:[%s6820_s12 + $0x768] sm:$0xff] }
 0x2be   : > { %2512 = vmatprep.subr.bf16.mxu0 %v2264_v57  ;;  %v2332_v57 = vunpack.c.h.s8.bf16 %v2124_v52 }
 0x2c1   : > { %2513 = vmatpush1.bf16.msra.mxu0 %v2263_v61  ;;  %v2127_v61 = vld [vmem:[%s6820_s12 + $0x680] sm:$0xff] }
 0x2c2   : > { %2514 = vmatprep.subr.bf16.mxu0 %v2268_v62  ;;  %v2335_v62 = vunpack.c.l.s8.bf16 %v2127_v61  ;;  %v2339_v1 = vunpack.c.h.s8.bf16 %v2127_v61 }
 0x2c5   : > { %2515 = vmatpush1.bf16.msra.mxu0 %v2267_v2  ;;  %v2344_v2 = vunpack.c.l.s8.bf16 %v2132_v0 }
 0x2c6   : > { %2516 = vmatprep.subr.bf16.mxu0 %v2272_v4  ;;  %v2131_v4 = vld [vmem:[%s6820_s12 + $0x6a0] sm:$0xff] }
 0x2c7   : > { %v2343_v5 = vunpack.c.l.s8.bf16 %v2131_v4 }
 0x2c9   : > { %2517 = vmatpush1.bf16.msra.mxu0 %v2271_v7  ;;  %v2136_v7 = vld [vmem:[%s6820_s12 + $0x6c8] sm:$0xff] }
 0x2ca   : > { %2518 = vmatprep.subr.bf16.mxu0 %v2276_v8  ;;  %v2347_v8 = vunpack.c.h.s8.bf16 %v2131_v4  ;;  %v2352_v9 = vunpack.c.l.s8.bf16 %v2136_v7  ;;  %v2356_v12 = vunpack.c.h.s8.bf16 %v2136_v7  ;;  %v2049_v7 = vld [vmem:[%s6820_s12 + $0x410] sm:$0xff] }
 0x2cd   : > { %2519 = vmatpush1.bf16.msra.mxu0 %v2275_v10  ;;  %v2135_v10 = vld [vmem:[%s6820_s12 + $0x6c0] sm:$0xff] }
 0x2ce   : > { %2520 = vmatprep.subr.bf16.mxu0 %v2280_v11  ;;  %v2351_v11 = vunpack.c.l.s8.bf16 %v2135_v10 }
 0x2d1   : > { %2521 = vmatpush1.bf16.msra.mxu0 %v2279_v13  ;;  %v2140_v13 = vld [vmem:[%s6820_s12 + $0x6e8] sm:$0xff] }
 0x2d2   : > { %2522 = vmatprep.subr.bf16.mxu0 %v2284_v14  ;;  %v2355_v14 = vunpack.c.h.s8.bf16 %v2135_v10  ;;  %v2360_v15 = vunpack.c.l.s8.bf16 %v2140_v13  ;;  %v2364_v18 = vunpack.c.h.s8.bf16 %v2140_v13 }
 0x2d5   : > { %2523 = vmatpush1.bf16.msra.mxu0 %v2283_v16  ;;  %v2139_v16 = vld [vmem:[%s6820_s12 + $0x6e0] sm:$0xff] }
 0x2d6   : > { %2524 = vmatprep.subr.bf16.mxu0 %v2288_v17  ;;  %v2359_v17 = vunpack.c.l.s8.bf16 %v2139_v16 }
 0x2d9   : > { %2525 = vmatpush1.bf16.msra.mxu0 %v2287_v20  ;;  %v2144_v20 = vld [vmem:[%s6820_s12 + $0x708] sm:$0xff] }
 0x2da   : > { %2526 = vmatprep.subr.bf16.mxu0 %v2292_v22  ;;  %v2363_v22 = vunpack.c.h.s8.bf16 %v2139_v16  ;;  %v2368_v23 = vunpack.c.l.s8.bf16 %v2144_v20  ;;  %v2372_v33 = vunpack.c.h.s8.bf16 %v2144_v20  ;;  %v2159_v16 = vld [vmem:[%s6820_s12 + $0x780] sm:$0xff]  ;;  %v2181_v20 = vunpack.c.h.s8.bf16 %v2049_v7 }
 0x2dd   : > { %2527 = vmatpush1.bf16.msra.mxu0 %v2291_v25  ;;  %v2143_v25 = vld [vmem:[%s6820_s12 + $0x700] sm:$0xff] }
 0x2de   : > { %2528 = vmatprep.subr.bf16.mxu0 %v2296_v26  ;;  %v6967_v26 = vld [vmem:[%s7741_s19 + $0x18] sm:$0xff] }
 0x2e1   : > { %2529 = vmatpush1.bf16.msra.mxu0 %v2295_v29  ;;  %v2367_v29 = vunpack.c.l.s8.bf16 %v2143_v25 }
 0x2e2   : > { %2530 = vmatprep.subr.bf16.mxu0 %v2300_v31  ;;  %v6975_v31 = vcombine.high %v6967_v26, %v6967_v26 }
 0x2e5   : > { %2531 = vmatpush1.bf16.msra.mxu0 %v2299_v34  ;;  %v2148_v34 = vld [vmem:[%s6820_s12 + $0x728] sm:$0xff] }
 0x2e6   : > { %2541 = vmatprep.subr.bf16.mxu0 %v2304_v35  ;;  %v2371_v35 = vunpack.c.h.s8.bf16 %v2143_v25  ;;  %v2376_v36 = vunpack.c.l.s8.bf16 %v2148_v34  ;;  %v2380_v41 = vunpack.c.h.s8.bf16 %v2148_v34  ;;  %v2053_v25 = vld [vmem:[%s6820_s12 + $0x430] sm:$0xff] }
 0x2e8   : > { %2533 = vmatmul.mubr.bf16.vlgmr.msra.gmra.mrb[8].mxu0 %v6940_v37 }
 0x2e9   : > { %2542 = vmatpush1.bf16.msra.mxu0 %v2303_v38  ;;  %2573 = vmatprep.mubr.bf16.mxu0 %v6944_v39  ;;  %v1329_v38 = vlaneseq }
 0x2ea   : > { %2543 = vmatprep.subr.bf16.mxu0 %v2308_v40  ;;  %v2375_v40 = vunpack.c.l.s8.bf16 %v2147_v21  ;;  %v2058_v21 = vld [vmem:[%s6820_s12 + $0x458] sm:$0xff] }
 0x2ed   : > { %2544 = vmatpush1.bf16.msra.mxu0 %v2307_v42  ;;  %v2152_v42 = vld [vmem:[%s6820_s12 + $0x748] sm:$0xff] }
 0x2ee   : > { %2545 = vmatprep.subr.bf16.mxu0 %v2312_v28  ;;  %v6982_v28 = vshrl.u32 %v1329_v38, 7 }
 0x2f0   : > { %v6991_v52 = vsub.s32 1, %v6982_v28 }
 0x2f1   : > { %2546 = vmatpush1.bf16.msra.mxu0 %v2311_v44  ;;  %v2384_v44 = vunpack.c.l.s8.bf16 %v2152_v42 }
 0x2f2   : > { %2547 = vmatprep.subr.bf16.mxu0 %v2316_v45  ;;  %v2151_v45 = vld [vmem:[%s6820_s12 + $0x740] sm:$0xff] }
 0x2f3   : > { %v2387_v58 = vunpack.c.h.s8.bf16 %v2151_v45 }
 0x2f5   : > { %2548 = vmatpush1.bf16.msra.mxu0 %v2315_v47 }
 0x2f6   : > { %2549 = vmatprep.subr.bf16.mxu0 %v2320_v48  ;;  %v6988_v48 = vsub.s32 0, %v6982_v28 }
 0x2f9   : > { %2550 = vmatpush1.bf16.msra.mxu0 %v2319_v50  ;;  %v2383_v50 = vunpack.c.l.s8.bf16 %v2151_v45 }
 0x2fa   : > { %2551 = vmatprep.subr.bf16.mxu0 %v2324_v51  ;;  %v1327_v51 = vld [vmem:[#allocation8] sm:$0x3] }
 0x2fd   : > { %2552 = vmatpush1.bf16.msra.mxu0 %v2323_v53 }
 0x2fe   : > { %2553 = vmatprep.subr.bf16.mxu0 %v2328_v54  ;;  %v2388_v54 = vunpack.c.h.s8.bf16 %v2152_v42  ;;  %v2057_v42 = vld [vmem:[%s6820_s12 + $0x450] sm:$0xff] }
 0x2ff   : > { %v2193_v45 = vunpack.c.l.s8.bf16 %v2057_v42 }
 0x301   : > { %2554 = vmatpush1.bf16.msra.mxu0 %v2327_v56  ;;  %v1332_v56 = vrot.slane %v1327_v51, %v6988_v48 }
 0x302   : > { %2555 = vmatprep.subr.bf16.mxu0 %v2332_v57  ;;  %v1336_v57 = vrot.slane %v1327_v51, %v6991_v52  ;;  %v2062_v51 = vld [vmem:[%s6820_s12 + $0x478] sm:$0xff] }
 0x305   : > { %2556 = vmatpush1.bf16.msra.mxu0 %v2331_v59  ;;  %v2392_v59 = vunpack.c.l.s8.bf16 %v2156_v55 }
 0x306   : > { %2557 = vmatprep.subr.bf16.mxu0 %v2336_v60  ;;  %v2155_v60 = vld [vmem:[%s6820_s12 + $0x760] sm:$0xff] }
 0x309   : > { %2558 = vmatpush1.bf16.msra.mxu0 %v2335_v62 }
 0x30a   : > { %2559 = vmatprep.subr.bf16.mxu0 %v2340_v63 }
 0x30d   : > { %2560 = vmatpush1.bf16.msra.mxu0 %v2339_v1 }
 0x30e   : > { %2561 = vmatprep.subr.bf16.mxu0 %v2344_v2  ;;  %v2391_v2 = vunpack.c.l.s8.bf16 %v2155_v60 }
 0x311   : > { %2562 = vmatpush1.bf16.msra.mxu0 %v2343_v5 }
 0x312   : > { %2563 = vmatprep.subr.bf16.mxu0 %v2348_v6  ;;  %v2396_v6 = vunpack.c.h.s8.bf16 %v2156_v55 }
 0x315   : > { %2564 = vmatpush1.bf16.msra.mxu0 %v2347_v8 }
 0x316   : > { %2565 = vmatprep.subr.bf16.mxu0 %v2352_v9  ;;  %v2160_v9 = vld [vmem:[%s6820_s12 + $0x788] sm:$0xff] }
 0x319   : > { %2566 = vmatpush1.bf16.msra.mxu0 %v2351_v11  ;;  %v2395_v11 = vunpack.c.h.s8.bf16 %v2155_v60 }
 0x31a   : > { %2567 = vmatprep.subr.bf16.mxu0 %v2356_v12  ;;  %v2177_v12 = vunpack.c.l.s8.bf16 %v2049_v7  ;;  %v1660_v7 = vld [vmem:[%s6820_s12 + $0x8] sm:$0xff] }
 0x31d   : > { %2568 = vmatpush1.bf16.msra.mxu0 %v2355_v14  ;;  %v2400_v14 = vunpack.c.l.s8.bf16 %v2160_v9 }
 0x31e   : > { %2569 = vmatprep.subr.bf16.mxu0 %v2360_v15  ;;  %v2182_v15 = vunpack.c.h.s8.bf16 %v6921_v3  ;;  %v2403_v3 = vunpack.c.h.s8.bf16 %v2159_v16 }
 0x321   : > { %2570 = vmatpush1.bf16.msra.mxu0 %v2359_v17  ;;  %v2054_v17 = vld [vmem:[%s6820_s12 + $0x438] sm:$0xff] }
 0x322   : > { %2571 = vmatprep.subr.bf16.mxu0 %v2364_v18  ;;  %v2399_v18 = vunpack.c.l.s8.bf16 %v2159_v16 }
 0x325   : > { %2572 = vmatpush1.bf16.msra.mxu0 %v2363_v22  ;;  %v2404_v22 = vunpack.c.h.s8.bf16 %v2160_v9 }
 0x326   : > { %2582 = vmatprep.subr.bf16.mxu0 %v2368_v23  ;;  %v2186_v23 = vunpack.c.l.s8.bf16 %v2054_v17 }
 0x328   : > { %2574 = vmatmul.mubr.bf16.vlgmr.msra.gmra.mrb[8].mxu0 %v6971_v27 }
 0x329   : > { %2583 = vmatpush1.bf16.msra.mxu0 %v2367_v29  ;;  %2614 = vmatprep.mubr.bf16.mxu0 %v6975_v31  ;;  %v2164_v29 = vld [vmem:[%s6820_s12 + $0x7a8] sm:$0xff] }
 0x32a   : > { %2584 = vmatprep.subr.bf16.mxu0 %v2372_v33  ;;  %v2185_v33 = vunpack.c.l.s8.bf16 %v2053_v25  ;;  %v2408_v34 = vunpack.c.l.s8.bf16 %v2164_v29 }
 0x32d   : > { %2585 = vmatpush1.bf16.msra.mxu0 %v2371_v35  ;;  %v2190_v35 = vunpack.c.h.s8.bf16 %v2054_v17 }
 0x32e   : > { %2586 = vmatprep.subr.bf16.mxu0 %v2376_v36  ;;  %v2163_v36 = vld [vmem:[%s6820_s12 + $0x7a0] sm:$0xff] }
 0x32f   : > { %v2407_v38 = vunpack.c.l.s8.bf16 %v2163_v36 }
 0x331   : > { %2587 = vmatpush1.bf16.msra.mxu0 %v2375_v40  ;;  %v2189_v40 = vunpack.c.h.s8.bf16 %v2053_v25 }
 0x332   : > { %2588 = vmatprep.subr.bf16.mxu0 %v2380_v41  ;;  %v2194_v41 = vunpack.c.l.s8.bf16 %v2058_v21 }
 0x333   : > { %v6985_v46 = vpop.f32.mrb[0].mxu0 }
 0x334   : > { %v5133_v47 = vpop.f32.mrb[1].mxu0 }
 0x335   : > { %2589 = vmatpush1.bf16.msra.mxu0 %v2379_v43  ;;  %v1319_v49 = vpop.f32.mrb[2].mxu0  ;;  %v2168_v43 = vld [vmem:[%s6820_s12 + $0x7c8] sm:$0xff] }
 0x336   : > { %v5134_v53 = vpop.f32.mrb[3].mxu0  ;;  %2590 = vmatprep.subr.bf16.mxu0 %v2384_v44  ;;  %v2411_v44 = vunpack.c.h.s8.bf16 %v2163_v36  ;;  %v2416_v47 = vunpack.c.l.s8.bf16 %v2168_v43  ;;  %v2198_v49 = vunpack.c.h.s8.bf16 %v2058_v21  ;;  %v2420_v55 = vunpack.c.h.s8.bf16 %v2168_v43 }
 0x339   : > { %2591 = vmatpush1.bf16.msra.mxu0 %v2383_v50  ;;  %v2167_v50 = vld [vmem:[%s6820_s12 + $0x7c0] sm:$0xff] }
 0x33a   : > { %2592 = vmatprep.subr.bf16.mxu0 %v2388_v54  ;;  %v2415_v53 = vunpack.c.l.s8.bf16 %v2167_v50  ;;  %v2197_v54 = vunpack.c.h.s8.bf16 %v2057_v42 }
 0x33b   : > { %v1395_v61 = vpop.f32.mrb[4].mxu0 }
 0x33c   : > { %v1396_v62 = vadd.f32 %v1395_v61, %v1332_v56  ;;  %v1397_v63 = vpop.f32.mrb[5].mxu0  ;;  %v2202_v56 = vunpack.c.l.s8.bf16 %v2062_v51 }
 0x33d   : > { %v1398_v0 = vadd.f32 %v1397_v63, %v1336_v57  ;;  %2593 = vmatpush1.bf16.msra.mxu0 %v2387_v58  ;;  %v1399_v1 = vpop.f32.mrb[6].mxu0  ;;  %v2061_v57 = vld [vmem:[%s6820_s12 + $0x470] sm:$0xff]  ;;  %v2172_v58 = vld [vmem:[%s6820_s12 + $0x7e8] sm:$0xff]  ;;  %v2171_v63 = vld [vmem:[%s6820_s12 + $0x7e0] sm:$0xff] }
 0x33e   : > { %v1402_v4 = vmax.f32 %v1396_v62, 0.0  ;;  %v1400_v5 = vpop.f32.mrb[7].mxu0  ;;  %2594 = vmatprep.subr.bf16.mxu0 %v2392_v59  ;;  %v2419_v59 = vunpack.c.h.s8.bf16 %v2167_v50  ;;  %v2201_v60 = vunpack.c.l.s8.bf16 %v2061_v57  ;;  %v2424_v61 = vunpack.c.l.s8.bf16 %v2172_v58 }
 0x33f   : > { %v1403_v8 = vmax.f32 %v1398_v0, 0.0  ;;  %v2206_v62 = vunpack.c.h.s8.bf16 %v2062_v51  ;;  %v2066_v0 = vld [vmem:[%s6820_s12 + $0x498] sm:$0xff]  ;;  %v2423_v1 = vunpack.c.l.s8.bf16 %v2171_v63 }
 0x340   : > { %v1404_v13 = vpack.c.bf16 %v1402_v4, %v1402_v4  ;;  %v2428_v4 = vunpack.c.h.s8.bf16 %v2172_v58  ;;  %v2210_v5 = vunpack.c.l.s8.bf16 %v2066_v0 }
 0x341   : > { %2595 = vmatpush1.bf16.msra.mxu0 %v2391_v2  ;;  %v1405_v10 = vpack.c.bf16 %v1403_v8, %v1403_v8  ;;  %v2205_v2 = vunpack.c.h.s8.bf16 %v2061_v57  ;;  %v2427_v8 = vunpack.c.h.s8.bf16 %v2171_v63 }
 0x342   : > { %2596 = vmatprep.subr.bf16.mxu0 %v2396_v6  ;;  %v2065_v6 = vld [vmem:[%s6820_s12 + $0x490] sm:$0xff] }
 0x343   : > { %1642 = vmatprep.mubr.bf16.mxu1 %v1405_v10  ;;  %v2209_v9 = vunpack.c.l.s8.bf16 %v2065_v6  ;;  %v2214_v10 = vunpack.c.h.s8.bf16 %v2066_v0  ;;  %v2213_v16 = vunpack.c.h.s8.bf16 %v2065_v6 }
 0x344   : > { %1643 = vmatmul.mubr.bf16.vlgmr.msra.gmra.mrb[0].mxu1 %v1404_v13  ;;  %v2070_v13 = vld [vmem:[%s6820_s12 + $0x4b8] sm:$0xff] }
 0x345   : > { %2597 = vmatpush1.bf16.msra.mxu0 %v2395_v11  ;;  %2624 = vmatpush1.bf16.msra.mxu1 %v2177_v12  ;;  %v1788_v11 = vunpack.c.l.s8.bf16 %v1660_v7  ;;  %v1659_v12 = vld [vmem:[%s6820_s12] sm:$0xff] }
 0x346   : > { %2598 = vmatprep.subr.bf16.mxu0 %v2400_v14  ;;  %2625 = vmatprep.subr.bf16.mxu1 %v2182_v15  ;;  %v7021_v14 = vcombine.low %v6967_v26, %v6967_v26  ;;  %v7026_v15 = vld [vmem:[%s7743_s6] sm:$0xff]  ;;  %v1787_v17 = vunpack.c.l.s8.bf16 %v1659_v12 }
 0x347   : > { %2655 = vmatprep.mubr.bf16.mxu1 %v6879_v24  ;;  %v2412_v24 = vunpack.c.h.s8.bf16 %v2164_v29  ;;  %v7032_v26 = vcombine.high %v7026_v15, %v7026_v15  ;;  %v1791_v29 = vunpack.c.h.s8.bf16 %v1659_v12 }
 0x349   : > { %2599 = vmatpush1.bf16.msra.mxu0 %v2399_v18  ;;  %2626 = vmatpush1.bf16.msra.mxu1 %v2181_v20  ;;  %v2218_v18 = vunpack.c.l.s8.bf16 %v2070_v13  ;;  %v1792_v20 = vunpack.c.h.s8.bf16 %v1660_v7 }
 0x34a   : > { %2600 = vmatprep.subr.bf16.mxu0 %v2404_v22  ;;  %2627 = vmatprep.subr.bf16.mxu1 %v2186_v23  ;;  %v2069_v22 = vld [vmem:[%s6820_s12 + $0x4b0] sm:$0xff]  ;;  %v1664_v23 = vld [vmem:[%s6820_s12 + $0x28] sm:$0xff] }
 0x34b   : > { %v2217_v25 = vunpack.c.l.s8.bf16 %v2069_v22  ;;  %v2221_v36 = vunpack.c.h.s8.bf16 %v2069_v22 }
 0x34d   : > { %2601 = vmatpush1.bf16.msra.mxu0 %v2403_v3  ;;  %2628 = vmatpush1.bf16.msra.mxu1 %v2185_v33  ;;  %v2222_v3 = vunpack.c.h.s8.bf16 %v2070_v13  ;;  %v1796_v33 = vunpack.c.l.s8.bf16 %v1664_v23 }
 0x34e   : > { %2602 = vmatprep.subr.bf16.mxu0 %v2408_v34  ;;  %2629 = vmatprep.subr.bf16.mxu1 %v2190_v35  ;;  %v1663_v34 = vld [vmem:[%s6820_s12 + $0x20] sm:$0xff]  ;;  %v2074_v35 = vld [vmem:[%s6820_s12 + $0x4d8] sm:$0xff] }
 0x34f   : > { %v1795_v21 = vunpack.c.l.s8.bf16 %v1663_v34  ;;  %v1799_v43 = vunpack.c.h.s8.bf16 %v1663_v34 }
 0x351   : > { %2603 = vmatpush1.bf16.msra.mxu0 %v2407_v38  ;;  %2630 = vmatpush1.bf16.msra.mxu1 %v2189_v40  ;;  %v2226_v38 = vunpack.c.l.s8.bf16 %v2074_v35  ;;  %v1800_v40 = vunpack.c.h.s8.bf16 %v1664_v23 }
 0x352   : > { %2604 = vmatprep.subr.bf16.mxu0 %v2412_v24  ;;  %2631 = vmatprep.subr.bf16.mxu1 %v2194_v41  ;;  %v2073_v24 = vld [vmem:[%s6820_s12 + $0x4d0] sm:$0xff]  ;;  %v1668_v41 = vld [vmem:[%s6820_s12 + $0x48] sm:$0xff] }
 0x353   : > { %v2225_v42 = vunpack.c.l.s8.bf16 %v2073_v24  ;;  %v2229_v50 = vunpack.c.h.s8.bf16 %v2073_v24 }
 0x355   : > { %2605 = vmatpush1.bf16.msra.mxu0 %v2411_v44  ;;  %2632 = vmatpush1.bf16.msra.mxu1 %v2193_v45  ;;  %v2230_v44 = vunpack.c.h.s8.bf16 %v2074_v35  ;;  %v1804_v45 = vunpack.c.l.s8.bf16 %v1668_v41 }
 0x356   : > { %2606 = vmatprep.subr.bf16.mxu0 %v2416_v47  ;;  %2633 = vmatprep.subr.bf16.mxu1 %v2198_v49  ;;  %v1667_v47 = vld [vmem:[%s6820_s12 + $0x40] sm:$0xff]  ;;  %v2078_v49 = vld [vmem:[%s6820_s12 + $0x4f8] sm:$0xff] }
 0x357   : > { %v1803_v51 = vunpack.c.l.s8.bf16 %v1667_v47  ;;  %v1807_v58 = vunpack.c.h.s8.bf16 %v1667_v47 }
 0x359   : > { %2607 = vmatpush1.bf16.msra.mxu0 %v2415_v53  ;;  %2634 = vmatpush1.bf16.msra.mxu1 %v2197_v54  ;;  %v2234_v53 = vunpack.c.l.s8.bf16 %v2078_v49  ;;  %v1808_v54 = vunpack.c.h.s8.bf16 %v1668_v41 }
 0x35a   : > { %2608 = vmatprep.subr.bf16.mxu0 %v2420_v55  ;;  %2635 = vmatprep.subr.bf16.mxu1 %v2202_v56  ;;  %v2077_v55 = vld [vmem:[%s6820_s12 + $0x4f0] sm:$0xff]  ;;  %v1672_v56 = vld [vmem:[%s6820_s12 + $0x68] sm:$0xff] }
 0x35b   : > { %v2233_v57 = vunpack.c.l.s8.bf16 %v2077_v55  ;;  %v2237_v63 = vunpack.c.h.s8.bf16 %v2077_v55 }
 0x35d   : > { %2609 = vmatpush1.bf16.msra.mxu0 %v2419_v59  ;;  %2636 = vmatpush1.bf16.msra.mxu1 %v2201_v60  ;;  %v2238_v59 = vunpack.c.h.s8.bf16 %v2078_v49  ;;  %v1812_v60 = vunpack.c.l.s8.bf16 %v1672_v56 }
 0x35e   : > { %2610 = vmatprep.subr.bf16.mxu0 %v2424_v61  ;;  %2637 = vmatprep.subr.bf16.mxu1 %v2206_v62  ;;  %v1671_v61 = vld [vmem:[%s6820_s12 + $0x60] sm:$0xff]  ;;  %v2082_v62 = vld [vmem:[%s6820_s12 + $0x518] sm:$0xff] }
 0x35f   : > { %v1811_v0 = vunpack.c.l.s8.bf16 %v1671_v61  ;;  %v1815_v7 = vunpack.c.h.s8.bf16 %v1671_v61 }
 0x361   : > { %2611 = vmatpush1.bf16.msra.mxu0 %v2423_v1  ;;  %2638 = vmatpush1.bf16.msra.mxu1 %v2205_v2  ;;  %v2242_v1 = vunpack.c.l.s8.bf16 %v2082_v62  ;;  %v1816_v2 = vunpack.c.h.s8.bf16 %v1672_v56 }
 0x362   : > { %2612 = vmatprep.subr.bf16.mxu0 %v2428_v4  ;;  %2639 = vmatprep.subr.bf16.mxu1 %v2210_v5  ;;  %v2081_v4 = vld [vmem:[%s6820_s12 + $0x510] sm:$0xff]  ;;  %v1676_v5 = vld [vmem:[%s6820_s12 + $0x88] sm:$0xff] }
 0x363   : > { %v2241_v6 = vunpack.c.l.s8.bf16 %v2081_v4  ;;  %v2245_v12 = vunpack.c.h.s8.bf16 %v2081_v4 }
 0x365   : > { %2613 = vmatpush1.bf16.msra.mxu0 %v2427_v8  ;;  %2640 = vmatpush1.bf16.msra.mxu1 %v2209_v9  ;;  %v2246_v8 = vunpack.c.h.s8.bf16 %v2082_v62  ;;  %v1820_v9 = vunpack.c.l.s8.bf16 %v1676_v5 }
 0x366   : > { %2641 = vmatprep.subr.bf16.mxu1 %v2214_v10  ;;  %2815 = vmatprep.subr.bf16.mxu0 %v1788_v11  ;;  %v1675_v10 = vld [vmem:[%s6820_s12 + $0x80] sm:$0xff]  ;;  %v2086_v11 = vld [vmem:[%s6820_s12 + $0x538] sm:$0xff] }
 0x367   : > { %v1819_v13 = vunpack.c.l.s8.bf16 %v1675_v10  ;;  %v1823_v23 = vunpack.c.h.s8.bf16 %v1675_v10 }
 0x368   : > { %2615 = vmatmul.mubr.bf16.vlgmr.msra.gmra.mrb[8].mxu0 %v7021_v14 }
 0x369   : > { %2642 = vmatpush1.bf16.msra.mxu1 %v2213_v16  ;;  %2816 = vmatpush1.bf16.msra.mxu0 %v1787_v17  ;;  %v2250_v16 = vunpack.c.l.s8.bf16 %v2086_v11  ;;  %v1824_v17 = vunpack.c.h.s8.bf16 %v1676_v5 }
 0x36a   : > { %2643 = vmatprep.subr.bf16.mxu1 %v2218_v18  ;;  %2817 = vmatprep.subr.bf16.mxu0 %v1792_v20  ;;  %v2085_v18 = vld [vmem:[%s6820_s12 + $0x530] sm:$0xff]  ;;  %v1680_v20 = vld [vmem:[%s6820_s12 + $0xa8] sm:$0xff] }
 0x36b   : > { %2847 = vmatprep.mubr.bf16.mxu0 %v7032_v26  ;;  %v2249_v22 = vunpack.c.l.s8.bf16 %v2085_v18  ;;  %v1832_v35 = vunpack.c.h.s8.bf16 %v1680_v20 }
 0x36d   : > { %2644 = vmatpush1.bf16.msra.mxu1 %v2217_v25  ;;  %2818 = vmatpush1.bf16.msra.mxu0 %v1791_v29  ;;  %v1828_v25 = vunpack.c.l.s8.bf16 %v1680_v20  ;;  %v1679_v29 = vld [vmem:[%s6820_s12 + $0xa0] sm:$0xff] }
 0x36e   : > { %2645 = vmatprep.subr.bf16.mxu1 %v2222_v3  ;;  %2819 = vmatprep.subr.bf16.mxu0 %v1796_v33  ;;  %v2090_v3 = vld [vmem:[%s6820_s12 + $0x558] sm:$0xff]  ;;  %v2253_v33 = vunpack.c.h.s8.bf16 %v2085_v18  ;;  %v1827_v34 = vunpack.c.l.s8.bf16 %v1679_v29 }
 0x36f   : > { %v2262_v24 = vunpack.c.h.s8.bf16 %v2090_v3 }
 0x371   : > { %2646 = vmatpush1.bf16.msra.mxu1 %v2221_v36  ;;  %2820 = vmatpush1.bf16.msra.mxu0 %v1795_v21  ;;  %v2089_v36 = vld [vmem:[%s6820_s12 + $0x550] sm:$0xff]  ;;  %v1684_v21 = vld [vmem:[%s6820_s12 + $0xc8] sm:$0xff] }
 0x372   : > { %2647 = vmatprep.subr.bf16.mxu1 %v2226_v38  ;;  %2821 = vmatprep.subr.bf16.mxu0 %v1800_v40  ;;  %v2257_v38 = vunpack.c.l.s8.bf16 %v2089_v36  ;;  %v1831_v40 = vunpack.c.h.s8.bf16 %v1679_v29  ;;  %v1836_v41 = vunpack.c.l.s8.bf16 %v1684_v21  ;;  %v1840_v49 = vunpack.c.h.s8.bf16 %v1684_v21 }
 0x375   : > { %2648 = vmatpush1.bf16.msra.mxu1 %v2225_v42  ;;  %2822 = vmatpush1.bf16.msra.mxu0 %v1799_v43  ;;  %v1683_v42 = vld [vmem:[%s6820_s12 + $0xc0] sm:$0xff]  ;;  %v2094_v43 = vld [vmem:[%s6820_s12 + $0x578] sm:$0xff] }
 0x376   : > { %2649 = vmatprep.subr.bf16.mxu1 %v2230_v44  ;;  %2823 = vmatprep.subr.bf16.mxu0 %v1804_v45  ;;  %v2261_v44 = vunpack.c.h.s8.bf16 %v2089_v36  ;;  %v1835_v45 = vunpack.c.l.s8.bf16 %v1683_v42  ;;  %v2266_v47 = vunpack.c.l.s8.bf16 %v2094_v43  ;;  %v2270_v55 = vunpack.c.h.s8.bf16 %v2094_v43 }
 0x379   : > { %2650 = vmatpush1.bf16.msra.mxu1 %v2229_v50  ;;  %2824 = vmatpush1.bf16.msra.mxu0 %v1803_v51  ;;  %v2093_v50 = vld [vmem:[%s6820_s12 + $0x570] sm:$0xff]  ;;  %v1688_v51 = vld [vmem:[%s6820_s12 + $0xe8] sm:$0xff] }
 0x37a   : > { %2651 = vmatprep.subr.bf16.mxu1 %v2234_v53  ;;  %2825 = vmatprep.subr.bf16.mxu0 %v1808_v54  ;;  %v2265_v53 = vunpack.c.l.s8.bf16 %v2093_v50  ;;  %v1839_v54 = vunpack.c.h.s8.bf16 %v1683_v42  ;;  %v1844_v56 = vunpack.c.l.s8.bf16 %v1688_v51  ;;  %v1848_v62 = vunpack.c.h.s8.bf16 %v1688_v51 }
 0x37d   : > { %2652 = vmatpush1.bf16.msra.mxu1 %v2233_v57  ;;  %2826 = vmatpush1.bf16.msra.mxu0 %v1807_v58  ;;  %v1687_v57 = vld [vmem:[%s6820_s12 + $0xe0] sm:$0xff]  ;;  %v2098_v58 = vld [vmem:[%s6820_s12 + $0x598] sm:$0xff] }
 0x37e   : > { %2653 = vmatprep.subr.bf16.mxu1 %v2238_v59  ;;  %2827 = vmatprep.subr.bf16.mxu0 %v1812_v60  ;;  %v2269_v59 = vunpack.c.h.s8.bf16 %v2093_v50  ;;  %v1843_v60 = vunpack.c.l.s8.bf16 %v1687_v57  ;;  %v2274_v61 = vunpack.c.l.s8.bf16 %v2098_v58  ;;  %v2278_v4 = vunpack.c.h.s8.bf16 %v2098_v58 }
 0x381   : > { %2654 = vmatpush1.bf16.msra.mxu1 %v2237_v63  ;;  %2828 = vmatpush1.bf16.msra.mxu0 %v1811_v0  ;;  %v2097_v63 = vld [vmem:[%s6820_s12 + $0x590] sm:$0xff]  ;;  %v1692_v0 = vld [vmem:[%s6820_s12 + $0x108] sm:$0xff] }
 0x382   : > { %2664 = vmatprep.subr.bf16.mxu1 %v2242_v1  ;;  %2829 = vmatprep.subr.bf16.mxu0 %v1816_v2  ;;  %v2273_v1 = vunpack.c.l.s8.bf16 %v2097_v63  ;;  %v1847_v2 = vunpack.c.h.s8.bf16 %v1687_v57  ;;  %v1852_v5 = vunpack.c.l.s8.bf16 %v1692_v0  ;;  %v2277_v10 = vunpack.c.h.s8.bf16 %v2097_v63 }
 0x384   : > { %2656 = vmatmul.mubr.bf16.vlgmr.msra.gmra.mrb[4].mxu1 %v6905_v30  ;;  %v2254_v30 = vunpack.c.h.s8.bf16 %v2086_v11 }
 0x385   : > { %2665 = vmatpush1.bf16.msra.mxu1 %v2241_v6  ;;  %2830 = vmatpush1.bf16.msra.mxu0 %v1815_v7  ;;  %v1691_v6 = vld [vmem:[%s6820_s12 + $0x100] sm:$0xff]  ;;  %v2102_v7 = vld [vmem:[%s6820_s12 + $0x5b8] sm:$0xff] }
 0x386   : > { %2666 = vmatprep.subr.bf16.mxu1 %v2246_v8  ;;  %2831 = vmatprep.subr.bf16.mxu0 %v1820_v9  ;;  %v7070_v8 = vcombine.low %v7026_v15, %v7026_v15  ;;  %v7075_v9 = vld [vmem:[%s7743_s6 + $0x8] sm:$0xff]  ;;  %v1851_v11 = vunpack.c.l.s8.bf16 %v1691_v6  ;;  %v1855_v20 = vunpack.c.h.s8.bf16 %v1691_v6 }
 0x387   : > { %2696 = vmatprep.mubr.bf16.mxu1 %v6909_v32  ;;  %v2258_v32 = vunpack.c.l.s8.bf16 %v2090_v3  ;;  %v7081_v15 = vcombine.high %v7075_v9, %v7075_v9 }
 0x389   : > { %2667 = vmatpush1.bf16.msra.mxu1 %v2245_v12  ;;  %2832 = vmatpush1.bf16.msra.mxu0 %v1819_v13  ;;  %v2282_v12 = vunpack.c.l.s8.bf16 %v2102_v7  ;;  %v1856_v13 = vunpack.c.h.s8.bf16 %v1692_v0 }
 0x38a   : > { %2668 = vmatprep.subr.bf16.mxu1 %v2250_v16  ;;  %2833 = vmatprep.subr.bf16.mxu0 %v1824_v17  ;;  %v2101_v16 = vld [vmem:[%s6820_s12 + $0x5b0] sm:$0xff]  ;;  %v1696_v17 = vld [vmem:[%s6820_s12 + $0x128] sm:$0xff] }
 0x38b   : > { %v2281_v18 = vunpack.c.l.s8.bf16 %v2101_v16  ;;  %v2285_v29 = vunpack.c.h.s8.bf16 %v2101_v16 }
 0x38d   : > { %2669 = vmatpush1.bf16.msra.mxu1 %v2249_v22  ;;  %2834 = vmatpush1.bf16.msra.mxu0 %v1823_v23  ;;  %v2286_v22 = vunpack.c.h.s8.bf16 %v2102_v7  ;;  %v1860_v23 = vunpack.c.l.s8.bf16 %v1696_v17 }
 0x38e   : > { %2670 = vmatprep.subr.bf16.mxu1 %v2254_v30  ;;  %2835 = vmatprep.subr.bf16.mxu0 %v1828_v25  ;;  %v1695_v30 = vld [vmem:[%s6820_s12 + $0x120] sm:$0xff]  ;;  %v2106_v25 = vld [vmem:[%s6820_s12 + $0x5d8] sm:$0xff] }
 0x38f   : > { %v1859_v3 = vunpack.c.l.s8.bf16 %v1695_v30  ;;  %v1863_v21 = vunpack.c.h.s8.bf16 %v1695_v30 }
 0x391   : > { %2671 = vmatpush1.bf16.msra.mxu1 %v2253_v33  ;;  %2836 = vmatpush1.bf16.msra.mxu0 %v1827_v34  ;;  %v2290_v33 = vunpack.c.l.s8.bf16 %v2106_v25  ;;  %v1864_v34 = vunpack.c.h.s8.bf16 %v1696_v17 }
 0x392   : > { %2672 = vmatprep.subr.bf16.mxu1 %v2258_v32  ;;  %2837 = vmatprep.subr.bf16.mxu0 %v1832_v35  ;;  %v2105_v32 = vld [vmem:[%s6820_s12 + $0x5d0] sm:$0xff]  ;;  %v1700_v35 = vld [vmem:[%s6820_s12 + $0x148] sm:$0xff] }
 0x393   : > { %v2289_v36 = vunpack.c.l.s8.bf16 %v2105_v32  ;;  %v2293_v42 = vunpack.c.h.s8.bf16 %v2105_v32 }
 0x395   : > { %2673 = vmatpush1.bf16.msra.mxu1 %v2257_v38  ;;  %2838 = vmatpush1.bf16.msra.mxu0 %v1831_v40  ;;  %v2294_v38 = vunpack.c.h.s8.bf16 %v2106_v25  ;;  %v1868_v40 = vunpack.c.l.s8.bf16 %v1700_v35 }
 0x396   : > { %2674 = vmatprep.subr.bf16.mxu1 %v2262_v24  ;;  %2839 = vmatprep.subr.bf16.mxu0 %v1836_v41  ;;  %v1699_v24 = vld [vmem:[%s6820_s12 + $0x140] sm:$0xff]  ;;  %v2110_v41 = vld [vmem:[%s6820_s12 + $0x5f8] sm:$0xff] }
 0x397   : > { %v1867_v43 = vunpack.c.l.s8.bf16 %v1699_v24  ;;  %v1871_v51 = vunpack.c.h.s8.bf16 %v1699_v24 }
 0x399   : > { %2675 = vmatpush1.bf16.msra.mxu1 %v2261_v44  ;;  %2840 = vmatpush1.bf16.msra.mxu0 %v1835_v45  ;;  %v2298_v44 = vunpack.c.l.s8.bf16 %v2110_v41  ;;  %v1872_v45 = vunpack.c.h.s8.bf16 %v1700_v35 }
 0x39a   : > { %2676 = vmatprep.subr.bf16.mxu1 %v2266_v47  ;;  %2841 = vmatprep.subr.bf16.mxu0 %v1840_v49  ;;  %v2109_v47 = vld [vmem:[%s6820_s12 + $0x5f0] sm:$0xff]  ;;  %v1704_v49 = vld [vmem:[%s6820_s12 + $0x168] sm:$0xff] }
 0x39b   : > { %v2297_v50 = vunpack.c.l.s8.bf16 %v2109_v47  ;;  %v2301_v57 = vunpack.c.h.s8.bf16 %v2109_v47 }
 0x39d   : > { %2677 = vmatpush1.bf16.msra.mxu1 %v2265_v53  ;;  %2842 = vmatpush1.bf16.msra.mxu0 %v1839_v54  ;;  %v2302_v53 = vunpack.c.h.s8.bf16 %v2110_v41  ;;  %v1876_v54 = vunpack.c.l.s8.bf16 %v1704_v49 }
 0x39e   : > { %2678 = vmatprep.subr.bf16.mxu1 %v2270_v55  ;;  %2843 = vmatprep.subr.bf16.mxu0 %v1844_v56  ;;  %v1703_v55 = vld [vmem:[%s6820_s12 + $0x160] sm:$0xff]  ;;  %v2114_v56 = vld [vmem:[%s6820_s12 + $0x618] sm:$0xff] }
 0x39f   : > { %v1875_v58 = vunpack.c.l.s8.bf16 %v1703_v55  ;;  %v1879_v0 = vunpack.c.h.s8.bf16 %v1703_v55 }
 0x3a1   : > { %2679 = vmatpush1.bf16.msra.mxu1 %v2269_v59  ;;  %2844 = vmatpush1.bf16.msra.mxu0 %v1843_v60  ;;  %v2306_v59 = vunpack.c.l.s8.bf16 %v2114_v56  ;;  %v1880_v60 = vunpack.c.h.s8.bf16 %v1704_v49 }
 0x3a2   : > { %2680 = vmatprep.subr.bf16.mxu1 %v2274_v61  ;;  %2845 = vmatprep.subr.bf16.mxu0 %v1848_v62  ;;  %v2113_v61 = vld [vmem:[%s6820_s12 + $0x610] sm:$0xff]  ;;  %v1708_v62 = vld [vmem:[%s6820_s12 + $0x188] sm:$0xff] }
 0x3a3   : > { %v2305_v63 = vunpack.c.l.s8.bf16 %v2113_v61  ;;  %v2309_v6 = vunpack.c.h.s8.bf16 %v2113_v61 }
 0x3a5   : > { %2681 = vmatpush1.bf16.msra.mxu1 %v2273_v1  ;;  %2846 = vmatpush1.bf16.msra.mxu0 %v1847_v2  ;;  %v2310_v1 = vunpack.c.h.s8.bf16 %v2114_v56  ;;  %v1884_v2 = vunpack.c.l.s8.bf16 %v1708_v62 }
 0x3a6   : > { %2682 = vmatprep.subr.bf16.mxu1 %v2278_v4  ;;  %2856 = vmatprep.subr.bf16.mxu0 %v1852_v5  ;;  %v1707_v4 = vld [vmem:[%s6820_s12 + $0x180] sm:$0xff]  ;;  %v2118_v5 = vld [vmem:[%s6820_s12 + $0x638] sm:$0xff] }
 0x3a7   : > { %v1883_v7 = vunpack.c.l.s8.bf16 %v1707_v4  ;;  %v1887_v17 = vunpack.c.h.s8.bf16 %v1707_v4 }
 0x3a8   : > { %2848 = vmatmul.mubr.bf16.vlgmr.msra.gmra.mrb[8].mxu0 %v7070_v8 }
 0x3a9   : > { %2683 = vmatpush1.bf16.msra.mxu1 %v2277_v10  ;;  %2857 = vmatpush1.bf16.msra.mxu0 %v1851_v11  ;;  %v2314_v10 = vunpack.c.l.s8.bf16 %v2118_v5  ;;  %v1888_v11 = vunpack.c.h.s8.bf16 %v1708_v62 }
 0x3aa   : > { %2684 = vmatprep.subr.bf16.mxu1 %v2282_v12  ;;  %2858 = vmatprep.subr.bf16.mxu0 %v1856_v13  ;;  %v2117_v12 = vld [vmem:[%s6820_s12 + $0x630] sm:$0xff]  ;;  %v1712_v13 = vld [vmem:[%s6820_s12 + $0x1a8] sm:$0xff] }
 0x3ab   : > { %2888 = vmatprep.mubr.bf16.mxu0 %v7081_v15  ;;  %v2313_v16 = vunpack.c.l.s8.bf16 %v2117_v12  ;;  %v1896_v25 = vunpack.c.h.s8.bf16 %v1712_v13 }
 0x3ad   : > { %2685 = vmatpush1.bf16.msra.mxu1 %v2281_v18  ;;  %2859 = vmatpush1.bf16.msra.mxu0 %v1855_v20  ;;  %v1892_v18 = vunpack.c.l.s8.bf16 %v1712_v13  ;;  %v1711_v20 = vld [vmem:[%s6820_s12 + $0x1a0] sm:$0xff] }
 0x3ae   : > { %2686 = vmatprep.subr.bf16.mxu1 %v2286_v22  ;;  %2860 = vmatprep.subr.bf16.mxu0 %v1860_v23  ;;  %v2122_v22 = vld [vmem:[%s6820_s12 + $0x658] sm:$0xff]  ;;  %v2317_v23 = vunpack.c.h.s8.bf16 %v2117_v12  ;;  %v1891_v30 = vunpack.c.l.s8.bf16 %v1711_v20 }
 0x3af   : > { %v2326_v32 = vunpack.c.h.s8.bf16 %v2122_v22 }
 0x3b1   : > { %2687 = vmatpush1.bf16.msra.mxu1 %v2285_v29  ;;  %2861 = vmatpush1.bf16.msra.mxu0 %v1859_v3  ;;  %v2121_v29 = vld [vmem:[%s6820_s12 + $0x650] sm:$0xff]  ;;  %v1716_v3 = vld [vmem:[%s6820_s12 + $0x1c8] sm:$0xff] }
 0x3b2   : > { %2688 = vmatprep.subr.bf16.mxu1 %v2290_v33  ;;  %2862 = vmatprep.subr.bf16.mxu0 %v1864_v34  ;;  %v2321_v33 = vunpack.c.l.s8.bf16 %v2121_v29  ;;  %v1895_v34 = vunpack.c.h.s8.bf16 %v1711_v20  ;;  %v1900_v35 = vunpack.c.l.s8.bf16 %v1716_v3  ;;  %v1904_v41 = vunpack.c.h.s8.bf16 %v1716_v3 }
 0x3b5   : > { %2689 = vmatpush1.bf16.msra.mxu1 %v2289_v36  ;;  %2863 = vmatpush1.bf16.msra.mxu0 %v1863_v21  ;;  %v1715_v36 = vld [vmem:[%s6820_s12 + $0x1c0] sm:$0xff]  ;;  %v2126_v21 = vld [vmem:[%s6820_s12 + $0x678] sm:$0xff] }
 0x3b6   : > { %2690 = vmatprep.subr.bf16.mxu1 %v2294_v38  ;;  %2864 = vmatprep.subr.bf16.mxu0 %v1868_v40  ;;  %v2325_v38 = vunpack.c.h.s8.bf16 %v2121_v29  ;;  %v1899_v40 = vunpack.c.l.s8.bf16 %v1715_v36  ;;  %v2330_v24 = vunpack.c.l.s8.bf16 %v2126_v21  ;;  %v2334_v47 = vunpack.c.h.s8.bf16 %v2126_v21 }
 0x3b9   : > { %2691 = vmatpush1.bf16.msra.mxu1 %v2293_v42  ;;  %2865 = vmatpush1.bf16.msra.mxu0 %v1867_v43  ;;  %v2125_v42 = vld [vmem:[%s6820_s12 + $0x670] sm:$0xff]  ;;  %v1720_v43 = vld [vmem:[%s6820_s12 + $0x1e8] sm:$0xff] }
 0x3ba   : > { %2692 = vmatprep.subr.bf16.mxu1 %v2298_v44  ;;  %2866 = vmatprep.subr.bf16.mxu0 %v1872_v45  ;;  %v2329_v44 = vunpack.c.l.s8.bf16 %v2125_v42  ;;  %v1903_v45 = vunpack.c.h.s8.bf16 %v1715_v36  ;;  %v1908_v49 = vunpack.c.l.s8.bf16 %v1720_v43  ;;  %v1912_v56 = vunpack.c.h.s8.bf16 %v1720_v43 }
 0x3bd   : > { %2693 = vmatpush1.bf16.msra.mxu1 %v2297_v50  ;;  %2867 = vmatpush1.bf16.msra.mxu0 %v1871_v51  ;;  %v1719_v50 = vld [vmem:[%s6820_s12 + $0x1e0] sm:$0xff]  ;;  %v2130_v51 = vld [vmem:[%s6820_s12 + $0x698] sm:$0xff] }
 0x3be   : > { %2694 = vmatprep.subr.bf16.mxu1 %v2302_v53  ;;  %2868 = vmatprep.subr.bf16.mxu0 %v1876_v54  ;;  %v2333_v53 = vunpack.c.h.s8.bf16 %v2125_v42  ;;  %v1907_v54 = vunpack.c.l.s8.bf16 %v1719_v50  ;;  %v2338_v55 = vunpack.c.l.s8.bf16 %v2130_v51  ;;  %v2342_v61 = vunpack.c.h.s8.bf16 %v2130_v51 }
 0x3c1   : > { %2695 = vmatpush1.bf16.msra.mxu1 %v2301_v57  ;;  %2869 = vmatpush1.bf16.msra.mxu0 %v1875_v58  ;;  %v2129_v57 = vld [vmem:[%s6820_s12 + $0x690] sm:$0xff]  ;;  %v1724_v58 = vld [vmem:[%s6820_s12 + $0x208] sm:$0xff] }
 0x3c2   : > { %2705 = vmatprep.subr.bf16.mxu1 %v2306_v59  ;;  %2870 = vmatprep.subr.bf16.mxu0 %v1880_v60  ;;  %v2337_v59 = vunpack.c.l.s8.bf16 %v2129_v57  ;;  %v1911_v60 = vunpack.c.h.s8.bf16 %v1719_v50  ;;  %v1916_v62 = vunpack.c.l.s8.bf16 %v1724_v58  ;;  %v2341_v4 = vunpack.c.h.s8.bf16 %v2129_v57 }
 0x3c4   : > { %2697 = vmatmul.mubr.bf16.vlgmr.msra.gmra.mrb[4].mxu1 %v6940_v37  ;;  %v2318_v37 = vunpack.c.h.s8.bf16 %v2118_v5 }
 0x3c5   : > { %2706 = vmatpush1.bf16.msra.mxu1 %v2305_v63  ;;  %2871 = vmatpush1.bf16.msra.mxu0 %v1879_v0  ;;  %v1723_v63 = vld [vmem:[%s6820_s12 + $0x200] sm:$0xff]  ;;  %v2134_v0 = vld [vmem:[%s6820_s12 + $0x6b8] sm:$0xff] }
 0x3c6   : > { %2707 = vmatprep.subr.bf16.mxu1 %v2310_v1  ;;  %2872 = vmatprep.subr.bf16.mxu0 %v1884_v2  ;;  %v7119_v1 = vcombine.low %v7075_v9, %v7075_v9  ;;  %v7124_v2 = vld [vmem:[%s7743_s6 + $0x10] sm:$0xff]  ;;  %v1915_v5 = vunpack.c.l.s8.bf16 %v1723_v63  ;;  %v1919_v13 = vunpack.c.h.s8.bf16 %v1723_v63 }
 0x3c7   : > { %2737 = vmatprep.mubr.bf16.mxu1 %v6944_v39  ;;  %v2322_v39 = vunpack.c.l.s8.bf16 %v2122_v22  ;;  %v7130_v9 = vcombine.high %v7124_v2, %v7124_v2 }
 0x3c9   : > { %2708 = vmatpush1.bf16.msra.mxu1 %v2309_v6  ;;  %2873 = vmatpush1.bf16.msra.mxu0 %v1883_v7  ;;  %v2346_v6 = vunpack.c.l.s8.bf16 %v2134_v0  ;;  %v1920_v7 = vunpack.c.h.s8.bf16 %v1724_v58 }
 0x3ca   : > { %2709 = vmatprep.subr.bf16.mxu1 %v2314_v10  ;;  %2874 = vmatprep.subr.bf16.mxu0 %v1888_v11  ;;  %v2133_v10 = vld [vmem:[%s6820_s12 + $0x6b0] sm:$0xff]  ;;  %v1728_v11 = vld [vmem:[%s6820_s12 + $0x228] sm:$0xff] }
 0x3cb   : > { %v2345_v12 = vunpack.c.l.s8.bf16 %v2133_v10  ;;  %v2349_v20 = vunpack.c.h.s8.bf16 %v2133_v10 }
 0x3cd   : > { %2710 = vmatpush1.bf16.msra.mxu1 %v2313_v16  ;;  %2875 = vmatpush1.bf16.msra.mxu0 %v1887_v17  ;;  %v2350_v16 = vunpack.c.h.s8.bf16 %v2134_v0  ;;  %v1924_v17 = vunpack.c.l.s8.bf16 %v1728_v11 }
 0x3ce   : > { %2711 = vmatprep.subr.bf16.mxu1 %v2318_v37  ;;  %2876 = vmatprep.subr.bf16.mxu0 %v1892_v18  ;;  %v1727_v37 = vld [vmem:[%s6820_s12 + $0x220] sm:$0xff]  ;;  %v2138_v18 = vld [vmem:[%s6820_s12 + $0x6d8] sm:$0xff] }
 0x3cf   : > { %v1923_v22 = vunpack.c.l.s8.bf16 %v1727_v37  ;;  %v1927_v3 = vunpack.c.h.s8.bf16 %v1727_v37 }
 0x3d1   : > { %2712 = vmatpush1.bf16.msra.mxu1 %v2317_v23  ;;  %2877 = vmatpush1.bf16.msra.mxu0 %v1891_v30  ;;  %v2354_v23 = vunpack.c.l.s8.bf16 %v2138_v18  ;;  %v1928_v30 = vunpack.c.h.s8.bf16 %v1728_v11 }
 0x3d2   : > { %2713 = vmatprep.subr.bf16.mxu1 %v2322_v39  ;;  %2878 = vmatprep.subr.bf16.mxu0 %v1896_v25  ;;  %v2137_v39 = vld [vmem:[%s6820_s12 + $0x6d0] sm:$0xff]  ;;  %v1732_v25 = vld [vmem:[%s6820_s12 + $0x248] sm:$0xff] }
 0x3d3   : > { %v2353_v29 = vunpack.c.l.s8.bf16 %v2137_v39  ;;  %v2357_v36 = vunpack.c.h.s8.bf16 %v2137_v39 }
 0x3d5   : > { %2714 = vmatpush1.bf16.msra.mxu1 %v2321_v33  ;;  %2879 = vmatpush1.bf16.msra.mxu0 %v1895_v34  ;;  %v2358_v33 = vunpack.c.h.s8.bf16 %v2138_v18  ;;  %v1932_v34 = vunpack.c.l.s8.bf16 %v1732_v25 }
 0x3d6   : > { %2715 = vmatprep.subr.bf16.mxu1 %v2326_v32  ;;  %2880 = vmatprep.subr.bf16.mxu0 %v1900_v35  ;;  %v1731_v32 = vld [vmem:[%s6820_s12 + $0x240] sm:$0xff]  ;;  %v2142_v35 = vld [vmem:[%s6820_s12 + $0x6f8] sm:$0xff] }
 0x3d7   : > { %v1931_v21 = vunpack.c.l.s8.bf16 %v1731_v32  ;;  %v1935_v43 = vunpack.c.h.s8.bf16 %v1731_v32 }
 0x3d9   : > { %2716 = vmatpush1.bf16.msra.mxu1 %v2325_v38  ;;  %2881 = vmatpush1.bf16.msra.mxu0 %v1899_v40  ;;  %v2362_v38 = vunpack.c.l.s8.bf16 %v2142_v35  ;;  %v1936_v40 = vunpack.c.h.s8.bf16 %v1732_v25 }
 0x3da   : > { %2717 = vmatprep.subr.bf16.mxu1 %v2330_v24  ;;  %2882 = vmatprep.subr.bf16.mxu0 %v1904_v41  ;;  %v2141_v24 = vld [vmem:[%s6820_s12 + $0x6f0] sm:$0xff]  ;;  %v1736_v41 = vld [vmem:[%s6820_s12 + $0x268] sm:$0xff] }
 0x3db   : > { %v2361_v42 = vunpack.c.l.s8.bf16 %v2141_v24  ;;  %v2365_v50 = vunpack.c.h.s8.bf16 %v2141_v24 }
 0x3dd   : > { %2718 = vmatpush1.bf16.msra.mxu1 %v2329_v44  ;;  %2883 = vmatpush1.bf16.msra.mxu0 %v1903_v45  ;;  %v2366_v44 = vunpack.c.h.s8.bf16 %v2142_v35  ;;  %v1940_v45 = vunpack.c.l.s8.bf16 %v1736_v41 }
 0x3de   : > { %2719 = vmatprep.subr.bf16.mxu1 %v2334_v47  ;;  %2884 = vmatprep.subr.bf16.mxu0 %v1908_v49  ;;  %v1735_v47 = vld [vmem:[%s6820_s12 + $0x260] sm:$0xff]  ;;  %v2146_v49 = vld [vmem:[%s6820_s12 + $0x718] sm:$0xff] }
 0x3df   : > { %v1939_v51 = vunpack.c.l.s8.bf16 %v1735_v47  ;;  %v1943_v58 = vunpack.c.h.s8.bf16 %v1735_v47  ;;  %v1751_v47 = vld [vmem:[%s6820_s12 + $0x2e0] sm:$0xff] }
 0x3e1   : > { %2720 = vmatpush1.bf16.msra.mxu1 %v2333_v53  ;;  %2885 = vmatpush1.bf16.msra.mxu0 %v1907_v54  ;;  %v2370_v53 = vunpack.c.l.s8.bf16 %v2146_v49  ;;  %v1944_v54 = vunpack.c.h.s8.bf16 %v1736_v41 }
 0x3e2   : > { %2721 = vmatprep.subr.bf16.mxu1 %v2338_v55  ;;  %2886 = vmatprep.subr.bf16.mxu0 %v1912_v56  ;;  %v2145_v55 = vld [vmem:[%s6820_s12 + $0x710] sm:$0xff]  ;;  %v1740_v56 = vld [vmem:[%s6820_s12 + $0x288] sm:$0xff] }
 0x3e3   : > { %v2369_v57 = vunpack.c.l.s8.bf16 %v2145_v55  ;;  %v2373_v63 = vunpack.c.h.s8.bf16 %v2145_v55  ;;  %v2161_v55 = vld [vmem:[%s6820_s12 + $0x790] sm:$0xff] }
 0x3e5   : > { %2722 = vmatpush1.bf16.msra.mxu1 %v2337_v59  ;;  %2887 = vmatpush1.bf16.msra.mxu0 %v1911_v60  ;;  %v2374_v59 = vunpack.c.h.s8.bf16 %v2146_v49  ;;  %v1948_v60 = vunpack.c.l.s8.bf16 %v1740_v56  ;;  %v2162_v49 = vld [vmem:[%s6820_s12 + $0x798] sm:$0xff] }
 0x3e6   : > { %2723 = vmatprep.subr.bf16.mxu1 %v2342_v61  ;;  %2897 = vmatprep.subr.bf16.mxu0 %v1916_v62  ;;  %v1739_v61 = vld [vmem:[%s6820_s12 + $0x280] sm:$0xff]  ;;  %v2150_v62 = vld [vmem:[%s6820_s12 + $0x738] sm:$0xff] }
 0x3e7   : > { %v1947_v0 = vunpack.c.l.s8.bf16 %v1739_v61  ;;  %v1951_v11 = vunpack.c.h.s8.bf16 %v1739_v61  ;;  %v1755_v61 = vld [vmem:[%s6820_s12 + $0x300] sm:$0xff] }
 0x3e8   : > { %2889 = vmatmul.mubr.bf16.vlgmr.msra.gmra.mrb[8].mxu0 %v7119_v1 }
 0x3e9   : > { %2724 = vmatpush1.bf16.msra.mxu1 %v2341_v4  ;;  %2898 = vmatpush1.bf16.msra.mxu0 %v1915_v5  ;;  %v2378_v4 = vunpack.c.l.s8.bf16 %v2150_v62  ;;  %v1952_v5 = vunpack.c.h.s8.bf16 %v1740_v56  ;;  %v1756_v56 = vld [vmem:[%s6820_s12 + $0x308] sm:$0xff] }
 0x3ea   : > { %2725 = vmatprep.subr.bf16.mxu1 %v2346_v6  ;;  %2899 = vmatprep.subr.bf16.mxu0 %v1920_v7  ;;  %v2149_v6 = vld [vmem:[%s6820_s12 + $0x730] sm:$0xff]  ;;  %v1744_v7 = vld [vmem:[%s6820_s12 + $0x2a8] sm:$0xff] }
 0x3eb   : > { %2929 = vmatprep.mubr.bf16.mxu0 %v7130_v9  ;;  %v2377_v10 = vunpack.c.l.s8.bf16 %v2149_v6  ;;  %v1960_v18 = vunpack.c.h.s8.bf16 %v1744_v7 }
 0x3ed   : > { %2726 = vmatpush1.bf16.msra.mxu1 %v2345_v12  ;;  %2900 = vmatpush1.bf16.msra.mxu0 %v1919_v13  ;;  %v1956_v12 = vunpack.c.l.s8.bf16 %v1744_v7  ;;  %v1743_v13 = vld [vmem:[%s6820_s12 + $0x2a0] sm:$0xff]  ;;  %v1984_v7 = vunpack.c.h.s8.bf16 %v1756_v56 }
 0x3ee   : > { %2727 = vmatprep.subr.bf16.mxu1 %v2350_v16  ;;  %2901 = vmatprep.subr.bf16.mxu0 %v1924_v17  ;;  %v2154_v16 = vld [vmem:[%s6820_s12 + $0x758] sm:$0xff]  ;;  %v2381_v17 = vunpack.c.h.s8.bf16 %v2149_v6  ;;  %v1955_v37 = vunpack.c.l.s8.bf16 %v1743_v13 }
 0x3ef   : > { %v2390_v39 = vunpack.c.h.s8.bf16 %v2154_v16 }
 0x3f1   : > { %2728 = vmatpush1.bf16.msra.mxu1 %v2349_v20  ;;  %2902 = vmatpush1.bf16.msra.mxu0 %v1923_v22  ;;  %v2153_v20 = vld [vmem:[%s6820_s12 + $0x750] sm:$0xff]  ;;  %v1748_v22 = vld [vmem:[%s6820_s12 + $0x2c8] sm:$0xff] }
 0x3f2   : > { %2729 = vmatprep.subr.bf16.mxu1 %v2354_v23  ;;  %2903 = vmatprep.subr.bf16.mxu0 %v1928_v30  ;;  %v2385_v23 = vunpack.c.l.s8.bf16 %v2153_v20  ;;  %v1959_v30 = vunpack.c.h.s8.bf16 %v1743_v13  ;;  %v1964_v25 = vunpack.c.l.s8.bf16 %v1748_v22  ;;  %v1968_v35 = vunpack.c.h.s8.bf16 %v1748_v22 }
 0x3f5   : > { %2730 = vmatpush1.bf16.msra.mxu1 %v2353_v29  ;;  %2904 = vmatpush1.bf16.msra.mxu0 %v1927_v3  ;;  %v1747_v29 = vld [vmem:[%s6820_s12 + $0x2c0] sm:$0xff]  ;;  %v2158_v3 = vld [vmem:[%s6820_s12 + $0x778] sm:$0xff] }
 0x3f6   : > { %2731 = vmatprep.subr.bf16.mxu1 %v2358_v33  ;;  %2905 = vmatprep.subr.bf16.mxu0 %v1932_v34  ;;  %v2389_v33 = vunpack.c.h.s8.bf16 %v2153_v20  ;;  %v1963_v34 = vunpack.c.l.s8.bf16 %v1747_v29  ;;  %v2394_v32 = vunpack.c.l.s8.bf16 %v2158_v3 }
 0x3f9   : > { %2732 = vmatpush1.bf16.msra.mxu1 %v2357_v36  ;;  %2906 = vmatpush1.bf16.msra.mxu0 %v1931_v21  ;;  %v2157_v36 = vld [vmem:[%s6820_s12 + $0x770] sm:$0xff] }
 0x3fa   : > { %2733 = vmatprep.subr.bf16.mxu1 %v2362_v38  ;;  %2907 = vmatprep.subr.bf16.mxu0 %v1936_v40  ;;  %v1752_v38 = vld [vmem:[%s6820_s12 + $0x2e8] sm:$0xff]  ;;  %v2393_v41 = vunpack.c.l.s8.bf16 %v2157_v36 }
 0x3fd   : > { %2734 = vmatpush1.bf16.msra.mxu1 %v2361_v42  ;;  %2908 = vmatpush1.bf16.msra.mxu0 %v1935_v43  ;;  %v1967_v42 = vunpack.c.h.s8.bf16 %v1747_v29 }
 0x3fe   : > { %2735 = vmatprep.subr.bf16.mxu1 %v2366_v44  ;;  %2909 = vmatprep.subr.bf16.mxu0 %v1940_v45  ;;  %v2398_v44 = vunpack.c.h.s8.bf16 %v2158_v3  ;;  %v1972_v45 = vunpack.c.l.s8.bf16 %v1752_v38 }
 0x401   : > { %2736 = vmatpush1.bf16.msra.mxu1 %v2365_v50  ;;  %2910 = vmatpush1.bf16.msra.mxu0 %v1939_v51  ;;  %v2397_v50 = vunpack.c.h.s8.bf16 %v2157_v36  ;;  %v1971_v51 = vunpack.c.l.s8.bf16 %v1751_v47 }
 0x402   : > { %2746 = vmatprep.subr.bf16.mxu1 %v2370_v53  ;;  %2911 = vmatprep.subr.bf16.mxu0 %v1944_v54  ;;  %v2402_v53 = vunpack.c.l.s8.bf16 %v2162_v49  ;;  %v1976_v54 = vunpack.c.h.s8.bf16 %v1752_v38 }
 0x404   : > { %2738 = vmatmul.mubr.bf16.vlgmr.msra.gmra.mrb[4].mxu1 %v6971_v27  ;;  %v2382_v27 = vunpack.c.h.s8.bf16 %v2150_v62  ;;  %v2166_v62 = vld [vmem:[%s6820_s12 + $0x7b8] sm:$0xff] }
 0x405   : > { %2747 = vmatpush1.bf16.msra.mxu1 %v2369_v57  ;;  %2912 = vmatpush1.bf16.msra.mxu0 %v1943_v58  ;;  %v2401_v57 = vunpack.c.l.s8.bf16 %v2161_v55  ;;  %v1975_v58 = vunpack.c.h.s8.bf16 %v1751_v47  ;;  %v2410_v6 = vunpack.c.l.s8.bf16 %v2166_v62  ;;  %v2414_v13 = vunpack.c.h.s8.bf16 %v2166_v62  ;;  %v1767_v47 = vld [vmem:[%s6820_s12 + $0x360] sm:$0xff]  ;;  %v1666_v62 = vld [vmem:[%s6820_s12 + $0x38] sm:$0xff] }
 0x406   : > { %2748 = vmatprep.subr.bf16.mxu1 %v2374_v59  ;;  %2913 = vmatprep.subr.bf16.mxu0 %v1948_v60  ;;  %v2406_v59 = vunpack.c.h.s8.bf16 %v2162_v49  ;;  %v1980_v60 = vunpack.c.l.s8.bf16 %v1756_v56  ;;  %v1662_v49 = vld [vmem:[%s6820_s12 + $0x18] sm:$0xff]  ;;  %v1772_v56 = vld [vmem:[%s6820_s12 + $0x388] sm:$0xff] }
 0x407   : > { %2778 = vmatprep.mubr.bf16.mxu1 %v6975_v31  ;;  %v2386_v31 = vunpack.c.l.s8.bf16 %v2154_v16 }
 0x409   : > { %2749 = vmatpush1.bf16.msra.mxu1 %v2373_v63  ;;  %2914 = vmatpush1.bf16.msra.mxu0 %v1947_v0  ;;  %v7172_v63 = vcombine.low %v7124_v2, %v7124_v2  ;;  %v7177_v0 = vld [vmem:[%s7743_s6 + $0x18] sm:$0xff] }
 0x40a   : > { %2750 = vmatprep.subr.bf16.mxu1 %v2378_v4  ;;  %2915 = vmatprep.subr.bf16.mxu0 %v1952_v5  ;;  %v2405_v4 = vunpack.c.h.s8.bf16 %v2161_v55  ;;  %v1979_v5 = vunpack.c.l.s8.bf16 %v1755_v61  ;;  %v7183_v2 = vcombine.high %v7177_v0, %v7177_v0  ;;  %v1661_v55 = vld [vmem:[%s6820_s12 + $0x10] sm:$0xff] }
 0x40d   : > { %2751 = vmatpush1.bf16.msra.mxu1 %v2377_v10  ;;  %2916 = vmatpush1.bf16.msra.mxu0 %v1951_v11  ;;  %v2165_v10 = vld [vmem:[%s6820_s12 + $0x7b0] sm:$0xff]  ;;  %v1760_v11 = vld [vmem:[%s6820_s12 + $0x328] sm:$0xff] }
 0x40e   : > { %2752 = vmatprep.subr.bf16.mxu1 %v2382_v27  ;;  %2917 = vmatprep.subr.bf16.mxu0 %v1956_v12  ;;  %v2409_v27 = vunpack.c.l.s8.bf16 %v2165_v10  ;;  %v1983_v12 = vunpack.c.h.s8.bf16 %v1755_v61  ;;  %v1988_v16 = vunpack.c.l.s8.bf16 %v1760_v11  ;;  %v1992_v22 = vunpack.c.h.s8.bf16 %v1760_v11  ;;  %v1771_v61 = vld [vmem:[%s6820_s12 + $0x380] sm:$0xff]  ;;  %v1776_v11 = vld [vmem:[%s6820_s12 + $0x3a8] sm:$0xff] }
 0x411   : > { %2753 = vmatpush1.bf16.msra.mxu1 %v2381_v17  ;;  %2918 = vmatpush1.bf16.msra.mxu0 %v1955_v37  ;;  %v1759_v17 = vld [vmem:[%s6820_s12 + $0x320] sm:$0xff]  ;;  %v2170_v37 = vld [vmem:[%s6820_s12 + $0x7d8] sm:$0xff] }
 0x412   : > { %2754 = vmatprep.subr.bf16.mxu1 %v2386_v31  ;;  %2919 = vmatprep.subr.bf16.mxu0 %v1960_v18  ;;  %v2413_v31 = vunpack.c.h.s8.bf16 %v2165_v10  ;;  %v1987_v18 = vunpack.c.l.s8.bf16 %v1759_v17  ;;  %v2418_v20 = vunpack.c.l.s8.bf16 %v2170_v37  ;;  %v2422_v29 = vunpack.c.h.s8.bf16 %v2170_v37  ;;  %v1665_v10 = vld [vmem:[%s6820_s12 + $0x30] sm:$0xff] }
 0x415   : > { %2755 = vmatpush1.bf16.msra.mxu1 %v2385_v23  ;;  %2920 = vmatpush1.bf16.msra.mxu0 %v1959_v30  ;;  %v2169_v23 = vld [vmem:[%s6820_s12 + $0x7d0] sm:$0xff]  ;;  %v1764_v30 = vld [vmem:[%s6820_s12 + $0x348] sm:$0xff] }
 0x416   : > { %2756 = vmatprep.subr.bf16.mxu1 %v2390_v39  ;;  %2921 = vmatprep.subr.bf16.mxu0 %v1964_v25  ;;  %v2417_v39 = vunpack.c.l.s8.bf16 %v2169_v23  ;;  %v1991_v25 = vunpack.c.h.s8.bf16 %v1759_v17  ;;  %v1996_v3 = vunpack.c.l.s8.bf16 %v1764_v30  ;;  %v2000_v38 = vunpack.c.h.s8.bf16 %v1764_v30  ;;  %v1670_v17 = vld [vmem:[%s6820_s12 + $0x58] sm:$0xff] }
 0x417   : > { %v7159_v21 = vpop.f32.mrb[0].mxu1 }
 0x418   : > { %v7162_v40 = vpop.f32.mrb[1].mxu1 }
 0x419   : > { %2757 = vmatpush1.bf16.msra.mxu1 %v2389_v33  ;;  %2922 = vmatpush1.bf16.msra.mxu0 %v1963_v34  ;;  %v1648_v24 = vpop.f32.mrb[2].mxu1  ;;  %v1763_v33 = vld [vmem:[%s6820_s12 + $0x340] sm:$0xff]  ;;  %v2174_v34 = vld [vmem:[%s6820_s12 + $0x7f8] sm:$0xff] }
 0x41a   : > { %v1649_v43 = vpop.f32.mrb[3].mxu1  ;;  %2758 = vmatprep.subr.bf16.mxu1 %v2394_v32  ;;  %2923 = vmatprep.subr.bf16.mxu0 %v1968_v35  ;;  %v2421_v32 = vunpack.c.h.s8.bf16 %v2169_v23  ;;  %v1995_v35 = vunpack.c.l.s8.bf16 %v1763_v33  ;;  %v2426_v36 = vunpack.c.l.s8.bf16 %v2174_v34  ;;  %v2173_v24 = vld [vmem:[%s6820_s12 + $0x7f0] sm:$0xff] }
 0x41b   : > { %v1999_v43 = vunpack.c.h.s8.bf16 %v1763_v33 }
 0x41d   : > { %2759 = vmatpush1.bf16.msra.mxu1 %v2393_v41  ;;  %2924 = vmatpush1.bf16.msra.mxu0 %v1967_v42  ;;  %v1768_v41 = vld [vmem:[%s6820_s12 + $0x368] sm:$0xff]  ;;  %v2425_v42 = vunpack.c.l.s8.bf16 %v2173_v24 }
 0x41e   : > { %2760 = vmatprep.subr.bf16.mxu1 %v2398_v44  ;;  %2925 = vmatprep.subr.bf16.mxu0 %v1972_v45  ;;  %v2430_v44 = vunpack.c.h.s8.bf16 %v2174_v34  ;;  %v2004_v45 = vunpack.c.l.s8.bf16 %v1768_v41 }
 0x421   : > { %2761 = vmatpush1.bf16.msra.mxu1 %v2397_v50  ;;  %2926 = vmatpush1.bf16.msra.mxu0 %v1971_v51  ;;  %v2429_v50 = vunpack.c.h.s8.bf16 %v2173_v24  ;;  %v2003_v51 = vunpack.c.l.s8.bf16 %v1767_v47 }
 0x422   : > { %2762 = vmatprep.subr.bf16.mxu1 %v2402_v53  ;;  %2927 = vmatprep.subr.bf16.mxu0 %v1976_v54  ;;  %v2008_v53 = vunpack.c.h.s8.bf16 %v1768_v41  ;;  %v1790_v54 = vunpack.c.l.s8.bf16 %v1662_v49 }
 0x425   : > { %2763 = vmatpush1.bf16.msra.mxu1 %v2401_v57  ;;  %2928 = vmatpush1.bf16.msra.mxu0 %v1975_v58  ;;  %v2007_v57 = vunpack.c.h.s8.bf16 %v1767_v47  ;;  %v1789_v58 = vunpack.c.l.s8.bf16 %v1661_v55 }
 0x426   : > { %2764 = vmatprep.subr.bf16.mxu1 %v2406_v59  ;;  %2938 = vmatprep.subr.bf16.mxu0 %v1980_v60  ;;  %v2012_v59 = vunpack.c.l.s8.bf16 %v1772_v56  ;;  %v1794_v60 = vunpack.c.h.s8.bf16 %v1662_v49 }
 0x428   : > { %2930 = vmatmul.mubr.bf16.vlgmr.msra.gmra.mrb[8].mxu0 %v7172_v63 }
 0x429   : > { %2765 = vmatpush1.bf16.msra.mxu1 %v2405_v4  ;;  %2939 = vmatpush1.bf16.msra.mxu0 %v1979_v5  ;;  %v2011_v4 = vunpack.c.l.s8.bf16 %v1771_v61  ;;  %v1793_v5 = vunpack.c.h.s8.bf16 %v1661_v55 }
 0x42a   : > { %2766 = vmatprep.subr.bf16.mxu1 %v2410_v6  ;;  %2940 = vmatprep.subr.bf16.mxu0 %v1984_v7  ;;  %v2016_v6 = vunpack.c.h.s8.bf16 %v1772_v56  ;;  %v1798_v7 = vunpack.c.l.s8.bf16 %v1666_v62 }
 0x42b   : > { %2970 = vmatprep.mubr.bf16.mxu0 %v7183_v2 }
 0x42d   : > { %2767 = vmatpush1.bf16.msra.mxu1 %v2409_v27  ;;  %2941 = vmatpush1.bf16.msra.mxu0 %v1983_v12  ;;  %v2015_v27 = vunpack.c.h.s8.bf16 %v1771_v61  ;;  %v1797_v12 = vunpack.c.l.s8.bf16 %v1665_v10  ;;  %v7221_v61 = vcombine.low %v7177_v0, %v7177_v0 }
 0x42e   : > { %2768 = vmatprep.subr.bf16.mxu1 %v2414_v13  ;;  %2942 = vmatprep.subr.bf16.mxu0 %v1988_v16  ;;  %v1802_v13 = vunpack.c.h.s8.bf16 %v1666_v62  ;;  %v1775_v16 = vld [vmem:[%s6820_s12 + $0x3a0] sm:$0xff] }
 0x42f   : > { %v2019_v37 = vunpack.c.l.s8.bf16 %v1775_v16  ;;  %v2023_v23 = vunpack.c.h.s8.bf16 %v1775_v16 }
 0x431   : > { %2769 = vmatpush1.bf16.msra.mxu1 %v2413_v31  ;;  %2943 = vmatpush1.bf16.msra.mxu0 %v1987_v18  ;;  %v1801_v31 = vunpack.c.h.s8.bf16 %v1665_v10  ;;  %v1806_v18 = vunpack.c.l.s8.bf16 %v1670_v17  ;;  %v3148_v10 = vld [vmem:[%s6820_s12 + $0x828] sm:$0xff] }
 0x432   : > { %2770 = vmatprep.subr.bf16.mxu1 %v2418_v20  ;;  %2944 = vmatprep.subr.bf16.mxu0 %v1992_v22  ;;  %v1669_v20 = vld [vmem:[%s6820_s12 + $0x50] sm:$0xff]  ;;  %v1780_v22 = vld [vmem:[%s6820_s12 + $0x3c8] sm:$0xff] }
 0x433   : > { %v1805_v30 = vunpack.c.l.s8.bf16 %v1669_v20  ;;  %v1809_v34 = vunpack.c.h.s8.bf16 %v1669_v20 }
 0x435   : > { %2771 = vmatpush1.bf16.msra.mxu1 %v2417_v39  ;;  %2945 = vmatpush1.bf16.msra.mxu0 %v1991_v25  ;;  %v2028_v39 = vunpack.c.l.s8.bf16 %v1780_v22  ;;  %v1810_v25 = vunpack.c.h.s8.bf16 %v1670_v17 }
 0x436   : > { %2772 = vmatprep.subr.bf16.mxu1 %v2422_v29  ;;  %2946 = vmatprep.subr.bf16.mxu0 %v1996_v3  ;;  %v1779_v29 = vld [vmem:[%s6820_s12 + $0x3c0] sm:$0xff]  ;;  %v1674_v3 = vld [vmem:[%s6820_s12 + $0x78] sm:$0xff] }
 0x437   : > { %v2027_v33 = vunpack.c.l.s8.bf16 %v1779_v29  ;;  %v2031_v24 = vunpack.c.h.s8.bf16 %v1779_v29 }
 0x439   : > { %2773 = vmatpush1.bf16.msra.mxu1 %v2421_v32  ;;  %2947 = vmatpush1.bf16.msra.mxu0 %v1995_v35  ;;  %v2032_v32 = vunpack.c.h.s8.bf16 %v1780_v22  ;;  %v1814_v35 = vunpack.c.l.s8.bf16 %v1674_v3 }
 0x43a   : > { %2774 = vmatprep.subr.bf16.mxu1 %v2426_v36  ;;  %2948 = vmatprep.subr.bf16.mxu0 %v2000_v38  ;;  %v1673_v36 = vld [vmem:[%s6820_s12 + $0x70] sm:$0xff]  ;;  %v1784_v38 = vld [vmem:[%s6820_s12 + $0x3e8] sm:$0xff] }
 0x43b   : > { %v1813_v41 = vunpack.c.l.s8.bf16 %v1673_v36  ;;  %v1817_v49 = vunpack.c.h.s8.bf16 %v1673_v36  ;;  %v7235_v36 = vld [vmem:[#allocation11] sm:$0x3] }
 0x43d   : > { %2775 = vmatpush1.bf16.msra.mxu1 %v2425_v42  ;;  %2949 = vmatpush1.bf16.msra.mxu0 %v1999_v43  ;;  %v2036_v42 = vunpack.c.l.s8.bf16 %v1784_v38  ;;  %v1818_v43 = vunpack.c.h.s8.bf16 %v1674_v3 }
 0x43e   : > { %2776 = vmatprep.subr.bf16.mxu1 %v2430_v44  ;;  %2950 = vmatprep.subr.bf16.mxu0 %v2004_v45  ;;  %v1783_v44 = vld [vmem:[%s6820_s12 + $0x3e0] sm:$0xff]  ;;  %v1678_v45 = vld [vmem:[%s6820_s12 + $0x98] sm:$0xff] }
 0x43f   : > { %v2035_v47 = vunpack.c.l.s8.bf16 %v1783_v44  ;;  %v2039_v55 = vunpack.c.h.s8.bf16 %v1783_v44  ;;  %v4956_v44 = vld [vmem:[#allocation5] ss:$0 sm:$0xff] }
 0x441   : > { %2777 = vmatpush1.bf16.msra.mxu1 %v2429_v50  ;;  %2951 = vmatpush1.bf16.msra.mxu0 %v2003_v51  ;;  %v2040_v50 = vunpack.c.h.s8.bf16 %v1784_v38  ;;  %v1822_v51 = vunpack.c.l.s8.bf16 %v1678_v45 }
 0x442   : > { %2952 = vmatprep.subr.bf16.mxu0 %v2008_v53  ;;  %2979 = vmatprep.subr.bf16.mxu1 %v1790_v54  ;;  %v1677_v53 = vld [vmem:[%s6820_s12 + $0x90] sm:$0xff]  ;;  %v3144_v54 = vld [vmem:[%s6820_s12 + $0x808] sm:$0xff] }
 0x443   : > { %v1821_v56 = vunpack.c.l.s8.bf16 %v1677_v53  ;;  %v1825_v62 = vunpack.c.h.s8.bf16 %v1677_v53 }
 0x444   : > { %2779 = vmatmul.mubr.bf16.vlgmr.msra.gmra.mrb[4].mxu1 %v7021_v14  ;;  %v2020_v14 = vunpack.c.l.s8.bf16 %v1776_v11 }
 0x445   : > { %2953 = vmatpush1.bf16.msra.mxu0 %v2007_v57  ;;  %2980 = vmatpush1.bf16.msra.mxu1 %v1789_v58  ;;  %v1826_v57 = vunpack.c.h.s8.bf16 %v1678_v45  ;;  %v3160_v58 = vunpack.c.l.s8.bf16 %v3144_v54  ;;  %v1694_v45 = vld [vmem:[%s6820_s12 + $0x118] sm:$0xff] }
 0x446   : > { %2954 = vmatprep.subr.bf16.mxu0 %v2012_v59  ;;  %2981 = vmatprep.subr.bf16.mxu1 %v1794_v60  ;;  %v3143_v59 = vld [vmem:[%s6820_s12 + $0x800] sm:$0xff]  ;;  %v1682_v60 = vld [vmem:[%s6820_s12 + $0xb8] sm:$0xff]  ;;  %v1854_v53 = vunpack.c.l.s8.bf16 %v1694_v45 }
 0x447   : > { %3011 = vmatprep.mubr.bf16.mxu1 %v7032_v26  ;;  %v2024_v26 = vunpack.c.h.s8.bf16 %v1776_v11  ;;  %v1834_v0 = vunpack.c.h.s8.bf16 %v1682_v60 }
 0x449   : > { %2955 = vmatpush1.bf16.msra.mxu0 %v2011_v4  ;;  %2982 = vmatpush1.bf16.msra.mxu1 %v1793_v5  ;;  %v3159_v4 = vunpack.c.l.s8.bf16 %v3143_v59  ;;  %v1830_v5 = vunpack.c.l.s8.bf16 %v1682_v60 }
 0x44a   : > { %2956 = vmatprep.subr.bf16.mxu0 %v2016_v6  ;;  %2983 = vmatprep.subr.bf16.mxu1 %v1798_v7  ;;  %v3164_v6 = vunpack.c.h.s8.bf16 %v3144_v54  ;;  %v1681_v7 = vld [vmem:[%s6820_s12 + $0xb0] sm:$0xff] }
 0x44b   : > { %v1829_v11 = vunpack.c.l.s8.bf16 %v1681_v7  ;;  %v1833_v16 = vunpack.c.h.s8.bf16 %v1681_v7 }
 0x44d   : > { %2957 = vmatpush1.bf16.msra.mxu0 %v2015_v27  ;;  %2984 = vmatpush1.bf16.msra.mxu1 %v1797_v12  ;;  %v3163_v27 = vunpack.c.h.s8.bf16 %v3143_v59  ;;  %v3168_v12 = vunpack.c.l.s8.bf16 %v3148_v10 }
 0x44e   : > { %2958 = vmatprep.subr.bf16.mxu0 %v2020_v14  ;;  %2985 = vmatprep.subr.bf16.mxu1 %v1802_v13  ;;  %v3147_v14 = vld [vmem:[%s6820_s12 + $0x820] sm:$0xff]  ;;  %v1686_v13 = vld [vmem:[%s6820_s12 + $0xd8] sm:$0xff] }
 0x44f   : > { %v3167_v17 = vunpack.c.l.s8.bf16 %v3147_v14  ;;  %v3171_v22 = vunpack.c.h.s8.bf16 %v3147_v14 }
 0x451   : > { %2959 = vmatpush1.bf16.msra.mxu0 %v2019_v37  ;;  %2986 = vmatpush1.bf16.msra.mxu1 %v1801_v31  ;;  %v1838_v37 = vunpack.c.l.s8.bf16 %v1686_v13  ;;  %v3172_v31 = vunpack.c.h.s8.bf16 %v3148_v10 }
 0x452   : > { %2960 = vmatprep.subr.bf16.mxu0 %v2024_v26  ;;  %2987 = vmatprep.subr.bf16.mxu1 %v1806_v18  ;;  %v1685_v26 = vld [vmem:[%s6820_s12 + $0xd0] sm:$0xff]  ;;  %v3152_v18 = vld [vmem:[%s6820_s12 + $0x848] sm:$0xff] }
 0x453   : > { %v1837_v20 = vunpack.c.l.s8.bf16 %v1685_v26  ;;  %v1841_v29 = vunpack.c.h.s8.bf16 %v1685_v26 }
 0x455   : > { %2961 = vmatpush1.bf16.msra.mxu0 %v2023_v23  ;;  %2988 = vmatpush1.bf16.msra.mxu1 %v1805_v30  ;;  %v1842_v23 = vunpack.c.h.s8.bf16 %v1686_v13  ;;  %v3176_v30 = vunpack.c.l.s8.bf16 %v3152_v18 }
 0x456   : > { %2962 = vmatprep.subr.bf16.mxu0 %v2028_v39  ;;  %2989 = vmatprep.subr.bf16.mxu1 %v1810_v25  ;;  %v3151_v39 = vld [vmem:[%s6820_s12 + $0x840] sm:$0xff]  ;;  %v1690_v25 = vld [vmem:[%s6820_s12 + $0xf8] sm:$0xff] }
 0x457   : > { %v3175_v3 = vunpack.c.l.s8.bf16 %v3151_v39 }
 0x459   : > { %2963 = vmatpush1.bf16.msra.mxu0 %v2027_v33  ;;  %2990 = vmatpush1.bf16.msra.mxu1 %v1809_v34  ;;  %v1846_v33 = vunpack.c.l.s8.bf16 %v1690_v25  ;;  %v3180_v34 = vunpack.c.h.s8.bf16 %v3152_v18 }
 0x45a   : > { %2964 = vmatprep.subr.bf16.mxu0 %v2032_v32  ;;  %2991 = vmatprep.subr.bf16.mxu1 %v1814_v35  ;;  %v1689_v32 = vld [vmem:[%s6820_s12 + $0xf0] sm:$0xff]  ;;  %v3156_v35 = vld [vmem:[%s6820_s12 + $0x868] sm:$0xff] }
 0x45b   : > { %v1845_v38 = vunpack.c.l.s8.bf16 %v1689_v32  ;;  %v3188_v54 = vunpack.c.h.s8.bf16 %v3156_v35 }
 0x45d   : > { %2965 = vmatpush1.bf16.msra.mxu0 %v2031_v24  ;;  %2992 = vmatpush1.bf16.msra.mxu1 %v1813_v41  ;;  %v3179_v24 = vunpack.c.h.s8.bf16 %v3151_v39  ;;  %v1850_v41 = vunpack.c.h.s8.bf16 %v1690_v25 }
 0x45e   : > { %2966 = vmatprep.subr.bf16.mxu0 %v2036_v42  ;;  %2993 = vmatprep.subr.bf16.mxu1 %v1818_v43  ;;  %v3184_v42 = vunpack.c.l.s8.bf16 %v3156_v35  ;;  %v3155_v43 = vld [vmem:[%s6820_s12 + $0x860] sm:$0xff] }
 0x45f   : > { %v3187_v59 = vunpack.c.h.s8.bf16 %v3155_v43 }
 0x461   : > { %2967 = vmatpush1.bf16.msra.mxu0 %v2035_v47  ;;  %2994 = vmatpush1.bf16.msra.mxu1 %v1817_v49  ;;  %v1447_v47 = vrot.slane %v7235_v36, %v6991_v52  ;;  %v1849_v49 = vunpack.c.h.s8.bf16 %v1689_v32 }
 0x462   : > { %2968 = vmatprep.subr.bf16.mxu0 %v2040_v50  ;;  %2995 = vmatprep.subr.bf16.mxu1 %v1822_v51  ;;  %v3183_v50 = vunpack.c.l.s8.bf16 %v3155_v43  ;;  %v1317_v51 = vadd.f32 %v4956_v44, %v6985_v46 }
 0x464   : > { %v1322_v60 = vmax.f32 %v1317_v51, 0.0 }
 0x465   : > { %2969 = vmatpush1.bf16.msra.mxu0 %v2039_v55  ;;  %2996 = vmatpush1.bf16.msra.mxu1 %v1821_v56  ;;  %v1693_v55 = vld [vmem:[%s6820_s12 + $0x110] sm:$0xff]  ;;  %v3278_v56 = vld [vmem:[%s6820_s12 + $0x888] sm:$0xff] }
 0x466   : > { %2997 = vmatprep.subr.bf16.mxu1 %v1826_v57  ;;  %3191 = vmatprep.subr.bf16.mxu0 %v3160_v58  ;;  %v1647_v57 = vadd.f32 %v7162_v40, %v1447_v47  ;;  %v1853_v58 = vunpack.c.l.s8.bf16 %v1693_v55  ;;  %v3310_v46 = vunpack.c.l.s8.bf16 %v3278_v56  ;;  %v1857_v7 = vunpack.c.h.s8.bf16 %v1693_v55  ;;  %v3289_v47 = vld [vmem:[%s6820_s12 + $0x8e0] sm:$0xff]  ;;  %v1709_v55 = vld [vmem:[%s6820_s12 + $0x190] sm:$0xff] }
 0x467   : > { %v7248_v10 = vpack.c.bf16 %v1322_v60, %v1322_v60  ;;  %v3333_v51 = vunpack.c.l.s8.bf16 %v3289_v47 }
 0x468   : > { %2971 = vmatmul.mubr.bf16.vlgmr.msra.gmra.mrb[8].mxu0 %v7221_v61 }
 0x469   : > { %2998 = vmatpush1.bf16.msra.mxu1 %v1825_v62  ;;  %3192 = vmatpush1.bf16.msra.mxu0 %v3159_v4  ;;  %v1858_v62 = vunpack.c.h.s8.bf16 %v1694_v45  ;;  %v3277_v4 = vld [vmem:[%s6820_s12 + $0x880] sm:$0xff] }
 0x46a   : > { %2999 = vmatprep.subr.bf16.mxu1 %v1830_v5  ;;  %3193 = vmatprep.subr.bf16.mxu0 %v3164_v6  ;;  %v1698_v5 = vld [vmem:[%s6820_s12 + $0x138] sm:$0xff]  ;;  %v1652_v6 = vmax.f32 %v1647_v57, 0.0  ;;  %v3309_v40 = vunpack.c.l.s8.bf16 %v3277_v4  ;;  %v3313_v13 = vunpack.c.h.s8.bf16 %v3277_v4  ;;  %v1885_v57 = vunpack.c.l.s8.bf16 %v1709_v55 }
 0x46b   : > { %3223 = vmatprep.mubr.bf16.mxu0 %v6133_v19  ;;  %v1889_v4 = vunpack.c.h.s8.bf16 %v1709_v55 }
 0x46c   : > { %v7253_v14 = vpack.c.bf16 %v1652_v6, %v1652_v6 }
 0x46d   : > { %3000 = vmatpush1.bf16.msra.mxu1 %v1829_v11  ;;  %3194 = vmatpush1.bf16.msra.mxu0 %v3163_v27  ;;  %v1862_v11 = vunpack.c.l.s8.bf16 %v1698_v5  ;;  %v1697_v27 = vld [vmem:[%s6820_s12 + $0x130] sm:$0xff] }
 0x46e   : > { %3001 = vmatprep.subr.bf16.mxu1 %v1834_v0  ;;  %3195 = vmatprep.subr.bf16.mxu0 %v3168_v12  ;;  %v3314_v0 = vunpack.c.h.s8.bf16 %v3278_v56  ;;  %v3282_v12 = vld [vmem:[%s6820_s12 + $0x8a8] sm:$0xff] }
 0x46f   : > { %v3294_v56 = vld [vmem:[%s6820_s12 + $0x908] sm:$0xff] }
 0x470   : > { %v3342_v60 = vunpack.c.l.s8.bf16 %v3294_v56 }
 0x471   : > { %3002 = vmatpush1.bf16.msra.mxu1 %v1833_v16  ;;  %3196 = vmatpush1.bf16.msra.mxu0 %v3167_v17  ;;  %v1866_v16 = vunpack.c.h.s8.bf16 %v1698_v5  ;;  %v3318_v17 = vunpack.c.l.s8.bf16 %v3282_v12 }
 0x472   : > { %3003 = vmatprep.subr.bf16.mxu1 %v1838_v37  ;;  %3197 = vmatprep.subr.bf16.mxu0 %v3172_v31  ;;  %v3281_v37 = vld [vmem:[%s6820_s12 + $0x8a0] sm:$0xff]  ;;  %v1702_v31 = vld [vmem:[%s6820_s12 + $0x158] sm:$0xff] }
 0x473   : > { %v3317_v26 = vunpack.c.l.s8.bf16 %v3281_v37  ;;  %v1870_v18 = vunpack.c.l.s8.bf16 %v1702_v31  ;;  %v3321_v39 = vunpack.c.h.s8.bf16 %v3281_v37  ;;  %v1874_v25 = vunpack.c.h.s8.bf16 %v1702_v31 }
 0x475   : > { %3004 = vmatpush1.bf16.msra.mxu1 %v1837_v20  ;;  %3198 = vmatpush1.bf16.msra.mxu0 %v3171_v22  ;;  %v3322_v20 = vunpack.c.h.s8.bf16 %v3282_v12  ;;  %v1701_v22 = vld [vmem:[%s6820_s12 + $0x150] sm:$0xff] }
 0x476   : > { %3005 = vmatprep.subr.bf16.mxu1 %v1842_v23  ;;  %3199 = vmatprep.subr.bf16.mxu0 %v3176_v30  ;;  %v3286_v23 = vld [vmem:[%s6820_s12 + $0x8c8] sm:$0xff]  ;;  %v1869_v30 = vunpack.c.l.s8.bf16 %v1701_v22 }
 0x479   : > { %3006 = vmatpush1.bf16.msra.mxu1 %v1841_v29  ;;  %3200 = vmatpush1.bf16.msra.mxu0 %v3175_v3  ;;  %v3326_v29 = vunpack.c.l.s8.bf16 %v3286_v23  ;;  %v3285_v3 = vld [vmem:[%s6820_s12 + $0x8c0] sm:$0xff] }
 0x47a   : > { %3007 = vmatprep.subr.bf16.mxu1 %v1846_v33  ;;  %3201 = vmatprep.subr.bf16.mxu0 %v3180_v34  ;;  %v1706_v33 = vld [vmem:[%s6820_s12 + $0x178] sm:$0xff]  ;;  %v1873_v34 = vunpack.c.h.s8.bf16 %v1701_v22  ;;  %v3325_v32 = vunpack.c.l.s8.bf16 %v3285_v3  ;;  %v3329_v43 = vunpack.c.h.s8.bf16 %v3285_v3 }
 0x47b   : > { %v1878_v35 = vunpack.c.l.s8.bf16 %v1706_v33  ;;  %v1882_v44 = vunpack.c.h.s8.bf16 %v1706_v33 }
 0x47d   : > { %3008 = vmatpush1.bf16.msra.mxu1 %v1845_v38  ;;  %3202 = vmatpush1.bf16.msra.mxu0 %v3179_v24  ;;  %v3330_v38 = vunpack.c.h.s8.bf16 %v3286_v23  ;;  %v1705_v24 = vld [vmem:[%s6820_s12 + $0x170] sm:$0xff] }
 0x47e   : > { %3009 = vmatprep.subr.bf16.mxu1 %v1850_v41  ;;  %3203 = vmatprep.subr.bf16.mxu0 %v3184_v42  ;;  %v3290_v41 = vld [vmem:[%s6820_s12 + $0x8e8] sm:$0xff]  ;;  %v1877_v42 = vunpack.c.l.s8.bf16 %v1705_v24 }
 0x47f   : > { %v3334_v45 = vunpack.c.l.s8.bf16 %v3290_v41 }
 0x481   : > { %3010 = vmatpush1.bf16.msra.mxu1 %v1849_v49  ;;  %3204 = vmatpush1.bf16.msra.mxu0 %v3183_v50  ;;  %v1710_v49 = vld [vmem:[%s6820_s12 + $0x198] sm:$0xff]  ;;  %v1881_v50 = vunpack.c.h.s8.bf16 %v1705_v24 }
 0x482   : > { %3020 = vmatprep.subr.bf16.mxu1 %v1854_v53  ;;  %3205 = vmatprep.subr.bf16.mxu0 %v3188_v54  ;;  %v1886_v53 = vunpack.c.l.s8.bf16 %v1710_v49  ;;  %v3338_v54 = vunpack.c.h.s8.bf16 %v3290_v41  ;;  %v1443_v41 = vrot.slane %v7235_v36, %v6988_v48 }
 0x484   : > { %3012 = vmatmul.mubr.bf16.vlgmr.msra.gmra.mrb[4].mxu1 %v7070_v8  ;;  %v1861_v8 = vunpack.c.l.s8.bf16 %v1697_v27 }
 0x485   : > { %3021 = vmatpush1.bf16.msra.mxu1 %v1853_v58  ;;  %3206 = vmatpush1.bf16.msra.mxu0 %v3187_v59  ;;  %v3337_v58 = vunpack.c.h.s8.bf16 %v3289_v47  ;;  %v1890_v59 = vunpack.c.h.s8.bf16 %v1710_v49 }
 0x486   : > { %3022 = vmatprep.subr.bf16.mxu1 %v1858_v62  ;;  %3373 = vmatprep.subr.bf16.mxu0 %v3310_v46  ;;  %v3293_v62 = vld [vmem:[%s6820_s12 + $0x900] sm:$0xff]  ;;  %v1714_v46 = vld [vmem:[%s6820_s12 + $0x1b8] sm:$0xff] }
 0x487   : > { %3052 = vmatprep.mubr.bf16.mxu1 %v7081_v15  ;;  %v1865_v15 = vunpack.c.h.s8.bf16 %v1697_v27  ;;  %v3341_v5 = vunpack.c.l.s8.bf16 %v3293_v62  ;;  %v1894_v6 = vunpack.c.l.s8.bf16 %v1714_v46  ;;  %v1898_v12 = vunpack.c.h.s8.bf16 %v1714_v46 }
 0x488   : > { %3224 = vmatmul.mubr.bf16.vlgmr.msra.gmra.mrb[8].mxu0 %v7248_v10 }
 0x489   : > { %3023 = vmatpush1.bf16.msra.mxu1 %v1857_v7  ;;  %3374 = vmatpush1.bf16.msra.mxu0 %v3309_v40  ;;  %v3346_v7 = vunpack.c.h.s8.bf16 %v3294_v56  ;;  %v1713_v40 = vld [vmem:[%s6820_s12 + $0x1b0] sm:$0xff] }
 0x48a   : > { %3405 = vmatprep.mubr.bf16.mxu0 %v7253_v14  ;;  %3024 = vmatprep.subr.bf16.mxu1 %v1862_v11  ;;  %v3298_v11 = vld [vmem:[%s6820_s12 + $0x928] sm:$0xff]  ;;  %v1893_v27 = vunpack.c.l.s8.bf16 %v1713_v40 }
 0x48b   : > { %3375 = vmatprep.subr.bf16.mxu0 %v3314_v0  ;;  %v3345_v0 = vunpack.c.h.s8.bf16 %v3293_v62  ;;  %v1729_v62 = vld [vmem:[%s6820_s12 + $0x230] sm:$0xff] }
 0x48c   : > { %v1925_v46 = vunpack.c.l.s8.bf16 %v1729_v62 }
 0x48d   : > { %3025 = vmatpush1.bf16.msra.mxu1 %v1861_v8  ;;  %3376 = vmatpush1.bf16.msra.mxu0 %v3313_v13  ;;  %v3350_v8 = vunpack.c.l.s8.bf16 %v3298_v11  ;;  %v3297_v13 = vld [vmem:[%s6820_s12 + $0x920] sm:$0xff] }
 0x48e   : > { %3026 = vmatprep.subr.bf16.mxu1 %v1866_v16  ;;  %3377 = vmatprep.subr.bf16.mxu0 %v3318_v17  ;;  %v1718_v16 = vld [vmem:[%s6820_s12 + $0x1d8] sm:$0xff]  ;;  %v1897_v17 = vunpack.c.h.s8.bf16 %v1713_v40  ;;  %v3349_v37 = vunpack.c.l.s8.bf16 %v3297_v13  ;;  %v3353_v22 = vunpack.c.h.s8.bf16 %v3297_v13 }
 0x48f   : > { %v1902_v31 = vunpack.c.l.s8.bf16 %v1718_v16  ;;  %v1906_v23 = vunpack.c.h.s8.bf16 %v1718_v16  ;;  %v1742_v16 = vld [vmem:[%s6820_s12 + $0x298] sm:$0xff] }
 0x491   : > { %3027 = vmatpush1.bf16.msra.mxu1 %v1865_v15  ;;  %3378 = vmatpush1.bf16.msra.mxu0 %v3317_v26  ;;  %v3354_v15 = vunpack.c.h.s8.bf16 %v3298_v11  ;;  %v1717_v26 = vld [vmem:[%s6820_s12 + $0x1d0] sm:$0xff] }
 0x492   : > { %3028 = vmatprep.subr.bf16.mxu1 %v1870_v18  ;;  %3379 = vmatprep.subr.bf16.mxu0 %v3322_v20  ;;  %v3302_v18 = vld [vmem:[%s6820_s12 + $0x948] sm:$0xff]  ;;  %v1901_v20 = vunpack.c.l.s8.bf16 %v1717_v26 }
 0x495   : > { %3029 = vmatpush1.bf16.msra.mxu1 %v1869_v30  ;;  %3380 = vmatpush1.bf16.msra.mxu0 %v3321_v39  ;;  %v3358_v30 = vunpack.c.l.s8.bf16 %v3302_v18  ;;  %v3301_v39 = vld [vmem:[%s6820_s12 + $0x940] sm:$0xff] }
 0x496   : > { %3030 = vmatprep.subr.bf16.mxu1 %v1874_v25  ;;  %3381 = vmatprep.subr.bf16.mxu0 %v3326_v29  ;;  %v1722_v25 = vld [vmem:[%s6820_s12 + $0x1f8] sm:$0xff]  ;;  %v1905_v29 = vunpack.c.h.s8.bf16 %v1717_v26  ;;  %v3357_v3 = vunpack.c.l.s8.bf16 %v3301_v39  ;;  %v3361_v24 = vunpack.c.h.s8.bf16 %v3301_v39  ;;  %v1954_v26 = vunpack.c.h.s8.bf16 %v1742_v16 }
 0x497   : > { %v1910_v33 = vunpack.c.l.s8.bf16 %v1722_v25 }
 0x499   : > { %3031 = vmatpush1.bf16.msra.mxu1 %v1873_v34  ;;  %3382 = vmatpush1.bf16.msra.mxu0 %v3325_v32  ;;  %v3362_v34 = vunpack.c.h.s8.bf16 %v3302_v18  ;;  %v1721_v32 = vld [vmem:[%s6820_s12 + $0x1f0] sm:$0xff]  ;;  %v1746_v18 = vld [vmem:[%s6820_s12 + $0x2b8] sm:$0xff] }
 0x49a   : > { %3032 = vmatprep.subr.bf16.mxu1 %v1878_v35  ;;  %3383 = vmatprep.subr.bf16.mxu0 %v3330_v38  ;;  %v3306_v35 = vld [vmem:[%s6820_s12 + $0x968] sm:$0xff]  ;;  %v1909_v38 = vunpack.c.l.s8.bf16 %v1721_v32  ;;  %v1913_v47 = vunpack.c.h.s8.bf16 %v1721_v32  ;;  %v1962_v39 = vunpack.c.h.s8.bf16 %v1746_v18 }
 0x49d   : > { %3033 = vmatpush1.bf16.msra.mxu1 %v1877_v42  ;;  %3384 = vmatpush1.bf16.msra.mxu0 %v3329_v43  ;;  %v1914_v42 = vunpack.c.h.s8.bf16 %v1722_v25  ;;  %v3366_v43 = vunpack.c.l.s8.bf16 %v3306_v35  ;;  %v1750_v25 = vld [vmem:[%s6820_s12 + $0x2d8] sm:$0xff] }
 0x49e   : > { %3034 = vmatprep.subr.bf16.mxu1 %v1882_v44  ;;  %3385 = vmatprep.subr.bf16.mxu0 %v3334_v45  ;;  %v3305_v44 = vld [vmem:[%s6820_s12 + $0x960] sm:$0xff]  ;;  %v1726_v45 = vld [vmem:[%s6820_s12 + $0x218] sm:$0xff]  ;;  %v1970_v32 = vunpack.c.h.s8.bf16 %v1750_v25 }
 0x49f   : > { %v3365_v49 = vunpack.c.l.s8.bf16 %v3305_v44  ;;  %v3369_v55 = vunpack.c.h.s8.bf16 %v3305_v44  ;;  %v1758_v44 = vld [vmem:[%s6820_s12 + $0x318] sm:$0xff] }
 0x4a1   : > { %3035 = vmatpush1.bf16.msra.mxu1 %v1881_v50  ;;  %3386 = vmatpush1.bf16.msra.mxu0 %v3333_v51  ;;  %v1645_v50 = vadd.f32 %v7159_v21, %v1443_v41  ;;  %v1918_v51 = vunpack.c.l.s8.bf16 %v1726_v45  ;;  %v1753_v41 = vld [vmem:[%s6820_s12 + $0x2f0] sm:$0xff] }
 0x4a2   : > { %3036 = vmatprep.subr.bf16.mxu1 %v1886_v53  ;;  %3387 = vmatprep.subr.bf16.mxu0 %v3338_v54  ;;  %v3370_v53 = vunpack.c.h.s8.bf16 %v3306_v35  ;;  %v1725_v54 = vld [vmem:[%s6820_s12 + $0x210] sm:$0xff]  ;;  %v1754_v35 = vld [vmem:[%s6820_s12 + $0x2f8] sm:$0xff] }
 0x4a3   : > { %v1917_v36 = vunpack.c.l.s8.bf16 %v1725_v54  ;;  %v1651_v56 = vmax.f32 %v1645_v50, 0.0  ;;  %v1921_v21 = vunpack.c.h.s8.bf16 %v1725_v54 }
 0x4a5   : > { %3037 = vmatpush1.bf16.msra.mxu1 %v1885_v57  ;;  %3388 = vmatpush1.bf16.msra.mxu0 %v3337_v58  ;;  %v1922_v57 = vunpack.c.h.s8.bf16 %v1726_v45  ;;  %v1730_v58 = vld [vmem:[%s6820_s12 + $0x238] sm:$0xff]  ;;  %v1977_v45 = vunpack.c.h.s8.bf16 %v1753_v41 }
 0x4a6   : > { %3038 = vmatprep.subr.bf16.mxu1 %v1890_v59  ;;  %3389 = vmatprep.subr.bf16.mxu0 %v3342_v60  ;;  %v7289_v59 = vpack.c.bf16 %v1651_v56, %v1651_v56  ;;  %v1926_v60 = vunpack.c.l.s8.bf16 %v1730_v58 }
 0x4a9   : > { %3039 = vmatpush1.bf16.msra.mxu1 %v1889_v4  ;;  %3390 = vmatpush1.bf16.msra.mxu0 %v3341_v5  ;;  %v1930_v4 = vunpack.c.h.s8.bf16 %v1730_v58  ;;  %v1929_v5 = vunpack.c.h.s8.bf16 %v1729_v62  ;;  %v1766_v58 = vld [vmem:[%s6820_s12 + $0x358] sm:$0xff] }
 0x4aa   : > { %3040 = vmatprep.subr.bf16.mxu1 %v1894_v6  ;;  %3391 = vmatprep.subr.bf16.mxu0 %v3346_v7  ;;  %v1733_v7 = vld [vmem:[%s6820_s12 + $0x250] sm:$0xff] }
 0x4ab   : > { %v1933_v40 = vunpack.c.l.s8.bf16 %v1733_v7 }
 0x4ad   : > { %3041 = vmatpush1.bf16.msra.mxu1 %v1893_v27  ;;  %3392 = vmatpush1.bf16.msra.mxu0 %v3345_v0  ;;  %v1937_v27 = vunpack.c.h.s8.bf16 %v1733_v7 }
 0x4ae   : > { %3042 = vmatprep.subr.bf16.mxu1 %v1898_v12  ;;  %3393 = vmatprep.subr.bf16.mxu0 %v3350_v8  ;;  %v1737_v12 = vld [vmem:[%s6820_s12 + $0x270] sm:$0xff] }
 0x4af   : > { %v1941_v8 = vunpack.c.l.s8.bf16 %v1737_v12 }
 0x4b1   : > { %3043 = vmatpush1.bf16.msra.mxu1 %v1897_v17  ;;  %3394 = vmatpush1.bf16.msra.mxu0 %v3349_v37  ;;  %v1945_v17 = vunpack.c.h.s8.bf16 %v1737_v12  ;;  %v1950_v37 = vunpack.c.l.s8.bf16 %v1742_v16 }
 0x4b2   : > { %3044 = vmatprep.subr.bf16.mxu1 %v1902_v31  ;;  %3395 = vmatprep.subr.bf16.mxu0 %v3354_v15  ;;  %v1741_v31 = vld [vmem:[%s6820_s12 + $0x290] sm:$0xff] }
 0x4b3   : > { %v1949_v15 = vunpack.c.l.s8.bf16 %v1741_v31 }
 0x4b5   : > { %3045 = vmatpush1.bf16.msra.mxu1 %v1901_v20  ;;  %3396 = vmatpush1.bf16.msra.mxu0 %v3353_v22  ;;  %v1953_v20 = vunpack.c.h.s8.bf16 %v1741_v31  ;;  %v1958_v22 = vunpack.c.l.s8.bf16 %v1746_v18 }
 0x4b6   : > { %3046 = vmatprep.subr.bf16.mxu1 %v1906_v23  ;;  %3397 = vmatprep.subr.bf16.mxu0 %v3358_v30  ;;  %v1745_v23 = vld [vmem:[%s6820_s12 + $0x2b0] sm:$0xff] }
 0x4b7   : > { %v1957_v30 = vunpack.c.l.s8.bf16 %v1745_v23 }
 0x4b9   : > { %3047 = vmatpush1.bf16.msra.mxu1 %v1905_v29  ;;  %3398 = vmatpush1.bf16.msra.mxu0 %v3357_v3  ;;  %v1961_v29 = vunpack.c.h.s8.bf16 %v1745_v23  ;;  %v1966_v3 = vunpack.c.l.s8.bf16 %v1750_v25 }
 0x4ba   : > { %3048 = vmatprep.subr.bf16.mxu1 %v1910_v33  ;;  %3399 = vmatprep.subr.bf16.mxu0 %v3362_v34  ;;  %v1749_v33 = vld [vmem:[%s6820_s12 + $0x2d0] sm:$0xff] }
 0x4bb   : > { %v1965_v34 = vunpack.c.l.s8.bf16 %v1749_v33 }
 0x4bd   : > { %3049 = vmatpush1.bf16.msra.mxu1 %v1909_v38  ;;  %3400 = vmatpush1.bf16.msra.mxu0 %v3361_v24  ;;  %v1969_v38 = vunpack.c.h.s8.bf16 %v1749_v33  ;;  %v1974_v24 = vunpack.c.l.s8.bf16 %v1754_v35 }
 0x4be   : > { %3050 = vmatprep.subr.bf16.mxu1 %v1914_v42  ;;  %3401 = vmatprep.subr.bf16.mxu0 %v3366_v43  ;;  %v1973_v42 = vunpack.c.l.s8.bf16 %v1753_v41  ;;  %v1978_v43 = vunpack.c.h.s8.bf16 %v1754_v35 }
 0x4c1   : > { %3051 = vmatpush1.bf16.msra.mxu1 %v1913_v47  ;;  %3402 = vmatpush1.bf16.msra.mxu0 %v3365_v49  ;;  %v1982_v47 = vunpack.c.l.s8.bf16 %v1758_v44  ;;  %v1757_v49 = vld [vmem:[%s6820_s12 + $0x310] sm:$0xff] }
 0x4c2   : > { %3061 = vmatprep.subr.bf16.mxu1 %v1918_v51  ;;  %3403 = vmatprep.subr.bf16.mxu0 %v3370_v53  ;;  %v1981_v50 = vunpack.c.l.s8.bf16 %v1757_v49  ;;  %v1986_v51 = vunpack.c.h.s8.bf16 %v1758_v44  ;;  %v1762_v53 = vld [vmem:[%s6820_s12 + $0x338] sm:$0xff]  ;;  %v1985_v54 = vunpack.c.h.s8.bf16 %v1757_v49 }
 0x4c4   : > { %3053 = vmatmul.mubr.bf16.vlgmr.msra.gmra.mrb[4].mxu1 %v7119_v1  ;;  %v1734_v1 = vld [vmem:[%s6820_s12 + $0x258] sm:$0xff] }
 0x4c5   : > { %3062 = vmatpush1.bf16.msra.mxu1 %v1917_v36  ;;  %3404 = vmatpush1.bf16.msra.mxu0 %v3369_v55  ;;  %v1934_v6 = vunpack.c.l.s8.bf16 %v1734_v1  ;;  %v1938_v11 = vunpack.c.h.s8.bf16 %v1734_v1  ;;  %v1990_v36 = vunpack.c.l.s8.bf16 %v1762_v53  ;;  %v1761_v55 = vld [vmem:[%s6820_s12 + $0x330] sm:$0xff] }
 0x4c6   : > { %3063 = vmatprep.subr.bf16.mxu1 %v1922_v57  ;;  %3093 = vmatprep.mubr.bf16.mxu1 %v7130_v9  ;;  %v1738_v9 = vld [vmem:[%s6820_s12 + $0x278] sm:$0xff]  ;;  %v1989_v56 = vunpack.c.l.s8.bf16 %v1761_v55  ;;  %v1994_v57 = vunpack.c.h.s8.bf16 %v1762_v53 }
 0x4c7   : > { %v1942_v0 = vunpack.c.l.s8.bf16 %v1738_v9  ;;  %v1946_v13 = vunpack.c.h.s8.bf16 %v1738_v9 }
 0x4c8   : > { %3406 = vmatmul.mubr.bf16.vlgmr.msra.gmra.mrb[8].mxu0 %v7289_v59 }
 0x4c9   : > { %3064 = vmatpush1.bf16.msra.mxu1 %v1921_v21  ;;  %v1993_v21 = vunpack.c.h.s8.bf16 %v1761_v55 }
 0x4ca   : > { %3065 = vmatprep.subr.bf16.mxu1 %v1926_v60  ;;  %v1998_v60 = vunpack.c.l.s8.bf16 %v1766_v58 }
 0x4cd   : > { %3066 = vmatpush1.bf16.msra.mxu1 %v1925_v46  ;;  %v1770_v46 = vld [vmem:[%s6820_s12 + $0x378] sm:$0xff] }
 0x4ce   : > { %3067 = vmatprep.subr.bf16.mxu1 %v1930_v4  ;;  %v2006_v1 = vunpack.c.l.s8.bf16 %v1770_v46  ;;  %v2010_v7 = vunpack.c.h.s8.bf16 %v1770_v46 }
 0x4d1   : > { %3068 = vmatpush1.bf16.msra.mxu1 %v1929_v5  ;;  %v1769_v5 = vld [vmem:[%s6820_s12 + $0x370] sm:$0xff] }
 0x4d2   : > { %3069 = vmatprep.subr.bf16.mxu1 %v1934_v6  ;;  %v2005_v6 = vunpack.c.l.s8.bf16 %v1769_v5 }
 0x4d5   : > { %3070 = vmatpush1.bf16.msra.mxu1 %v1933_v40  ;;  %v1774_v40 = vld [vmem:[%s6820_s12 + $0x398] sm:$0xff] }
 0x4d6   : > { %3071 = vmatprep.subr.bf16.mxu1 %v1938_v11  ;;  %v2009_v11 = vunpack.c.h.s8.bf16 %v1769_v5  ;;  %v2014_v9 = vunpack.c.l.s8.bf16 %v1774_v40  ;;  %v2018_v12 = vunpack.c.h.s8.bf16 %v1774_v40 }
 0x4d9   : > { %3072 = vmatpush1.bf16.msra.mxu1 %v1937_v27  ;;  %v1773_v27 = vld [vmem:[%s6820_s12 + $0x390] sm:$0xff] }
 0x4da   : > { %3073 = vmatprep.subr.bf16.mxu1 %v1942_v0  ;;  %v2013_v0 = vunpack.c.l.s8.bf16 %v1773_v27 }
 0x4dd   : > { %3074 = vmatpush1.bf16.msra.mxu1 %v1941_v8  ;;  %v1778_v8 = vld [vmem:[%s6820_s12 + $0x3b8] sm:$0xff] }
 0x4de   : > { %3075 = vmatprep.subr.bf16.mxu1 %v1946_v13  ;;  %v2017_v13 = vunpack.c.h.s8.bf16 %v1773_v27  ;;  %v2022_v16 = vunpack.c.l.s8.bf16 %v1778_v8  ;;  %v2026_v31 = vunpack.c.h.s8.bf16 %v1778_v8  ;;  %v3292_v8 = vld [vmem:[%s6820_s12 + $0x8f8] sm:$0xff] }
 0x4e1   : > { %3076 = vmatpush1.bf16.msra.mxu1 %v1945_v17  ;;  %v1777_v17 = vld [vmem:[%s6820_s12 + $0x3b0] sm:$0xff] }
 0x4e2   : > { %3077 = vmatprep.subr.bf16.mxu1 %v1950_v37  ;;  %v2021_v37 = vunpack.c.l.s8.bf16 %v1777_v17 }
 0x4e5   : > { %3078 = vmatpush1.bf16.msra.mxu1 %v1949_v15  ;;  %v1782_v15 = vld [vmem:[%s6820_s12 + $0x3d8] sm:$0xff] }
 0x4e6   : > { %3079 = vmatprep.subr.bf16.mxu1 %v1954_v26  ;;  %v2025_v26 = vunpack.c.h.s8.bf16 %v1777_v17  ;;  %v2030_v18 = vunpack.c.l.s8.bf16 %v1782_v15  ;;  %v2034_v23 = vunpack.c.h.s8.bf16 %v1782_v15  ;;  %v3291_v17 = vld [vmem:[%s6820_s12 + $0x8f0] sm:$0xff]  ;;  %v3296_v15 = vld [vmem:[%s6820_s12 + $0x918] sm:$0xff] }
 0x4e9   : > { %3080 = vmatpush1.bf16.msra.mxu1 %v1953_v20  ;;  %v1781_v20 = vld [vmem:[%s6820_s12 + $0x3d0] sm:$0xff] }
 0x4ea   : > { %3081 = vmatprep.subr.bf16.mxu1 %v1958_v22  ;;  %v2029_v22 = vunpack.c.l.s8.bf16 %v1781_v20 }
 0x4ed   : > { %3082 = vmatpush1.bf16.msra.mxu1 %v1957_v30  ;;  %v1786_v30 = vld [vmem:[%s6820_s12 + $0x3f8] sm:$0xff] }
 0x4ee   : > { %3083 = vmatprep.subr.bf16.mxu1 %v1962_v39  ;;  %v2033_v39 = vunpack.c.h.s8.bf16 %v1781_v20  ;;  %v2038_v25 = vunpack.c.l.s8.bf16 %v1786_v30  ;;  %v2042_v33 = vunpack.c.h.s8.bf16 %v1786_v30  ;;  %v3295_v20 = vld [vmem:[%s6820_s12 + $0x910] sm:$0xff]  ;;  %v3300_v30 = vld [vmem:[%s6820_s12 + $0x938] sm:$0xff] }
 0x4f1   : > { %3084 = vmatpush1.bf16.msra.mxu1 %v1961_v29  ;;  %v1785_v29 = vld [vmem:[%s6820_s12 + $0x3f0] sm:$0xff] }
 0x4f2   : > { %3085 = vmatprep.subr.bf16.mxu1 %v1966_v3  ;;  %v2037_v3 = vunpack.c.l.s8.bf16 %v1785_v29 }
 0x4f5   : > { %3086 = vmatpush1.bf16.msra.mxu1 %v1965_v34  ;;  %v3146_v34 = vld [vmem:[%s6820_s12 + $0x818] sm:$0xff] }
 0x4f6   : > { %3087 = vmatprep.subr.bf16.mxu1 %v1970_v32  ;;  %v2041_v32 = vunpack.c.h.s8.bf16 %v1785_v29  ;;  %v3162_v35 = vunpack.c.l.s8.bf16 %v3146_v34  ;;  %v3166_v41 = vunpack.c.h.s8.bf16 %v3146_v34  ;;  %v3299_v29 = vld [vmem:[%s6820_s12 + $0x930] sm:$0xff]  ;;  %v3304_v34 = vld [vmem:[%s6820_s12 + $0x958] sm:$0xff] }
 0x4f9   : > { %3088 = vmatpush1.bf16.msra.mxu1 %v1969_v38  ;;  %v3145_v38 = vld [vmem:[%s6820_s12 + $0x810] sm:$0xff] }
 0x4fa   : > { %3089 = vmatprep.subr.bf16.mxu1 %v1974_v24  ;;  %v3161_v24 = vunpack.c.l.s8.bf16 %v3145_v38 }
 0x4fd   : > { %3090 = vmatpush1.bf16.msra.mxu1 %v1973_v42  ;;  %v3150_v42 = vld [vmem:[%s6820_s12 + $0x838] sm:$0xff] }
 0x4fe   : > { %3091 = vmatprep.subr.bf16.mxu1 %v1978_v43  ;;  %v3165_v43 = vunpack.c.h.s8.bf16 %v3145_v38  ;;  %v3170_v44 = vunpack.c.l.s8.bf16 %v3150_v42  ;;  %v3174_v49 = vunpack.c.h.s8.bf16 %v3150_v42  ;;  %v3303_v38 = vld [vmem:[%s6820_s12 + $0x950] sm:$0xff]  ;;  %v3308_v42 = vld [vmem:[%s6820_s12 + $0x978] sm:$0xff] }
 0x501   : > { %3092 = vmatpush1.bf16.msra.mxu1 %v1977_v45  ;;  %v3149_v45 = vld [vmem:[%s6820_s12 + $0x830] sm:$0xff] }
 0x502   : > { %3102 = vmatprep.subr.bf16.mxu1 %v1982_v47  ;;  %v3169_v47 = vunpack.c.l.s8.bf16 %v3149_v45 }
 0x504   : > { %3094 = vmatmul.mubr.bf16.vlgmr.msra.gmra.mrb[4].mxu1 %v7172_v63  ;;  %v1765_v63 = vld [vmem:[%s6820_s12 + $0x350] sm:$0xff] }
 0x505   : > { %3103 = vmatpush1.bf16.msra.mxu1 %v1981_v50  ;;  %3134 = vmatprep.mubr.bf16.mxu1 %v7183_v2  ;;  %v1997_v62 = vunpack.c.l.s8.bf16 %v1765_v63  ;;  %v2002_v2 = vunpack.c.h.s8.bf16 %v1766_v58  ;;  %v2001_v4 = vunpack.c.h.s8.bf16 %v1765_v63  ;;  %v3154_v50 = vld [vmem:[%s6820_s12 + $0x858] sm:$0xff] }
 0x506   : > { %3104 = vmatprep.subr.bf16.mxu1 %v1986_v51  ;;  %v3173_v51 = vunpack.c.h.s8.bf16 %v3149_v45  ;;  %v3178_v53 = vunpack.c.l.s8.bf16 %v3154_v50  ;;  %v3368_v45 = vunpack.c.l.s8.bf16 %v3308_v42 }
 0x509   : > { %3105 = vmatpush1.bf16.msra.mxu1 %v1985_v54 }
 0x50a   : > { %3106 = vmatprep.subr.bf16.mxu1 %v1990_v36  ;;  %v3158_v36 = vld [vmem:[%s6820_s12 + $0x878] sm:$0xff] }
 0x50d   : > { %3107 = vmatpush1.bf16.msra.mxu1 %v1989_v56  ;;  %v3186_v56 = vunpack.c.l.s8.bf16 %v3158_v36 }
 0x50e   : > { %3108 = vmatprep.subr.bf16.mxu1 %v1994_v57  ;;  %v3157_v57 = vld [vmem:[%s6820_s12 + $0x870] sm:$0xff] }
 0x50f   : > { %v3185_v58 = vunpack.c.l.s8.bf16 %v3157_v57  ;;  %v3189_v63 = vunpack.c.h.s8.bf16 %v3157_v57 }
 0x511   : > { %3109 = vmatpush1.bf16.msra.mxu1 %v1993_v21  ;;  %v3190_v21 = vunpack.c.h.s8.bf16 %v3158_v36 }
 0x512   : > { %3110 = vmatprep.subr.bf16.mxu1 %v1998_v60  ;;  %v3280_v60 = vld [vmem:[%s6820_s12 + $0x898] sm:$0xff] }
 0x515   : > { %3111 = vmatpush1.bf16.msra.mxu1 %v1997_v62  ;;  %v3312_v62 = vunpack.c.l.s8.bf16 %v3280_v60 }
 0x516   : > { %3112 = vmatprep.subr.bf16.mxu1 %v2002_v2  ;;  %v3279_v2 = vld [vmem:[%s6820_s12 + $0x890] sm:$0xff] }
 0x517   : > { %v3311_v46 = vunpack.c.l.s8.bf16 %v3279_v2  ;;  %v3315_v5 = vunpack.c.h.s8.bf16 %v3279_v2 }
 0x519   : > { %3113 = vmatpush1.bf16.msra.mxu1 %v2001_v4  ;;  %v3316_v4 = vunpack.c.h.s8.bf16 %v3280_v60 }
 0x51a   : > { %3114 = vmatprep.subr.bf16.mxu1 %v2006_v1  ;;  %v3284_v1 = vld [vmem:[%s6820_s12 + $0x8b8] sm:$0xff] }
 0x51d   : > { %3115 = vmatpush1.bf16.msra.mxu1 %v2005_v6  ;;  %v3320_v6 = vunpack.c.l.s8.bf16 %v3284_v1 }
 0x51e   : > { %3116 = vmatprep.subr.bf16.mxu1 %v2010_v7  ;;  %v3283_v7 = vld [vmem:[%s6820_s12 + $0x8b0] sm:$0xff] }
 0x51f   : > { %v3319_v40 = vunpack.c.l.s8.bf16 %v3283_v7  ;;  %v3323_v27 = vunpack.c.h.s8.bf16 %v3283_v7 }
 0x521   : > { %3117 = vmatpush1.bf16.msra.mxu1 %v2009_v11  ;;  %v3324_v11 = vunpack.c.h.s8.bf16 %v3284_v1 }
 0x522   : > { %3118 = vmatprep.subr.bf16.mxu1 %v2014_v9  ;;  %v3288_v9 = vld [vmem:[%s6820_s12 + $0x8d8] sm:$0xff] }
 0x525   : > { %3119 = vmatpush1.bf16.msra.mxu1 %v2013_v0  ;;  %v3328_v0 = vunpack.c.l.s8.bf16 %v3288_v9 }
 0x526   : > { %3120 = vmatprep.subr.bf16.mxu1 %v2018_v12 }
 0x529   : > { %3121 = vmatpush1.bf16.msra.mxu1 %v2017_v13 }
 0x52a   : > { %3122 = vmatprep.subr.bf16.mxu1 %v2022_v16  ;;  %v3336_v16 = vunpack.c.l.s8.bf16 %v3292_v8 }
 0x52d   : > { %3123 = vmatpush1.bf16.msra.mxu1 %v2021_v37  ;;  %v3335_v37 = vunpack.c.l.s8.bf16 %v3291_v17 }
 0x52e   : > { %3124 = vmatprep.subr.bf16.mxu1 %v2026_v31  ;;  %v3340_v31 = vunpack.c.h.s8.bf16 %v3292_v8 }
 0x531   : > { %3125 = vmatpush1.bf16.msra.mxu1 %v2025_v26  ;;  %v3339_v26 = vunpack.c.h.s8.bf16 %v3291_v17 }
 0x532   : > { %3126 = vmatprep.subr.bf16.mxu1 %v2030_v18  ;;  %v3344_v18 = vunpack.c.l.s8.bf16 %v3296_v15 }
 0x535   : > { %3127 = vmatpush1.bf16.msra.mxu1 %v2029_v22  ;;  %v3343_v22 = vunpack.c.l.s8.bf16 %v3295_v20 }
 0x536   : > { %3128 = vmatprep.subr.bf16.mxu1 %v2034_v23  ;;  %v3348_v23 = vunpack.c.h.s8.bf16 %v3296_v15 }
 0x539   : > { %3129 = vmatpush1.bf16.msra.mxu1 %v2033_v39  ;;  %v3347_v39 = vunpack.c.h.s8.bf16 %v3295_v20 }
 0x53a   : > { %3130 = vmatprep.subr.bf16.mxu1 %v2038_v25  ;;  %v3352_v25 = vunpack.c.l.s8.bf16 %v3300_v30 }
 0x53d   : > { %3131 = vmatpush1.bf16.msra.mxu1 %v2037_v3  ;;  %v3351_v3 = vunpack.c.l.s8.bf16 %v3299_v29 }
 0x53e   : > { %3132 = vmatprep.subr.bf16.mxu1 %v2042_v33  ;;  %v3356_v33 = vunpack.c.h.s8.bf16 %v3300_v30 }
 0x541   : > { %3133 = vmatpush1.bf16.msra.mxu1 %v2041_v32  ;;  %v3355_v32 = vunpack.c.h.s8.bf16 %v3299_v29 }
 0x542   : > { %3232 = vmatprep.subr.bf16.mxu1 %v3162_v35  ;;  %v3360_v35 = vunpack.c.l.s8.bf16 %v3304_v34 }
 0x544   : > { %3135 = vmatmul.mubr.bf16.vlgmr.msra.gmra.mrb[4].mxu1 %v7221_v61  ;;  %v3153_v61 = vld [vmem:[%s6820_s12 + $0x850] sm:$0xff] }
 0x545   : > { %3233 = vmatpush1.bf16.msra.mxu1 %v3161_v24  ;;  %3264 = vmatprep.mubr.bf16.mxu1 %v6133_v19  ;;  %v3177_v54 = vunpack.c.l.s8.bf16 %v3153_v61  ;;  %v3182_v19 = vunpack.c.h.s8.bf16 %v3154_v50  ;;  %v3181_v55 = vunpack.c.h.s8.bf16 %v3153_v61  ;;  %v3359_v24 = vunpack.c.l.s8.bf16 %v3303_v38 }
 0x546   : > { %3234 = vmatprep.subr.bf16.mxu1 %v3166_v41  ;;  %v3364_v41 = vunpack.c.h.s8.bf16 %v3304_v34 }
 0x549   : > { %3235 = vmatpush1.bf16.msra.mxu1 %v3165_v43  ;;  %v3363_v43 = vunpack.c.h.s8.bf16 %v3303_v38 }
 0x54a   : > { %3236 = vmatprep.subr.bf16.mxu1 %v3170_v44  ;;  %v7353_v44 = vld [vmem:[%s991_s23] sm:$0xf]  ;;  %s7745_s23 = scalar_lea.vmem [#allocation17], %s6827_s27 }
 0x54b   : > { %v3464_v50 = vrot.slane %v7353_v44, %v6988_v48 }
 0x54d   : > { %3237 = vmatpush1.bf16.msra.mxu1 %v3169_v47  ;;  %v3307_v47 = vld [vmem:[%s6820_s12 + $0x970] sm:$0xff] }
 0x54e   : > { %3238 = vmatprep.subr.bf16.mxu1 %v3174_v49  ;;  %v7358_v49 = vld [vmem:[%s1000_s15] sm:$0xf]  ;;  %s7748_s15 = scalar_lea.vmem (!%p5016_p8), [#allocation21], %s6840_s14 }
 0x54f   : > { %v3490_v61 = vrot.slane %v7358_v49, %v6988_v48  ;;  %v3494_v36 = vrot.slane %v7358_v49, %v6991_v52 }
 0x551   : > { %3239 = vmatpush1.bf16.msra.mxu1 %v3173_v51  ;;  %v3468_v51 = vrot.slane %v7353_v44, %v6991_v52 }
 0x552   : > { %3240 = vmatprep.subr.bf16.mxu1 %v3178_v53  ;;  %v3367_v53 = vunpack.c.l.s8.bf16 %v3307_v47 }
 0x555   : > { %3241 = vmatpush1.bf16.msra.mxu1 %v3177_v54  ;;  %v3372_v54 = vunpack.c.h.s8.bf16 %v3308_v42 }
 0x556   : > { %3242 = vmatprep.subr.bf16.mxu1 %v3182_v19 }
 0x559   : > { %3243 = vmatpush1.bf16.msra.mxu1 %v3181_v55 }
 0x55a   : > { %3244 = vmatprep.subr.bf16.mxu1 %v3186_v56 }
 0x55d   : > { %3245 = vmatpush1.bf16.msra.mxu1 %v3185_v58 }
 0x55e   : > { %3246 = vmatprep.subr.bf16.mxu1 %v3190_v21  ;;  %v3371_v21 = vunpack.c.h.s8.bf16 %v3307_v47 }
 0x561   : > { %3247 = vmatpush1.bf16.msra.mxu1 %v3189_v63 }
 0x562   : > { %3414 = vmatprep.subr.bf16.mxu1 %v3312_v62 }
 0x564   : > { %3265 = vmatmul.mubr.bf16.vlgmr.msra.gmra.mrb[4].mxu1 %v7248_v10  ;;  %v3287_v10 = vld [vmem:[%s6820_s12 + $0x8d0] sm:$0xff]  ;;  %s7744_s12 = scalar_lea.vmem [#allocation16], %s6827_s27  ;;  %s7747_s27 = scalar_lea.vmem (!%p5016_p8), [#allocation20], %s6840_s14 }
 0x565   : > { %3415 = vmatpush1.bf16.msra.mxu1 %v3311_v46  ;;  %3446 = vmatprep.mubr.bf16.mxu1 %v7253_v14  ;;  %v3327_v12 = vunpack.c.l.s8.bf16 %v3287_v10  ;;  %v3332_v14 = vunpack.c.h.s8.bf16 %v3288_v9  ;;  %v3331_v13 = vunpack.c.h.s8.bf16 %v3287_v10  ;;  %v7371_v34 = vld [vmem:[%s7744_s12] sm:$0xf] }
 0x566   : > { %3416 = vmatprep.subr.bf16.mxu1 %v3316_v4 }
 0x569   : > { %3417 = vmatpush1.bf16.msra.mxu1 %v3315_v5 }
 0x56a   : > { %3418 = vmatprep.subr.bf16.mxu1 %v3320_v6 }
 0x56d   : > { %3419 = vmatpush1.bf16.msra.mxu1 %v3319_v40 }
 0x56e   : > { %3420 = vmatprep.subr.bf16.mxu1 %v3324_v11 }
 0x571   : > { %3421 = vmatpush1.bf16.msra.mxu1 %v3323_v27 }
 0x572   : > { %3422 = vmatprep.subr.bf16.mxu1 %v3328_v0 }
 0x575   : > { %3423 = vmatpush1.bf16.msra.mxu1 %v3327_v12 }
 0x576   : > { %3424 = vmatprep.subr.bf16.mxu1 %v3332_v14 }
 0x579   : > { %3425 = vmatpush1.bf16.msra.mxu1 %v3331_v13 }
 0x57a   : > { %3426 = vmatprep.subr.bf16.mxu1 %v3336_v16 }
 0x57d   : > { %3427 = vmatpush1.bf16.msra.mxu1 %v3335_v37 }
 0x57e   : > { %3428 = vmatprep.subr.bf16.mxu1 %v3340_v31 }
 0x581   : > { %3429 = vmatpush1.bf16.msra.mxu1 %v3339_v26 }
 0x582   : > { %3430 = vmatprep.subr.bf16.mxu1 %v3344_v18 }
 0x585   : > { %3431 = vmatpush1.bf16.msra.mxu1 %v3343_v22 }
 0x586   : > { %3432 = vmatprep.subr.bf16.mxu1 %v3348_v23 }
 0x589   : > { %3433 = vmatpush1.bf16.msra.mxu1 %v3347_v39 }
 0x58a   : > { %3434 = vmatprep.subr.bf16.mxu1 %v3352_v25 }
 0x58d   : > { %3435 = vmatpush1.bf16.msra.mxu1 %v3351_v3 }
 0x58e   : > { %3436 = vmatprep.subr.bf16.mxu1 %v3356_v33 }
 0x591   : > { %3437 = vmatpush1.bf16.msra.mxu1 %v3355_v32  ;;  %v7375_v32 = vld [vmem:[%s7745_s23] sm:$0xf] }
 0x592   : > { %3438 = vmatprep.subr.bf16.mxu1 %v3360_v35  ;;  %v3593_v35 = vrot.slane %v7371_v34, %v6988_v48  ;;  %v3623_v47 = vrot.slane %v7375_v32, %v6991_v52 }
 0x595   : > { %3439 = vmatpush1.bf16.msra.mxu1 %v3359_v24  ;;  %v3597_v24 = vrot.slane %v7371_v34, %v6991_v52 }
 0x596   : > { %3440 = vmatprep.subr.bf16.mxu1 %v3364_v41 }
 0x599   : > { %3441 = vmatpush1.bf16.msra.mxu1 %v3363_v43  ;;  %v3619_v43 = vrot.slane %v7375_v32, %v6988_v48 }
 0x59a   : > { %3442 = vmatprep.subr.bf16.mxu1 %v3368_v45 }
 0x59b   : > { %v3407_v19 = vpop.f32.mrb[8].mxu0 }
 0x59c   : > { %v3481_v55 = vmul.f32 %v3464_v50, %v3407_v19  ;;  %v3409_v56 = vpop.f32.mrb[9].mxu0 }
 0x59d   : > { %v3482_v57 = vmul.f32 %v3468_v51, %v3409_v56  ;;  %v3411_v58 = vpop.f32.mrb[10].mxu0  ;;  %3443 = vmatpush1.bf16.msra.mxu1 %v3367_v53 }
 0x59e   : > { %v3507_v60 = vadd.f32 %v3490_v61, %v3481_v55  ;;  %v3412_v63 = vpop.f32.mrb[11].mxu0  ;;  %3444 = vmatprep.subr.bf16.mxu1 %v3372_v54  ;;  %v7395_v55 = vsub.s32 3, %v6982_v28 }
 0x59f   : > { %v3508_v62 = vadd.f32 %v3494_v36, %v3482_v57  ;;  %v7392_v36 = vsub.s32 2, %v6982_v28 }
 0x5a0   : > { %v3511_v2 = vrot.slane %v3507_v60, 4  ;;  %v3476_v57 = vrot.slane %v7353_v44, %v7395_v55 }
 0x5a1   : > { %v3517_v46 = vrot.slane %v3508_v62, 4  ;;  %3445 = vmatpush1.bf16.msra.mxu1 %v3371_v21  ;;  %v3472_v56 = vrot.slane %v7353_v44, %v7392_v36  ;;  %v3498_v58 = vrot.slane %v7358_v49, %v7392_v36 }
 0x5a2   : > { %v3512_v4 = vadd.f32 %v3511_v2, %v3507_v60 }
 0x5a3   : > { %v3518_v1 = vadd.f32 %v3517_v46, %v3508_v62 }
 0x5a4   : > { %v3513_v5 = vrot.slane %v3512_v4, 2  ;;  %3447 = vmatmul.mubr.bf16.vlgmr.msra.gmra.mrb[4].mxu1 %v7289_v59 }
 0x5a5   : > { %v3519_v6 = vrot.slane %v3518_v1, 2 }
 0x5a6   : > { %v3514_v7 = vadd.f32 %v3513_v5, %v3512_v4 }
 0x5a7   : > { %v3520_v40 = vadd.f32 %v3519_v6, %v3518_v1 }
 0x5a8   : > { %v3515_v11 = vrot.slane %v3514_v7, 1 }
 0x5a9   : > { %v3521_v9 = vrot.slane %v3520_v40, 1 }
 0x5aa   : > { %v3516_v27 = vadd.f32 %v3515_v11, %v3514_v7 }
 0x5ab   : > { %v3522_v0 = vadd.f32 %v3521_v9, %v3520_v40 }
 0x5ac   : > { %v3536_v10 = vmul.f32 0.125, %v3516_v27 }
 0x5ad   : > { %v3537_v12 = vmul.f32 0.125, %v3522_v0 }
 0x5ae   : > { %v3540_v14 = vsub.f32 %v3507_v60, %v3536_v10  ;;  %v3502_v60 = vrot.slane %v7358_v49, %v7395_v55 }
 0x5af   : > { %v3541_v8 = vsub.f32 %v3508_v62, %v3537_v12 }
 0x5b0   : > { %v3544_v13 = vmul.f32 %v3540_v14, %v3540_v14 }
 0x5b1   : > { %v3545_v16 = vmul.f32 %v3541_v8, %v3541_v8 }
 0x5b2   : > { %v3548_v17 = vrot.slane %v3544_v13, 4 }
 0x5b3   : > { %v3554_v37 = vrot.slane %v3545_v16, 4 }
 0x5b4   : > { %v3549_v31 = vadd.f32 %v3548_v17, %v3544_v13 }
 0x5b5   : > { %v3555_v15 = vadd.f32 %v3554_v37, %v3545_v16 }
 0x5b6   : > { %v3550_v59 = vrot.slane %v3549_v31, 2 }
 0x5b7   : > { %v3556_v26 = vrot.slane %v3555_v15, 2 }
 0x5b8   : > { %v3551_v18 = vadd.f32 %v3550_v59, %v3549_v31 }
 0x5b9   : > { %v3557_v20 = vadd.f32 %v3556_v26, %v3555_v15 }
 0x5ba   : > { %v3552_v22 = vrot.slane %v3551_v18, 1 }
 0x5bb   : > { %v3558_v23 = vrot.slane %v3557_v20, 1 }
 0x5bc   : > { %v3553_v30 = vadd.f32 %v3552_v22, %v3551_v18 }
 0x5bd   : > { %v3559_v39 = vadd.f32 %v3558_v23, %v3557_v20 }
 0x5be   : > { %v3572_v25 = vmul.f32 0.125, %v3553_v30 }
 0x5bf   : > { %v3573_v29 = vmul.f32 0.125, %v3559_v39 }
 0x5c0   : > { %v3576_v3 = vadd.f32 1e-05, %v3572_v25 }
 0x5c1   : > { %v3577_v33 = vadd.f32 1e-05, %v3573_v29 }
 0x5c2   : > { %5477 = vrsqrt.f32 %v3576_v3 }
 0x5c3   : > { %5479 = vrsqrt.f32 %v3577_v33 }
 0x5cc   : > { %v5478_v38 = vpop.eup %5477 }
 0x5cd   : > { %v5480_v41 = vpop.eup %5479  ;;  %v3584_v42 = vmul.f32 %v5478_v38, %v3540_v14 }
 0x5ce   : > { %v3585_v45 = vmul.f32 %v5480_v41, %v3541_v8 }
 0x5cf   : > { %v3610_v50 = vmul.f32 %v3593_v35, %v3584_v42  ;;  %v3605_v42 = vrot.slane %v7371_v34, %v7395_v55 }
 0x5d0   : > { %v3611_v51 = vmul.f32 %v3597_v24, %v3585_v45  ;;  %v3601_v24 = vrot.slane %v7371_v34, %v7392_v36  ;;  %v3657_v34 = vld [vmem:[%s6834_s25 + $0x8] sm:$0xff] (!%p5016_p8) }
 0x5d1   : > { %v3636_v53 = vadd.f32 %v3619_v43, %v3610_v50 }
 0x5d2   : > { %v3637_v61 = vadd.f32 %v3623_v47, %v3611_v51  ;;  %v3627_v47 = vrot.slane %v7375_v32, %v7392_v36  ;;  %v3631_v51 = vrot.slane %v7375_v32, %v7395_v55  ;;  %v3659_v32 = vld [vmem:[%s6834_s25 + $0x18] sm:$0xff] (!%p5016_p8) }
 0x5d3   : > { %v7385_v54 = vmax.f32 %v3636_v53, 0.0 }
 0x5d4   : > { %v7387_v19 = vmax.f32 %v3637_v61, 0.0 }
 0x5d5   : > { %3644 = vst [vmem:[#allocation2] sm:$0xff] %v7385_v54 }
 0x5d6   : > { %3645 = vst [vmem:[#allocation2 + $0x8] sm:$0xff] %v7387_v19 }
 0x677   : > { %v3448_v21 = vpop.f32.mrb[4].mxu1 }
 0x678   : > { %v3483_v63 = vmul.f32 %v3472_v56, %v3448_v21  ;;  %v3450_v62 = vpop.f32.mrb[5].mxu1 }
 0x679   : > { %v3484_v2 = vmul.f32 %v3476_v57, %v3450_v62  ;;  %v3452_v46 = vpop.f32.mrb[6].mxu1  ;;  %v3721_v62 = vunpack.c.l.s8.bf16 (!%p5016_p8), %v3657_v34 }
 0x67a   : > { %v3509_v4 = vadd.f32 %v3498_v58, %v3483_v63  ;;  %v3453_v28 = vpop.f32.mrb[7].mxu1  ;;  %v3653_v63 = vpack.c.bf16 (!%p5016_p8), %v7387_v19, %v7387_v19  ;;  %v3723_v46 = vunpack.c.l.s8.bf16 (!%p5016_p8), %v3659_v32 }
 0x67b   : > { %v3510_v1 = vadd.f32 %v3502_v60, %v3484_v2  ;;  %v3656_v60 = vld [vmem:[%s6834_s25] sm:$0xff] (!%p5016_p8)  ;;  %v3725_v2 = vunpack.c.h.s8.bf16 (!%p5016_p8), %v3657_v34  ;;  %v3658_v28 = vld [vmem:[%s6834_s25 + $0x10] sm:$0xff] (!%p5016_p8)  ;;  %3848 = vmatprep.subr.bf16.mxu0 (!%p5016_p8), %v3721_v62 }
 0x67c   : > { %v3523_v5 = vrot.slane %v3509_v4, 4  ;;  %3880 = vmatprep.mubr.bf16.mxu0 (!%p5016_p8), %v3653_v63  ;;  %3962 = vmatprep.mubr.bf16.mxu1 (!%p5016_p8), %v3653_v63  ;;  %v3679_v63 = vld [vmem:[%s6834_s25 + $0xb8] sm:$0xff] (!%p5016_p8) }
 0x67d   : > { %v3529_v6 = vrot.slane %v3510_v1, 4  ;;  %3930 = vmatprep.subr.bf16.mxu1 (!%p5016_p8), %v3723_v46 }
 0x67e   : > { %v3524_v7 = vadd.f32 %v3523_v5, %v3509_v4  ;;  %v3722_v5 = vunpack.c.l.s8.bf16 (!%p5016_p8), %v3658_v28 }
 0x67f   : > { %v3530_v40 = vadd.f32 %v3529_v6, %v3510_v1  ;;  %v3661_v6 = vld [vmem:[%s6834_s25 + $0x28] sm:$0xff] (!%p5016_p8) }
 0x680   : > { %v3525_v11 = vrot.slane %v3524_v7, 2  ;;  %3931 = vmatpush1.bf16.msra.mxu1 (!%p5016_p8), %v3722_v5  ;;  %v3729_v19 = vunpack.c.l.s8.bf16 (!%p5016_p8), %v3661_v6 }
 0x681   : > { %v3531_v44 = vrot.slane %v3530_v40, 2 }
 0x682   : > { %v3526_v9 = vadd.f32 %v3525_v11, %v3524_v7  ;;  %v3663_v7 = vld [vmem:[%s6834_s25 + $0x38] sm:$0xff] (!%p5016_p8)  ;;  %v3726_v11 = vunpack.c.h.s8.bf16 (!%p5016_p8), %v3658_v28  ;;  %v3676_v28 = vld [vmem:[%s6834_s25 + $0xa0] sm:$0xff] (!%p5016_p8) }
 0x683   : > { %v3532_v27 = vadd.f32 %v3531_v44, %v3530_v40  ;;  %v3724_v40 = vunpack.c.h.s8.bf16 (!%p5016_p8), %v3656_v60  ;;  %v3731_v44 = vunpack.c.l.s8.bf16 (!%p5016_p8), %v3663_v7  ;;  %v3760_v5 = vunpack.c.l.s8.bf16 (!%p5016_p8), %v3676_v28 }
 0x684   : > { %v3527_v0 = vrot.slane %v3526_v9, 1 }
 0x685   : > { %v3533_v10 = vrot.slane %v3532_v27, 1 }
 0x686   : > { %v3528_v12 = vadd.f32 %v3527_v0, %v3526_v9  ;;  %v3660_v9 = vld [vmem:[%s6834_s25 + $0x20] sm:$0xff] (!%p5016_p8) }
 0x687   : > { %v3534_v14 = vadd.f32 %v3533_v10, %v3532_v27  ;;  %v3662_v27 = vld [vmem:[%s6834_s25 + $0x30] sm:$0xff] (!%p5016_p8)  ;;  %v3728_v0 = vunpack.c.l.s8.bf16 (!%p5016_p8), %v3660_v9 }
 0x688   : > { %v3538_v49 = vmul.f32 0.125, %v3528_v12  ;;  %v3730_v10 = vunpack.c.l.s8.bf16 (!%p5016_p8), %v3662_v27  ;;  %v3733_v12 = vunpack.c.h.s8.bf16 (!%p5016_p8), %v3661_v6 }
 0x689   : > { %v3539_v8 = vmul.f32 0.125, %v3534_v14  ;;  %v3735_v14 = vunpack.c.h.s8.bf16 (!%p5016_p8), %v3663_v7 }
 0x68a   : > { %v3542_v13 = vsub.f32 %v3509_v4, %v3538_v49  ;;  %v3727_v4 = vunpack.c.h.s8.bf16 (!%p5016_p8), %v3659_v32  ;;  %v3665_v49 = vld [vmem:[%s6834_s25 + $0x48] sm:$0xff] (!%p5016_p8) }
 0x68b   : > { %v3543_v16 = vsub.f32 %v3510_v1, %v3539_v8  ;;  %v3720_v1 = vunpack.c.l.s8.bf16 (!%p5016_p8), %v3656_v60  ;;  %v3667_v8 = vld [vmem:[%s6834_s25 + $0x58] sm:$0xff] (!%p5016_p8)  ;;  %v3677_v60 = vld [vmem:[%s6834_s25 + $0xa8] sm:$0xff] (!%p5016_p8) }
 0x68c   : > { %v3546_v17 = vmul.f32 %v3542_v13, %v3542_v13  ;;  %3932 = vmatprep.subr.bf16.mxu1 (!%p5016_p8), %v3727_v4  ;;  %v3761_v46 = vunpack.c.l.s8.bf16 (!%p5016_p8), %v3677_v60  ;;  %v3763_v4 = vunpack.c.l.s8.bf16 (!%p5016_p8), %v3679_v63  ;;  %v3765_v7 = vunpack.c.h.s8.bf16 (!%p5016_p8), %v3677_v60 }
 0x68d   : > { %v3547_v37 = vmul.f32 %v3543_v16, %v3543_v16  ;;  %3849 = vmatpush1.bf16.msra.mxu0 (!%p5016_p8), %v3720_v1  ;;  %3933 = vmatpush1.bf16.msra.mxu1 (!%p5016_p8), %v3726_v11  ;;  %v3678_v1 = vld [vmem:[%s6834_s25 + $0xb0] sm:$0xff] (!%p5016_p8)  ;;  %v3681_v11 = vld [vmem:[%s6834_s25 + $0xc8] sm:$0xff] (!%p5016_p8) }
 0x68e   : > { %v3560_v31 = vrot.slane %v3546_v17, 4  ;;  %3850 = vmatprep.subr.bf16.mxu0 (!%p5016_p8), %v3725_v2  ;;  %3934 = vmatprep.subr.bf16.mxu1 (!%p5016_p8), %v3731_v44  ;;  %v3762_v6 = vunpack.c.l.s8.bf16 (!%p5016_p8), %v3678_v1  ;;  %v3764_v44 = vunpack.c.h.s8.bf16 (!%p5016_p8), %v3676_v28 }
 0x68f   : > { %v3566_v15 = vrot.slane %v3547_v37, 4 }
 0x690   : > { %v3561_v59 = vadd.f32 %v3560_v31, %v3546_v17  ;;  %v3737_v17 = vunpack.c.l.s8.bf16 (!%p5016_p8), %v3665_v49  ;;  %v3664_v31 = vld [vmem:[%s6834_s25 + $0x40] sm:$0xff] (!%p5016_p8) }
 0x691   : > { %v3567_v26 = vadd.f32 %v3566_v15, %v3547_v37  ;;  %3851 = vmatpush1.bf16.msra.mxu0 (!%p5016_p8), %v3724_v40  ;;  %3935 = vmatpush1.bf16.msra.mxu1 (!%p5016_p8), %v3730_v10  ;;  %v3739_v37 = vunpack.c.l.s8.bf16 (!%p5016_p8), %v3667_v8  ;;  %v3666_v15 = vld [vmem:[%s6834_s25 + $0x50] sm:$0xff] (!%p5016_p8)  ;;  %v3767_v40 = vunpack.c.h.s8.bf16 (!%p5016_p8), %v3679_v63  ;;  %v3680_v10 = vld [vmem:[%s6834_s25 + $0xc0] sm:$0xff] (!%p5016_p8) }
 0x692   : > { %v3562_v18 = vrot.slane %v3561_v59, 2  ;;  %3852 = vmatprep.subr.bf16.mxu0 (!%p5016_p8), %v3729_v19  ;;  %3936 = vmatprep.subr.bf16.mxu1 (!%p5016_p8), %v3735_v14  ;;  %v3683_v19 = vld [vmem:[%s6834_s25 + $0xd8] sm:$0xff] (!%p5016_p8)  ;;  %v3768_v14 = vunpack.c.l.s8.bf16 (!%p5016_p8), %v3680_v10 }
 0x693   : > { %v3568_v20 = vrot.slane %v3567_v26, 2 }
 0x694   : > { %v3563_v22 = vadd.f32 %v3562_v18, %v3561_v59  ;;  %v3736_v59 = vunpack.c.l.s8.bf16 (!%p5016_p8), %v3664_v31  ;;  %v3741_v18 = vunpack.c.h.s8.bf16 (!%p5016_p8), %v3665_v49 }
 0x695   : > { %v3569_v23 = vadd.f32 %v3568_v20, %v3567_v26  ;;  %3853 = vmatpush1.bf16.msra.mxu0 (!%p5016_p8), %v3728_v0  ;;  %v3738_v26 = vunpack.c.l.s8.bf16 (!%p5016_p8), %v3666_v15  ;;  %v3743_v20 = vunpack.c.h.s8.bf16 (!%p5016_p8), %v3667_v8  ;;  %v3771_v0 = vunpack.c.l.s8.bf16 (!%p5016_p8), %v3683_v19 }
 0x696   : > { %v3564_v30 = vrot.slane %v3563_v22, 1  ;;  %3854 = vmatprep.subr.bf16.mxu0 (!%p5016_p8), %v3733_v12  ;;  %v3682_v12 = vld [vmem:[%s6834_s25 + $0xd0] sm:$0xff] (!%p5016_p8)  ;;  %v3773_v8 = vunpack.c.h.s8.bf16 (!%p5016_p8), %v3681_v11 }
 0x697   : > { %v3570_v39 = vrot.slane %v3569_v23, 1  ;;  %v3770_v49 = vunpack.c.l.s8.bf16 (!%p5016_p8), %v3682_v12 }
 0x698   : > { %v3565_v25 = vadd.f32 %v3564_v30, %v3563_v22  ;;  %v3669_v22 = vld [vmem:[%s6834_s25 + $0x68] sm:$0xff] (!%p5016_p8)  ;;  %v3740_v30 = vunpack.c.h.s8.bf16 (!%p5016_p8), %v3664_v31  ;;  %v3774_v31 = vunpack.c.h.s8.bf16 (!%p5016_p8), %v3682_v12 }
 0x699   : > { %v3571_v29 = vadd.f32 %v3570_v39, %v3569_v23  ;;  %v3671_v23 = vld [vmem:[%s6834_s25 + $0x78] sm:$0xff] (!%p5016_p8)  ;;  %v3742_v39 = vunpack.c.h.s8.bf16 (!%p5016_p8), %v3666_v15 }
 0x69a   : > { %v3574_v3 = vmul.f32 0.125, %v3565_v25  ;;  %v3745_v25 = vunpack.c.l.s8.bf16 (!%p5016_p8), %v3669_v22 }
 0x69b   : > { %v3575_v33 = vmul.f32 0.125, %v3571_v29  ;;  %v3747_v29 = vunpack.c.l.s8.bf16 (!%p5016_p8), %v3671_v23 }
 0x69c   : > { %v3578_v35 = vadd.f32 1e-05, %v3574_v3  ;;  %v3668_v3 = vld [vmem:[%s6834_s25 + $0x60] sm:$0xff] (!%p5016_p8) }
 0x69d   : > { %v3579_v38 = vadd.f32 1e-05, %v3575_v33  ;;  %v3670_v33 = vld [vmem:[%s6834_s25 + $0x70] sm:$0xff] (!%p5016_p8) }
 0x69e   : > { %5481 = vrsqrt.f32 %v3578_v35  ;;  %v3744_v35 = vunpack.c.l.s8.bf16 (!%p5016_p8), %v3668_v3 }
 0x69f   : > { %5483 = vrsqrt.f32 %v3579_v38  ;;  %v3746_v38 = vunpack.c.l.s8.bf16 (!%p5016_p8), %v3670_v33 }
 0x6a8   : > { %v5482_v41 = vpop.eup %5481 }
 0x6a9   : > { %v5484_v43 = vpop.eup %5483  ;;  %v3586_v45 = vmul.f32 %v5482_v41, %v3542_v13  ;;  %v3732_v13 = vunpack.c.h.s8.bf16 (!%p5016_p8), %v3660_v9  ;;  %v3751_v41 = vunpack.c.h.s8.bf16 (!%p5016_p8), %v3671_v23  ;;  %v3766_v9 = vunpack.c.h.s8.bf16 (!%p5016_p8), %v3678_v1 }
 0x6aa   : > { %v3587_v50 = vmul.f32 %v5484_v43, %v3543_v16  ;;  %v3734_v16 = vunpack.c.h.s8.bf16 (!%p5016_p8), %v3662_v27  ;;  %v3675_v43 = vld [vmem:[%s6834_s25 + $0x98] sm:$0xff] (!%p5016_p8)  ;;  %v3769_v27 = vunpack.c.l.s8.bf16 (!%p5016_p8), %v3681_v11 }
 0x6ab   : > { %v3612_v53 = vmul.f32 %v3601_v24, %v3586_v45  ;;  %3855 = vmatpush1.bf16.msra.mxu0 (!%p5016_p8), %v3732_v13  ;;  %v3749_v24 = vunpack.c.h.s8.bf16 (!%p5016_p8), %v3669_v22  ;;  %v3748_v45 = vunpack.c.h.s8.bf16 (!%p5016_p8), %v3668_v3  ;;  %v3759_v32 = vunpack.c.h.s8.bf16 (!%p5016_p8), %v3675_v43 }
 0x6ac   : > { %v3613_v61 = vmul.f32 %v3605_v42, %v3587_v50  ;;  %3651 = sbr.rel (%p5016_p8) target bundleno = 2095 (0x82f), region = 180  ;;  %3937 = vmatpush1.bf16.msra.mxu1 (!%p5016_p8), %v3734_v16  ;;  %3856 = vmatprep.subr.bf16.mxu0 (!%p5016_p8), %v3737_v17  ;;  %v3673_v42 = vld [vmem:[%s6834_s25 + $0x88] sm:$0xff] (!%p5016_p8)  ;;  %v3775_v13 = vunpack.c.h.s8.bf16 (!%p5016_p8), %v3683_v19  ;;  %v3687_v17 = vld [vmem:[%s6834_s25 + $0xf8] sm:$0xff] (!%p5016_p8) }
 0x6ad   : > { %v3638_v56 = vadd.f32 %v3627_v47, %v3612_v53  ;;  %3938 = vmatprep.subr.bf16.mxu1 (!%p5016_p8), %v3739_v37  ;;  %v3750_v47 = vunpack.c.h.s8.bf16 (!%p5016_p8), %v3670_v33  ;;  %v3753_v50 = vunpack.c.l.s8.bf16 (!%p5016_p8), %v3673_v42  ;;  %v3672_v53 = vld [vmem:[%s6834_s25 + $0x80] sm:$0xff] (!%p5016_p8)  ;;  %v3757_v34 = vunpack.c.h.s8.bf16 (!%p5016_p8), %v3673_v42  ;;  %v3685_v16 = vld [vmem:[%s6834_s25 + $0xe8] sm:$0xff] (!%p5016_p8) }
 0x6ae   : > { %v3639_v57 = vadd.f32 %v3631_v51, %v3613_v61  ;;  %v3755_v51 = vunpack.c.l.s8.bf16 (!%p5016_p8), %v3675_v43  ;;  %v3674_v61 = vld [vmem:[%s6834_s25 + $0x90] sm:$0xff] (!%p5016_p8)  ;;  %v3756_v62 = vunpack.c.h.s8.bf16 (!%p5016_p8), %v3672_v53  ;;  %v3772_v37 = vunpack.c.h.s8.bf16 (!%p5016_p8), %v3680_v10 }
 0x6af   : > { %v7413_v58 = vmax.f32 %v3638_v56, 0.0  ;;  %3857 = vmatpush1.bf16.msra.mxu0 (!%p5016_p8), %v3736_v59  ;;  %v3752_v56 = vunpack.c.l.s8.bf16 (!%p5016_p8), %v3672_v53  ;;  %v3758_v2 = vunpack.c.h.s8.bf16 (!%p5016_p8), %v3674_v61  ;;  %v3777_v15 = vunpack.c.l.s8.bf16 (!%p5016_p8), %v3685_v16 }
 0x6b0   : > { %v7415_v21 = vmax.f32 %v3639_v57, 0.0  ;;  %3939 = vmatpush1.bf16.msra.mxu1 (!%p5016_p8), %v3738_v26  ;;  %3858 = vmatprep.subr.bf16.mxu0 (!%p5016_p8), %v3741_v18  ;;  %v3754_v57 = vunpack.c.l.s8.bf16 (!%p5016_p8), %v3674_v61  ;;  %v3779_v59 = vunpack.c.l.s8.bf16 (!%p5016_p8), %v3687_v17  ;;  %v3684_v26 = vld [vmem:[%s6834_s25 + $0xe0] sm:$0xff] (!%p5016_p8)  ;;  %v3686_v18 = vld [vmem:[%s6834_s25 + $0xf0] sm:$0xff] (!%p5016_p8)  ;;  %v3781_v23 = vunpack.c.h.s8.bf16 (!%p5016_p8), %v3685_v16 }
 0x6b1   : > { %3646 = vst [vmem:[#allocation2 + $0x10] sm:$0xff] %v7413_v58  ;;  %3940 = vmatprep.subr.bf16.mxu1 (!%p5016_p8), %v3743_v20  ;;  %v3776_v20 = vunpack.c.l.s8.bf16 (!%p5016_p8), %v3684_v26  ;;  %v3778_v22 = vunpack.c.l.s8.bf16 (!%p5016_p8), %v3686_v18  ;;  %v3782_v3 = vunpack.c.h.s8.bf16 (!%p5016_p8), %v3686_v18 }
 0x6b2   : > { %3647 = vst [vmem:[#allocation2 + $0x18] sm:$0xff] %v7415_v21  ;;  %v3655_v53 = vpack.c.bf16 (!%p5016_p8), %v7415_v21, %v7415_v21 }
 0x6b3   : > { %3859 = vmatpush1.bf16.msra.mxu0 %v3740_v30  ;;  %v3783_v30 = vunpack.c.h.s8.bf16 %v3687_v17 }
 0x6b4   : > { %3941 = vmatpush1.bf16.msra.mxu1 %v3742_v39  ;;  %3860 = vmatprep.subr.bf16.mxu0 %v3745_v25  ;;  %v3689_v39 = vld [vmem:[%s6834_s25 + $0x108] sm:$0xff]  ;;  %v3691_v25 = vld [vmem:[%s6834_s25 + $0x118] sm:$0xff] }
 0x6b5   : > { %3942 = vmatprep.subr.bf16.mxu1 %v3747_v29  ;;  %v3780_v29 = vunpack.c.h.s8.bf16 %v3684_v26  ;;  %v3785_v33 = vunpack.c.l.s8.bf16 %v3689_v39 }
 0x6b7   : > { %3861 = vmatpush1.bf16.msra.mxu0 %v3744_v35  ;;  %v3787_v35 = vunpack.c.l.s8.bf16 %v3691_v25 }
 0x6b8   : > { %3943 = vmatpush1.bf16.msra.mxu1 %v3746_v38  ;;  %3862 = vmatprep.subr.bf16.mxu0 %v3749_v24  ;;  %v3688_v38 = vld [vmem:[%s6834_s25 + $0x100] sm:$0xff]  ;;  %v3690_v24 = vld [vmem:[%s6834_s25 + $0x110] sm:$0xff] }
 0x6b9   : > { %3944 = vmatprep.subr.bf16.mxu1 %v3751_v41  ;;  %v3652_v41 = vpack.c.bf16 %v7385_v54, %v7385_v54  ;;  %v3784_v42 = vunpack.c.l.s8.bf16 %v3688_v38  ;;  %v3786_v43 = vunpack.c.l.s8.bf16 %v3690_v24  ;;  %v3788_v54 = vunpack.c.h.s8.bf16 %v3688_v38 }
 0x6ba   : > { %v3790_v61 = vunpack.c.h.s8.bf16 %v3690_v24 }
 0x6bb   : > { %3863 = vmatpush1.bf16.msra.mxu0 %v3748_v45  ;;  %v3789_v45 = vunpack.c.h.s8.bf16 %v3689_v39 }
 0x6bc   : > { %3945 = vmatpush1.bf16.msra.mxu1 %v3750_v47  ;;  %3864 = vmatprep.subr.bf16.mxu0 %v3753_v50  ;;  %v3791_v47 = vunpack.c.h.s8.bf16 %v3691_v25  ;;  %v3693_v50 = vld [vmem:[%s6834_s25 + $0x128] sm:$0xff] }
 0x6bd   : > { %3946 = vmatprep.subr.bf16.mxu1 %v3755_v51  ;;  %v3695_v51 = vld [vmem:[%s6834_s25 + $0x138] sm:$0xff]  ;;  %v3797_v63 = vunpack.c.h.s8.bf16 %v3693_v50 }
 0x6bf   : > { %3865 = vmatpush1.bf16.msra.mxu0 %v3752_v56  ;;  %v3793_v56 = vunpack.c.l.s8.bf16 %v3693_v50 }
 0x6c0   : > { %3947 = vmatpush1.bf16.msra.mxu1 %v3754_v57  ;;  %3866 = vmatprep.subr.bf16.mxu0 %v3757_v34  ;;  %v3795_v57 = vunpack.c.l.s8.bf16 %v3695_v51  ;;  %v3692_v34 = vld [vmem:[%s6834_s25 + $0x120] sm:$0xff] }
 0x6c1   : > { %3948 = vmatprep.subr.bf16.mxu1 %v3759_v32  ;;  %v3694_v32 = vld [vmem:[%s6834_s25 + $0x130] sm:$0xff]  ;;  %v3792_v60 = vunpack.c.l.s8.bf16 %v3692_v34 }
 0x6c2   : > { %v3794_v21 = vunpack.c.l.s8.bf16 %v3694_v32  ;;  %v3798_v28 = vunpack.c.h.s8.bf16 %v3694_v32  ;;  %v3712_v32 = vld [vmem:[%s6834_s25 + $0x1c0] sm:$0xff] }
 0x6c3   : > { %3867 = vmatpush1.bf16.msra.mxu0 %v3756_v62  ;;  %v3799_v62 = vunpack.c.h.s8.bf16 %v3695_v51 }
 0x6c4   : > { %3949 = vmatpush1.bf16.msra.mxu1 %v3758_v2  ;;  %3868 = vmatprep.subr.bf16.mxu0 %v3761_v46  ;;  %v3697_v2 = vld [vmem:[%s6834_s25 + $0x148] sm:$0xff]  ;;  %v3699_v46 = vld [vmem:[%s6834_s25 + $0x158] sm:$0xff] }
 0x6c5   : > { %3950 = vmatprep.subr.bf16.mxu1 %v3763_v4  ;;  %v3796_v4 = vunpack.c.h.s8.bf16 %v3692_v34  ;;  %v3801_v1 = vunpack.c.l.s8.bf16 %v3697_v2  ;;  %v3805_v19 = vunpack.c.h.s8.bf16 %v3697_v2 }
 0x6c7   : > { %3869 = vmatpush1.bf16.msra.mxu0 %v3760_v5  ;;  %v3803_v5 = vunpack.c.l.s8.bf16 %v3699_v46 }
 0x6c8   : > { %3951 = vmatpush1.bf16.msra.mxu1 %v3762_v6  ;;  %3870 = vmatprep.subr.bf16.mxu0 %v3765_v7  ;;  %v3696_v6 = vld [vmem:[%s6834_s25 + $0x140] sm:$0xff]  ;;  %v3698_v7 = vld [vmem:[%s6834_s25 + $0x150] sm:$0xff] }
 0x6c9   : > { %3952 = vmatprep.subr.bf16.mxu1 %v3767_v40  ;;  %v3800_v40 = vunpack.c.l.s8.bf16 %v3696_v6  ;;  %v3802_v11 = vunpack.c.l.s8.bf16 %v3698_v7  ;;  %v3806_v10 = vunpack.c.h.s8.bf16 %v3698_v7  ;;  %v3716_v7 = vld [vmem:[%s6834_s25 + $0x1e0] sm:$0xff] }
 0x6cb   : > { %3871 = vmatpush1.bf16.msra.mxu0 %v3764_v44  ;;  %v3807_v44 = vunpack.c.h.s8.bf16 %v3699_v46  ;;  %v3717_v46 = vld [vmem:[%s6834_s25 + $0x1e8] sm:$0xff] }
 0x6cc   : > { %3953 = vmatpush1.bf16.msra.mxu1 %v3766_v9  ;;  %3872 = vmatprep.subr.bf16.mxu0 %v3769_v27  ;;  %v3701_v9 = vld [vmem:[%s6834_s25 + $0x168] sm:$0xff]  ;;  %v3703_v27 = vld [vmem:[%s6834_s25 + $0x178] sm:$0xff] }
 0x6cd   : > { %3954 = vmatprep.subr.bf16.mxu1 %v3771_v0  ;;  %v3804_v0 = vunpack.c.h.s8.bf16 %v3696_v6  ;;  %v3809_v12 = vunpack.c.l.s8.bf16 %v3701_v9  ;;  %v3813_v17 = vunpack.c.h.s8.bf16 %v3701_v9 }
 0x6cf   : > { %3873 = vmatpush1.bf16.msra.mxu0 %v3768_v14  ;;  %v3811_v14 = vunpack.c.l.s8.bf16 %v3703_v27 }
 0x6d0   : > { %3955 = vmatpush1.bf16.msra.mxu1 %v3770_v49  ;;  %3874 = vmatprep.subr.bf16.mxu0 %v3773_v8  ;;  %v3700_v49 = vld [vmem:[%s6834_s25 + $0x160] sm:$0xff]  ;;  %v3702_v8 = vld [vmem:[%s6834_s25 + $0x170] sm:$0xff] }
 0x6d1   : > { %3956 = vmatprep.subr.bf16.mxu1 %v3775_v13  ;;  %v3808_v13 = vunpack.c.l.s8.bf16 %v3700_v49  ;;  %v3810_v16 = vunpack.c.l.s8.bf16 %v3702_v8  ;;  %v3814_v26 = vunpack.c.h.s8.bf16 %v3702_v8 }
 0x6d3   : > { %3875 = vmatpush1.bf16.msra.mxu0 %v3772_v37  ;;  %v3815_v37 = vunpack.c.h.s8.bf16 %v3703_v27  ;;  %v3844_v27 = vunpack.c.h.s8.bf16 %v3716_v7 }
 0x6d4   : > { %3957 = vmatpush1.bf16.msra.mxu1 %v3774_v31  ;;  %3876 = vmatprep.subr.bf16.mxu0 %v3777_v15  ;;  %v3705_v31 = vld [vmem:[%s6834_s25 + $0x188] sm:$0xff]  ;;  %v3707_v15 = vld [vmem:[%s6834_s25 + $0x198] sm:$0xff] }
 0x6d5   : > { %3958 = vmatprep.subr.bf16.mxu1 %v3779_v59  ;;  %v3812_v59 = vunpack.c.h.s8.bf16 %v3700_v49  ;;  %v3817_v18 = vunpack.c.l.s8.bf16 %v3705_v31  ;;  %v3821_v25 = vunpack.c.h.s8.bf16 %v3705_v31 }
 0x6d7   : > { %3877 = vmatpush1.bf16.msra.mxu0 %v3776_v20  ;;  %v3819_v20 = vunpack.c.l.s8.bf16 %v3707_v15 }
 0x6d8   : > { %3959 = vmatpush1.bf16.msra.mxu1 %v3778_v22  ;;  %3878 = vmatprep.subr.bf16.mxu0 %v3781_v23  ;;  %v3704_v22 = vld [vmem:[%s6834_s25 + $0x180] sm:$0xff]  ;;  %v3706_v23 = vld [vmem:[%s6834_s25 + $0x190] sm:$0xff] }
 0x6d9   : > { %3960 = vmatprep.subr.bf16.mxu1 %v3783_v30  ;;  %v3816_v30 = vunpack.c.l.s8.bf16 %v3704_v22  ;;  %v3818_v39 = vunpack.c.l.s8.bf16 %v3706_v23  ;;  %v3822_v38 = vunpack.c.h.s8.bf16 %v3706_v23 }
 0x6db   : > { %3879 = vmatpush1.bf16.msra.mxu0 %v3780_v29  ;;  %v3823_v29 = vunpack.c.h.s8.bf16 %v3707_v15 }
 0x6dc   : > { %3961 = vmatpush1.bf16.msra.mxu1 %v3782_v3  ;;  %3889 = vmatprep.subr.bf16.mxu0 %v3785_v33  ;;  %v3709_v3 = vld [vmem:[%s6834_s25 + $0x1a8] sm:$0xff]  ;;  %v3711_v33 = vld [vmem:[%s6834_s25 + $0x1b8] sm:$0xff] }
 0x6dd   : > { %3971 = vmatprep.subr.bf16.mxu1 %v3787_v35  ;;  %v3820_v35 = vunpack.c.h.s8.bf16 %v3704_v22  ;;  %v3825_v24 = vunpack.c.l.s8.bf16 %v3709_v3  ;;  %v3829_v50 = vunpack.c.h.s8.bf16 %v3709_v3  ;;  %v3831_v51 = vunpack.c.h.s8.bf16 %v3711_v33 }
 0x6de   : > { %3881 = vmatmul.mubr.bf16.vlgmr.msra.gmra.mrb[0].mxu0 %v3652_v41 }
 0x6df   : > { %3963 = vmatmul.mubr.bf16.vlgmr.msra.gmra.mrb[0].mxu1 %v3652_v41  ;;  %3890 = vmatpush1.bf16.msra.mxu0 %v3784_v42  ;;  %v3827_v41 = vunpack.c.l.s8.bf16 %v3711_v33  ;;  %v3708_v42 = vld [vmem:[%s6834_s25 + $0x1a0] sm:$0xff] }
 0x6e0   : > { %3972 = vmatpush1.bf16.msra.mxu1 %v3786_v43  ;;  %3891 = vmatprep.subr.bf16.mxu0 %v3789_v45  ;;  %v3710_v43 = vld [vmem:[%s6834_s25 + $0x1b0] sm:$0xff]  ;;  %v3824_v45 = vunpack.c.l.s8.bf16 %v3708_v42 }
 0x6e1   : > { %3973 = vmatprep.subr.bf16.mxu1 %v3791_v47  ;;  %3921 = vmatprep.mubr.bf16.mxu0 %v3655_v53  ;;  %v3826_v47 = vunpack.c.l.s8.bf16 %v3710_v43 }
 0x6e2   : > { %4003 = vmatprep.mubr.bf16.mxu1 %v3655_v53  ;;  %v3713_v53 = vld [vmem:[%s6834_s25 + $0x1c8] sm:$0xff] }
 0x6e3   : > { %3892 = vmatpush1.bf16.msra.mxu0 %v3788_v54  ;;  %v3715_v54 = vld [vmem:[%s6834_s25 + $0x1d8] sm:$0xff] }
 0x6e4   : > { %3974 = vmatpush1.bf16.msra.mxu1 %v3790_v61  ;;  %3893 = vmatprep.subr.bf16.mxu0 %v3793_v56  ;;  %v3828_v61 = vunpack.c.h.s8.bf16 %v3708_v42  ;;  %v3830_v56 = vunpack.c.h.s8.bf16 %v3710_v43  ;;  %v3835_v34 = vunpack.c.l.s8.bf16 %v3715_v54  ;;  %v3839_v2 = vunpack.c.h.s8.bf16 %v3715_v54 }
 0x6e5   : > { %3975 = vmatprep.subr.bf16.mxu1 %v3795_v57  ;;  %v3833_v57 = vunpack.c.l.s8.bf16 %v3713_v53 }
 0x6e7   : > { %3894 = vmatpush1.bf16.msra.mxu0 %v3792_v60  ;;  %v3714_v60 = vld [vmem:[%s6834_s25 + $0x1d0] sm:$0xff] }
 0x6e8   : > { %3976 = vmatpush1.bf16.msra.mxu1 %v3794_v21  ;;  %3895 = vmatprep.subr.bf16.mxu0 %v3797_v63  ;;  %v3832_v21 = vunpack.c.l.s8.bf16 %v3712_v32  ;;  %v3834_v63 = vunpack.c.l.s8.bf16 %v3714_v60 }
 0x6e9   : > { %3977 = vmatprep.subr.bf16.mxu1 %v3799_v62  ;;  %v3837_v62 = vunpack.c.h.s8.bf16 %v3713_v53 }
 0x6eb   : > { %3896 = vmatpush1.bf16.msra.mxu0 %v3796_v4  ;;  %v3719_v4 = vld [vmem:[%s6834_s25 + $0x1f8] sm:$0xff] }
 0x6ec   : > { %3978 = vmatpush1.bf16.msra.mxu1 %v3798_v28  ;;  %3897 = vmatprep.subr.bf16.mxu0 %v3801_v1  ;;  %v3836_v28 = vunpack.c.h.s8.bf16 %v3712_v32  ;;  %v3838_v1 = vunpack.c.h.s8.bf16 %v3714_v60  ;;  %v3843_v6 = vunpack.c.l.s8.bf16 %v3719_v4  ;;  %v3847_v9 = vunpack.c.h.s8.bf16 %v3719_v4 }
 0x6ed   : > { %3979 = vmatprep.subr.bf16.mxu1 %v3803_v5  ;;  %v3841_v5 = vunpack.c.l.s8.bf16 %v3717_v46 }
 0x6ef   : > { %3898 = vmatpush1.bf16.msra.mxu0 %v3800_v40  ;;  %v3718_v40 = vld [vmem:[%s6834_s25 + $0x1f0] sm:$0xff]  ;;  %s7749_s25 = scalar_lea.vmem [#allocation22], %s6840_s14 }
 0x6f0   : > { %3980 = vmatpush1.bf16.msra.mxu1 %v3802_v11  ;;  %3899 = vmatprep.subr.bf16.mxu0 %v3805_v19  ;;  %v3840_v11 = vunpack.c.l.s8.bf16 %v3716_v7  ;;  %v3842_v19 = vunpack.c.l.s8.bf16 %v3718_v40 }
 0x6f1   : > { %3981 = vmatprep.subr.bf16.mxu1 %v3807_v44  ;;  %v3845_v44 = vunpack.c.h.s8.bf16 %v3717_v46 }
 0x6f3   : > { %3900 = vmatpush1.bf16.msra.mxu0 %v3804_v0  ;;  %v3846_v0 = vunpack.c.h.s8.bf16 %v3718_v40 }
 0x6f4   : > { %3982 = vmatpush1.bf16.msra.mxu1 %v3806_v10  ;;  %3901 = vmatprep.subr.bf16.mxu0 %v3809_v12  ;;  %v3654_v10 = vpack.c.bf16 %v7413_v58, %v7413_v58  ;;  %v4012_v12 = vld [vmem:[%s7746_s24] sm:$0xf] }
 0x6f5   : > { %3983 = vmatprep.subr.bf16.mxu1 %v3811_v14  ;;  %v4038_v14 = vld [vmem:[%s7747_s27] sm:$0xf]  ;;  %v4017_v49 = vrot.slane %v4012_v12, %v6988_v48  ;;  %v4025_v8 = vrot.slane %v4012_v12, %v7392_v36 }
 0x6f6   : > { %v4051_v58 = vrot.slane %v4038_v14, %v7392_v36  ;;  %v4047_v15 = vrot.slane %v4038_v14, %v6991_v52 }
 0x6f7   : > { %3902 = vmatpush1.bf16.msra.mxu0 %v3808_v13  ;;  %v4021_v13 = vrot.slane %v4012_v12, %v6991_v52 }
 0x6f8   : > { %3984 = vmatpush1.bf16.msra.mxu1 %v3810_v16  ;;  %3903 = vmatprep.subr.bf16.mxu0 %v3813_v17  ;;  %v4029_v16 = vrot.slane %v4012_v12, %v7395_v55  ;;  %v4043_v17 = vrot.slane %v4038_v14, %v6988_v48 }
 0x6f9   : > { %3985 = vmatprep.subr.bf16.mxu1 %v3815_v37 }
 0x6fb   : > { %3904 = vmatpush1.bf16.msra.mxu0 %v3812_v59  ;;  %v4055_v59 = vrot.slane %v4038_v14, %v7395_v55 }
 0x6fc   : > { %3986 = vmatpush1.bf16.msra.mxu1 %v3814_v26  ;;  %3905 = vmatprep.subr.bf16.mxu0 %v3817_v18 }
 0x6fd   : > { %3987 = vmatprep.subr.bf16.mxu1 %v3819_v20 }
 0x6ff   : > { %3906 = vmatpush1.bf16.msra.mxu0 %v3816_v30 }
 0x700   : > { %3988 = vmatpush1.bf16.msra.mxu1 %v3818_v39  ;;  %3907 = vmatprep.subr.bf16.mxu0 %v3821_v25 }
 0x701   : > { %3989 = vmatprep.subr.bf16.mxu1 %v3823_v29 }
 0x703   : > { %3908 = vmatpush1.bf16.msra.mxu0 %v3820_v35 }
 0x704   : > { %3990 = vmatpush1.bf16.msra.mxu1 %v3822_v38  ;;  %3909 = vmatprep.subr.bf16.mxu0 %v3825_v24 }
 0x705   : > { %3991 = vmatprep.subr.bf16.mxu1 %v3827_v41 }
 0x707   : > { %3910 = vmatpush1.bf16.msra.mxu0 %v3824_v45 }
 0x708   : > { %3992 = vmatpush1.bf16.msra.mxu1 %v3826_v47  ;;  %3911 = vmatprep.subr.bf16.mxu0 %v3829_v50 }
 0x709   : > { %3993 = vmatprep.subr.bf16.mxu1 %v3831_v51 }
 0x70b   : > { %3912 = vmatpush1.bf16.msra.mxu0 %v3828_v61 }
 0x70c   : > { %3994 = vmatpush1.bf16.msra.mxu1 %v3830_v56  ;;  %3913 = vmatprep.subr.bf16.mxu0 %v3833_v57 }
 0x70d   : > { %3995 = vmatprep.subr.bf16.mxu1 %v3835_v34 }
 0x70f   : > { %3914 = vmatpush1.bf16.msra.mxu0 %v3832_v21 }
 0x710   : > { %3996 = vmatpush1.bf16.msra.mxu1 %v3834_v63  ;;  %3915 = vmatprep.subr.bf16.mxu0 %v3837_v62 }
 0x711   : > { %3997 = vmatprep.subr.bf16.mxu1 %v3839_v2 }
 0x713   : > { %3916 = vmatpush1.bf16.msra.mxu0 %v3836_v28 }
 0x714   : > { %3998 = vmatpush1.bf16.msra.mxu1 %v3838_v1  ;;  %3917 = vmatprep.subr.bf16.mxu0 %v3841_v5 }
 0x715   : > { %3999 = vmatprep.subr.bf16.mxu1 %v3843_v6 }
 0x717   : > { %3918 = vmatpush1.bf16.msra.mxu0 %v3840_v11 }
 0x718   : > { %4000 = vmatpush1.bf16.msra.mxu1 %v3842_v19  ;;  %3919 = vmatprep.subr.bf16.mxu0 %v3845_v44 }
 0x719   : > { %4001 = vmatprep.subr.bf16.mxu1 %v3847_v9 }
 0x71b   : > { %3920 = vmatpush1.bf16.msra.mxu0 %v3844_v27 }
 0x71c   : > { %4002 = vmatpush1.bf16.msra.mxu1 %v3846_v0 }
 0x71e   : > { %3922 = vmatmul.mubr.bf16.vlgmr.msra.gmra.mrb[0].mxu0 %v3654_v10 }
 0x71f   : > { %4004 = vmatmul.mubr.bf16.vlgmr.msra.gmra.mrb[0].mxu1 %v3654_v10 }
 0x7f1   : > { %v3923_v37 = vpop.f32.mrb[0].mxu0 }
 0x7f2   : > { %v4005_v31 = vpop.f32.mrb[0].mxu1  ;;  %v4034_v26 = vmul.f32 %v4017_v49, %v3923_v37  ;;  %v3925_v20 = vpop.f32.mrb[1].mxu0 }
 0x7f3   : > { %v4036_v18 = vmul.f32 %v4025_v8, %v4005_v31  ;;  %v4007_v22 = vpop.f32.mrb[1].mxu1  ;;  %v4035_v23 = vmul.f32 %v4021_v13, %v3925_v20  ;;  %v3927_v39 = vpop.f32.mrb[2].mxu0 }
 0x7f4   : > { %v4037_v30 = vmul.f32 %v4029_v16, %v4007_v22  ;;  %v4009_v25 = vpop.f32.mrb[2].mxu1  ;;  %v4060_v29 = vadd.f32 %v4043_v17, %v4034_v26  ;;  %v3928_v33 = vpop.f32.mrb[3].mxu0 }
 0x7f5   : > { %v4062_v3 = vadd.f32 %v4051_v58, %v4036_v18  ;;  %v4010_v35 = vpop.f32.mrb[3].mxu1  ;;  %v4061_v38 = vadd.f32 %v4047_v15, %v4035_v23 }
 0x7f6   : > { %v4063_v24 = vadd.f32 %v4055_v59, %v4037_v30  ;;  %v4064_v41 = vrot.slane %v4060_v29, 4 }
 0x7f7   : > { %v4076_v42 = vrot.slane %v4062_v3, 4  ;;  %v4070_v43 = vrot.slane %v4061_v38, 4 }
 0x7f8   : > { %v4082_v45 = vrot.slane %v4063_v24, 4  ;;  %v4065_v47 = vadd.f32 %v4064_v41, %v4060_v29 }
 0x7f9   : > { %v4077_v50 = vadd.f32 %v4076_v42, %v4062_v3  ;;  %v4071_v51 = vadd.f32 %v4070_v43, %v4061_v38 }
 0x7fa   : > { %v4083_v53 = vadd.f32 %v4082_v45, %v4063_v24  ;;  %v4066_v54 = vrot.slane %v4065_v47, 2 }
 0x7fb   : > { %v4078_v61 = vrot.slane %v4077_v50, 2  ;;  %v4072_v56 = vrot.slane %v4071_v51, 2 }
 0x7fc   : > { %v4084_v57 = vrot.slane %v4083_v53, 2  ;;  %v4067_v34 = vadd.f32 %v4066_v54, %v4065_v47  ;;  %v4140_v54 = vld [vmem:[%s7748_s15] sm:$0xf] }
 0x7fd   : > { %v4079_v32 = vadd.f32 %v4078_v61, %v4077_v50  ;;  %v4073_v60 = vadd.f32 %v4072_v56, %v4071_v51  ;;  %v4166_v61 = vld [vmem:[%s7749_s25] sm:$0xf]  ;;  %v4145_v56 = vrot.slane %v4140_v54, %v6988_v48 }
 0x7fe   : > { %v4085_v21 = vadd.f32 %v4084_v57, %v4083_v53  ;;  %v4068_v63 = vrot.slane %v4067_v34, 1 }
 0x7ff   : > { %v4080_v62 = vrot.slane %v4079_v32, 1  ;;  %v4074_v2 = vrot.slane %v4073_v60, 1 }
 0x800   : > { %v4086_v46 = vrot.slane %v4085_v21, 1  ;;  %v4069_v4 = vadd.f32 %v4068_v63, %v4067_v34  ;;  %v4153_v34 = vrot.slane %v4140_v54, %v7392_v36  ;;  %v4149_v63 = vrot.slane %v4140_v54, %v6991_v52 }
 0x801   : > { %v4081_v28 = vadd.f32 %v4080_v62, %v4079_v32  ;;  %v4075_v1 = vadd.f32 %v4074_v2, %v4073_v60 }
 0x802   : > { %v4087_v5 = vadd.f32 %v4086_v46, %v4085_v21  ;;  %v4088_v6 = vmul.f32 0.125, %v4069_v4  ;;  %v4171_v21 = vrot.slane %v4166_v61, %v6988_v48  ;;  %v4179_v46 = vrot.slane %v4166_v61, %v7392_v36 }
 0x803   : > { %v4090_v7 = vmul.f32 0.125, %v4081_v28  ;;  %v4089_v40 = vmul.f32 0.125, %v4075_v1  ;;  %v4157_v4 = vrot.slane %v4140_v54, %v7395_v55 }
 0x804   : > { %v4091_v11 = vmul.f32 0.125, %v4087_v5  ;;  %v4092_v19 = vsub.f32 %v4060_v29, %v4088_v6  ;;  %v4175_v6 = vrot.slane %v4166_v61, %v6991_v52 }
 0x805   : > { %v4094_v44 = vsub.f32 %v4062_v3, %v4090_v7  ;;  %v4093_v9 = vsub.f32 %v4061_v38, %v4089_v40 }
 0x806   : > { %v4095_v27 = vsub.f32 %v4063_v24, %v4091_v11  ;;  %v4096_v0 = vmul.f32 %v4092_v19, %v4092_v19  ;;  %v4183_v11 = vrot.slane %v4166_v61, %v7395_v55 }
 0x807   : > { %v4098_v10 = vmul.f32 %v4094_v44, %v4094_v44  ;;  %v4097_v12 = vmul.f32 %v4093_v9, %v4093_v9 }
 0x808   : > { %v4099_v14 = vmul.f32 %v4095_v27, %v4095_v27  ;;  %v4100_v49 = vrot.slane %v4096_v0, 4 }
 0x809   : > { %v4112_v8 = vrot.slane %v4098_v10, 4  ;;  %v4106_v13 = vrot.slane %v4097_v12, 4 }
 0x80a   : > { %v4118_v16 = vrot.slane %v4099_v14, 4  ;;  %v4101_v17 = vadd.f32 %v4100_v49, %v4096_v0 }
 0x80b   : > { %v4113_v58 = vadd.f32 %v4112_v8, %v4098_v10  ;;  %v4107_v37 = vadd.f32 %v4106_v13, %v4097_v12 }
 0x80c   : > { %v4119_v31 = vadd.f32 %v4118_v16, %v4099_v14  ;;  %v4102_v15 = vrot.slane %v4101_v17, 2 }
 0x80d   : > { %v4114_v59 = vrot.slane %v4113_v58, 2  ;;  %v4108_v26 = vrot.slane %v4107_v37, 2 }
 0x80e   : > { %v4120_v18 = vrot.slane %v4119_v31, 2  ;;  %v4103_v20 = vadd.f32 %v4102_v15, %v4101_v17 }
 0x80f   : > { %v4115_v22 = vadd.f32 %v4114_v59, %v4113_v58  ;;  %v4109_v23 = vadd.f32 %v4108_v26, %v4107_v37 }
 0x810   : > { %v4121_v30 = vadd.f32 %v4120_v18, %v4119_v31  ;;  %v4104_v39 = vrot.slane %v4103_v20, 1 }
 0x811   : > { %v4116_v25 = vrot.slane %v4115_v22, 1  ;;  %v4110_v29 = vrot.slane %v4109_v23, 1 }
 0x812   : > { %v4122_v3 = vrot.slane %v4121_v30, 1  ;;  %v4105_v33 = vadd.f32 %v4104_v39, %v4103_v20 }
 0x813   : > { %v4117_v35 = vadd.f32 %v4116_v25, %v4115_v22  ;;  %v4111_v38 = vadd.f32 %v4110_v29, %v4109_v23 }
 0x814   : > { %v4123_v24 = vadd.f32 %v4122_v3, %v4121_v30  ;;  %v4124_v41 = vmul.f32 0.125, %v4105_v33 }
 0x815   : > { %v4126_v42 = vmul.f32 0.125, %v4117_v35  ;;  %v4125_v43 = vmul.f32 0.125, %v4111_v38 }
 0x816   : > { %v4127_v45 = vmul.f32 0.125, %v4123_v24  ;;  %v4128_v47 = vadd.f32 1e-05, %v4124_v41 }
 0x817   : > { %v4130_v50 = vadd.f32 1e-05, %v4126_v42  ;;  %v4129_v51 = vadd.f32 1e-05, %v4125_v43 }
 0x818   : > { %v4131_v53 = vadd.f32 1e-05, %v4127_v45  ;;  %5485 = vrsqrt.f32 %v4128_v47 }
 0x819   : > { %5487 = vrsqrt.f32 %v4130_v50 }
 0x81a   : > { %5489 = vrsqrt.f32 %v4129_v51 }
 0x81b   : > { %5491 = vrsqrt.f32 %v4131_v53 }
 0x822   : > { %v5486_v57 = vpop.eup %5485 }
 0x823   : > { %v5488_v32 = vpop.eup %5487  ;;  %v4136_v60 = vmul.f32 %v5486_v57, %v4092_v19 }
 0x824   : > { %v5490_v62 = vpop.eup %5489  ;;  %v4138_v2 = vmul.f32 %v5488_v32, %v4094_v44 }
 0x825   : > { %v5492_v28 = vpop.eup %5491  ;;  %v4162_v1 = vmul.f32 %v4145_v56, %v4136_v60  ;;  %v4137_v5 = vmul.f32 %v5490_v62, %v4093_v9 }
 0x826   : > { %v4164_v7 = vmul.f32 %v4153_v34, %v4138_v2  ;;  %v4139_v40 = vmul.f32 %v5492_v28, %v4095_v27 }
 0x827   : > { %v4188_v19 = vadd.f32 %v4171_v21, %v4162_v1  ;;  %v4163_v0 = vmul.f32 %v4149_v63, %v4137_v5 }
 0x828   : > { %v4190_v48 = vadd.f32 %v4179_v46, %v4164_v7  ;;  %v4165_v10 = vmul.f32 %v4157_v4, %v4139_v40 }
 0x829   : > { %v4192_v12 = vmax.f32 %v4188_v19, 0.0  ;;  %v4189_v14 = vadd.f32 %v4175_v6, %v4163_v0 }
 0x82a   : > { %v4194_v44 = vmax.f32 %v4190_v48, 0.0  ;;  %v4191_v49 = vadd.f32 %v4183_v11, %v4165_v10 }
 0x82b   : > { %4196 = vst [vmem:[#allocation2] sm:$0xff] %v4192_v12  ;;  %v4193_v36 = vmax.f32 %v4189_v14, 0.0 }
 0x82c   : > { %4198 = vst [vmem:[#allocation2 + $0x10] sm:$0xff] %v4194_v44  ;;  %v4195_v8 = vmax.f32 %v4191_v49, 0.0 }
 0x82d   : > { %4197 = vst [vmem:[#allocation2 + $0x8] sm:$0xff] %v4193_v36 }
 0x82e   : > { %4199 = vst [vmem:[#allocation2 + $0x18] sm:$0xff] %v4195_v8 }
 0x82f PF: > { %v5493_v52 = vld [vmem:[%s6856_s20 + $0x40] sm:$0xff]   ;;  %v5497_v13 = vld [vmem:[%s6856_s20 + $0x48] sm:$0xff]   ;;  %v5501_v37 = vld [vmem:[%s6856_s20 + $0x50] sm:$0xff]   ;;  %s7750_s14 = scalar_lea.vmem [#allocation23], %s6817_s13  ;;  %vm4551_vm4 = vcmask 23552  }
 0x830   : > { %v5494_v55 = vld [vmem:[%s6856_s20 + $0xc0] sm:$0xff]   ;;  %5071 = vmatprep.subr.bf16.mxu0 %v5493_v52  ;;  %v5498_v16 = vld [vmem:[%s6856_s20 + $0xc8] sm:$0xff]   ;;  %v5502_v31 = vld [vmem:[%s6856_s20 + $0xd0] sm:$0xff]  }
 0x831   : > { %v5495_v9 = vld [vmem:[%s6856_s20] sm:$0xff]   ;;  %5093 = vmatprep.subr.bf16.mxu1 %v5494_v55  ;;  %v5499_v17 = vld [vmem:[%s6856_s20 + $0x8] sm:$0xff]   ;;  %v5503_v15 = vld [vmem:[%s6856_s20 + $0x10] sm:$0xff]  }
 0x832   : > { %v5496_v27 = vld [vmem:[%s6856_s20 + $0x80] sm:$0xff]   ;;  %5072 = vmatpush3.bf16.msra.mxu0 %v5495_v9  ;;  %v5500_v58 = vld [vmem:[%s6856_s20 + $0x88] sm:$0xff]   ;;  %v5504_v59 = vld [vmem:[%s6856_s20 + $0x90] sm:$0xff]  }
 0x833   : > { %5094 = vmatpush3.bf16.msra.mxu1 %v5496_v27  ;;  %5073 = vmatprep.subr.bf16.mxu0 %v5497_v13  ;;  %v5505_v26 = vld [vmem:[%s6856_s20 + $0x58] sm:$0xff]   ;;  %v5509_v23 = vld [vmem:[%s6856_s20 + $0x60] sm:$0xff]   ;;  %v5513_v29 = vld [vmem:[%s6856_s20 + $0x68] sm:$0xff]  }
 0x834   : > { %5095 = vmatprep.subr.bf16.mxu1 %v5498_v16  ;;  %v5506_v18 = vld [vmem:[%s6856_s20 + $0xd8] sm:$0xff]   ;;  %v5510_v30 = vld [vmem:[%s6856_s20 + $0xe0] sm:$0xff]   ;;  %v5514_v3 = vld [vmem:[%s6856_s20 + $0xe8] sm:$0xff]  }
 0x835   : > { %v5507_v20 = vld [vmem:[%s6856_s20 + $0x18] sm:$0xff]   ;;  %v5511_v39 = vld [vmem:[%s6856_s20 + $0x20] sm:$0xff]   ;;  %v5515_v33 = vld [vmem:[%s6856_s20 + $0x28] sm:$0xff]  }
 0x836   : > { %5074 = vmatpush3.bf16.msra.mxu0 %v5499_v17  ;;  %v5508_v22 = vld [vmem:[%s6856_s20 + $0x98] sm:$0xff]   ;;  %v5512_v25 = vld [vmem:[%s6856_s20 + $0xa0] sm:$0xff]   ;;  %v5516_v35 = vld [vmem:[%s6856_s20 + $0xa8] sm:$0xff]  }
 0x837   : > { %5096 = vmatpush3.bf16.msra.mxu1 %v5500_v58  ;;  %5075 = vmatprep.subr.bf16.mxu0 %v5501_v37  ;;  %v5517_v38 = vld [vmem:[%s6856_s20 + $0x70] sm:$0xff]   ;;  %v5521_v43 = vld [vmem:[%s6856_s20 + $0x78] sm:$0xff]   ;;  %v4201_v51 = vld [vmem:[#allocation2 + $0x8] sm:$0xff] }
 0x838   : > { %5097 = vmatprep.subr.bf16.mxu1 %v5502_v31  ;;  %v5518_v24 = vld [vmem:[%s6856_s20 + $0xf0] sm:$0xff]   ;;  %v5522_v45 = vld [vmem:[%s6856_s20 + $0xf8] sm:$0xff]   ;;  %v4200_v54 = vld [vmem:[#allocation2] sm:$0xff]  ;;  %v4205_v61 = vpack.c.bf16 %v4201_v51, %v4201_v51 }
 0x839   : > { %v5519_v41 = vld [vmem:[%s6856_s20 + $0x30] sm:$0xff]   ;;  %v5523_v47 = vld [vmem:[%s6856_s20 + $0x38] sm:$0xff]   ;;  %v4204_v57 = vpack.c.bf16 %v4200_v54, %v4200_v54  ;;  %v5017_v63 = vld [vmem:[%s7750_s14] ss:$0 sm:$0xff] }
 0x83a   : > { %5076 = vmatpush3.bf16.msra.mxu0 %v5503_v15  ;;  %v5520_v42 = vld [vmem:[%s6856_s20 + $0xb0] sm:$0xff]   ;;  %v5524_v50 = vld [vmem:[%s6856_s20 + $0xb8] sm:$0xff]   ;;  %4503 = vmatprep.mubr.bf16.mxu0 %v4205_v61 }
 0x83b   : > { %5098 = vmatpush3.bf16.msra.mxu1 %v5504_v59  ;;  %5077 = vmatprep.subr.bf16.mxu0 %v5505_v26  ;;  %v4203_v53 = vld [vmem:[#allocation2 + $0x18] sm:$0xff]  ;;  %v4202_v34 = vld [vmem:[#allocation2 + $0x10] sm:$0xff] }
 0x83c   : > { %5099 = vmatprep.subr.bf16.mxu1 %v5506_v18  ;;  %v4207_v56 = vpack.c.bf16 %v4203_v53, %v4203_v53  ;;  %v4206_v32 = vpack.c.bf16 %v4202_v34, %v4202_v34 }
 0x83e   : > { %5078 = vmatpush3.bf16.msra.mxu0 %v5507_v20  ;;  %4543 = vmatprep.mubr.bf16.mxu1 %v4207_v56 }
 0x83f   : > { %5100 = vmatpush3.bf16.msra.mxu1 %v5508_v22  ;;  %5079 = vmatprep.subr.bf16.mxu0 %v5509_v23 }
 0x840   : > { %5101 = vmatprep.subr.bf16.mxu1 %v5510_v30 }
 0x842   : > { %5080 = vmatpush3.bf16.msra.mxu0 %v5511_v39 }
 0x843   : > { %5102 = vmatpush3.bf16.msra.mxu1 %v5512_v25  ;;  %5081 = vmatprep.subr.bf16.mxu0 %v5513_v29 }
 0x844   : > { %5103 = vmatprep.subr.bf16.mxu1 %v5514_v3 }
 0x846   : > { %5082 = vmatpush3.bf16.msra.mxu0 %v5515_v33 }
 0x847   : > { %5104 = vmatpush3.bf16.msra.mxu1 %v5516_v35  ;;  %5083 = vmatprep.subr.bf16.mxu0 %v5517_v38 }
 0x848   : > { %5105 = vmatprep.subr.bf16.mxu1 %v5518_v24 }
 0x84a   : > { %5084 = vmatpush3.bf16.msra.mxu0 %v5519_v41 }
 0x84b   : > { %5106 = vmatpush3.bf16.msra.mxu1 %v5520_v42  ;;  %5085 = vmatprep.subr.bf16.mxu0 %v5521_v43 }
 0x84c   : > { %5107 = vmatprep.subr.bf16.mxu1 %v5522_v45 }
 0x84e   : > { %5086 = vmatpush3.bf16.msra.mxu0 %v5523_v47 }
 0x84f   : > { %5108 = vmatpush3.bf16.msra.mxu1 %v5524_v50 }
 0x851   : > { %4504 = vmatmul.mubr.bf16.vlgmr.msra.gmra.mrb[0].mxu0 %v4204_v57 }
 0x852   : > { %4544 = vmatmul.mubr.bf16.vlgmr.msra.gmra.mrb[0].mxu1 %v4206_v32 }
 0x924   : > { %v5087_v60 = vpop.f32.mrb[0].mxu0 }
 0x925   : > { %v5109_v21 = vpop.f32.mrb[0].mxu1  ;;  %v5088_v62 = vpop.f32.mrb[1].mxu0 }
 0x926   : > { %v5110_v2 = vpop.f32.mrb[1].mxu1  ;;  %v5089_v46 = vadd.f32 %v5088_v62, %v5087_v60  ;;  %v5090_v28 = vpop.f32.mrb[2].mxu0 }
 0x927   : > { %v5111_v4 = vadd.f32 %v5110_v2, %v5109_v21  ;;  %v5112_v1 = vpop.f32.mrb[2].mxu1  ;;  %v5091_v5 = vpop.f32.mrb[3].mxu0 }
 0x928   : > { %v5113_v6 = vpop.f32.mrb[3].mxu1  ;;  %v4506_v7 = vadd.f32 %v5089_v46, %v5017_v63 }
 0x92a   : > { %v4546_v40 = vadd.f32 %v5111_v4, %v4506_v7 }
 0x92c   : > { %4552 = vst.msk [vmem:[%s6861_s2] sm:$0xff] %vm4551_vm4, %v4546_v40 }
 0x92d PF: > { %s7751_s30 = sld [smem:[#allocation31_spill]]  ;;  %s7752_s4 = sld [smem:[#allocation32_spill]] }
 0x92e   : > { %s7753_s0 = sld [smem:[#allocation36_spill]]  ;;  %p33_p13 = scmp.ge.s32.totalorder %s6303_s26, 5  }
 0x92f   : > { %s7754_s3 = smov %s6085_s28  ;;  %s7755_s28 = smov %s6089_s29 }
 0x930   : > { %s7756_s29 = smov %s6525_s10  ;;  %s7757_s23 = smov %s6303_s26 }
 0x931   :  { %35 = sbr.rel (!%p33_p13) target bundleno = 31 (0x1f), region = 288 }
 0x938   :  { %4572 = vsyncpa [#allocation4], 1 }
 0x939   :  { %4574 = vsyncpa [#allocation4 + $0x1], 1 }
 0x93a   :  { %4575 = vsyncpa [#allocation6], 1 }
 0x93b   :  { %4576 = vsyncpa [#allocation9], 1 }
 0x93c   :  { %4577 = vsyncpa [#allocation12], 1 }

</bundles_post_ra>
